<compile_context>
chip_gen: v7x
topology: tpu7x:2x2x1
jax: 0.10.0
libtpu: 0.0.40
codegen_flags: <defaults>
</compile_context>

<pallas_src>
import functools

import numpy as np
import jax
import jax.numpy as jnp
from jax.experimental import pallas as pl
from jax.experimental.pallas import tpu as pltpu


# ----------------------------- Pallas kernel -----------------------------

def _encoder_kernel(p1_ref, w1_ref, b1_ref,
                    g2_ref, w2_ref, b2_ref, gamma_ref, beta_ref,
                    g3_ref, w3_ref, b3_ref,
                    w4_ref, b4_ref, w5_ref, b5_ref,
                    o_ref, *, n_batch, eps):
    f32 = jnp.float32

    # Hoist all (tiny) constants into values once.
    w1 = w1_ref[...]                    # (9, 8)
    w2 = w2_ref[...]                    # (9, 8, 16)   per-tap conv2 weights
    w3 = w3_ref[...]                    # (9, 16, 32)  per-tap conv3 weights
    w4 = w4_ref[...]                    # (9, 32, 128) per-position lin1 weights
    w5 = w5_ref[...]                    # (128, esd)
    b1, b2, b3 = b1_ref[...], b2_ref[...], b3_ref[...]
    b4, b5 = b4_ref[...], b5_ref[...]
    gamma, beta = gamma_ref[...], beta_ref[...]
    # Per-image 0/1 im2col gathers (stored bf16 -> exact), rows ordered (tap, out_pos).
    g2 = g2_ref[...].astype(f32)        # (441, 196)
    g3 = g3_ref[...].astype(f32)        # (81, 49)

    # ---- Conv2d(1, 8, 3, s=2, p=1) + ReLU : per-image (196, 9) @ (9, 8) ----
    y1 = []
    for n in range(n_batch):
        y = jnp.dot(p1_ref[n], w1, preferred_element_type=f32) + b1
        y1.append(jnp.maximum(y, 0.0))                                   # (196, 8)

    # ---- Conv2d(8, 16, 3, s=2, p=1): gather-first im2col, then per-tap matmuls ----
    acc2 = []
    for n in range(n_batch):
        pat = jnp.dot(g2, y1[n], preferred_element_type=f32)             # (441, 8)
        a = jnp.zeros((49, 16), f32)
        for t in range(9):
            a = a + jnp.dot(pat[t * 49:(t + 1) * 49, :], w2[t],
                            preferred_element_type=f32)
        acc2.append(a + b2)                                               # (49, 16)

    # ---- BatchNorm2d(16): training-mode batch stats, two-pass (numerically safe) ----
    m2 = float(n_batch * 49)
    s = jnp.zeros((1, 16), f32)
    for n in range(n_batch):
        s = s + jnp.sum(acc2[n], axis=0, keepdims=True)
    mean = s / m2
    s = jnp.zeros((1, 16), f32)
    for n in range(n_batch):
        d = acc2[n] - mean
        s = s + jnp.sum(d * d, axis=0, keepdims=True)
    var = s / m2
    scale = gamma * jax.lax.rsqrt(var + eps)                              # (1, 16)
    shift = beta - mean * scale                                           # (1, 16)

    # ---- ReLU -> Conv2d(16, 32, 3, s=2, p=0)+ReLU -> Flatten -> Linear stack ----
    for n in range(n_batch):
        y2 = jnp.maximum(acc2[n] * scale + shift, 0.0)                    # (49, 16)

        pat = jnp.dot(g3, y2, preferred_element_type=f32)                 # (81, 16)
        a3 = jnp.zeros((9, 32), f32)
        for t in range(9):
            a3 = a3 + jnp.dot(pat[t * 9:(t + 1) * 9, :], w3[t],
                              preferred_element_type=f32)
        a3 = jnp.maximum(a3 + b3, 0.0)                                    # (9, 32)

        # Linear(288, 128) + ReLU; PyTorch (c, h, w) flatten folded into w4[p].
        h = jnp.zeros((1, 128), f32)
        for p in range(9):
            h = h + jnp.dot(a3[p:p + 1, :], w4[p], preferred_element_type=f32)
        h = jnp.maximum(h + b4, 0.0)                                      # (1, 128)

        # Linear(128, esd) + Tanh
        out = jnp.tanh(jnp.dot(h, w5, preferred_element_type=f32) + b5)   # (1, esd)
        o_ref[pl.ds(n, 1), :] = out.astype(o_ref.dtype)


# ----------------------------- Pallas wrapper -----------------------------

def encoder_pallas(p1, kp):
    n_batch = p1.shape[0]
    esd = kp["w5"].shape[1]

    args = (p1, kp["w1"], kp["b1"],
            kp["g2"], kp["w2"], kp["b2"], kp["gamma"], kp["beta"],
            kp["g3"], kp["w3"], kp["b3"],
            kp["w4"], kp["b4"], kp["w5"], kp["b5"])

    vmem = pl.BlockSpec(memory_space=pltpu.MemorySpace.VMEM)
    kernel = functools.partial(_encoder_kernel, n_batch=n_batch, eps=1e-5)

    return pl.pallas_call(
        kernel,
        out_shape=jax.ShapeDtypeStruct((n_batch, esd), jnp.float32),
        in_specs=[vmem] * len(args),
        out_specs=vmem,
    )(*args)


def _conv1_patches(x):
    """x: (N, 1, 28, 28) NCHW -> (N, 196, 9); rows (oh, ow), cols t = kh*3 + kw."""
    n = x.shape[0]
    xp = jnp.pad(x[:, 0], ((0, 0), (1, 1), (1, 1)))          # (N, 30, 30)
    taps = [xp[:, kh:kh + 28:2, kw:kw + 28:2]                 # (N, 14, 14) each
            for kh in range(3) for kw in range(3)]
    return jnp.stack(taps, axis=-1).reshape(n, 14 * 14, 9)


def encoder_forward(x, kp):
    # Only conv1's im2col runs as (cheap) XLA glue on the raw HBM input; everything
    # else is inside the single fused Pallas kernel.
    return encoder_pallas(_conv1_patches(x), kp)


# --------------------- parameters & constant gather matrices ---------------------

def init_params(key, encoded_space_dim):
    """PyTorch-default-style init, PyTorch layouts (Conv: OIHW, Linear: (out, in))."""
    def uniform(k, shape, fan_in):
        bound = 1.0 / (fan_in ** 0.5)
        return jax.random.uniform(k, shape, jnp.float32, -bound, bound)

    keys = jax.random.split(key, 10)
    return {
        "conv1_w": uniform(keys[0], (8, 1, 3, 3), 1 * 9),
        "conv1_b": uniform(keys[1], (8,), 1 * 9),
        "conv2_w": uniform(keys[2], (16, 8, 3, 3), 8 * 9),
        "conv2_b": uniform(keys[3], (16,), 8 * 9),
        "bn_gamma": jnp.ones((16,), jnp.float32),
        "bn_beta": jnp.zeros((16,), jnp.float32),
        "conv3_w": uniform(keys[4], (32, 16, 3, 3), 16 * 9),
        "conv3_b": uniform(keys[5], (32,), 16 * 9),
        "lin1_w": uniform(keys[6], (128, 288), 288),
        "lin1_b": uniform(keys[7], (128,), 288),
        "lin2_w": uniform(keys[8], (encoded_space_dim, 128), 128),
        "lin2_b": uniform(keys[9], (encoded_space_dim,), 128),
    }


def _conv_gather_matrix(in_h, in_w, out_h, out_w, stride, pad):
    """Per-image 0/1 im2col gather: G[(t,oh,ow), (ih,iw)] = 1 where ih=stride*oh+kh-pad."""
    g = np.zeros((9 * out_h * out_w, in_h * in_w), np.float32)
    for kh in range(3):
        for kw in range(3):
            t = kh * 3 + kw
            for oh in range(out_h):
                ih = stride * oh + kh - pad
                if not 0 <= ih < in_h:
                    continue
                for ow in range(out_w):
                    iw = stride * ow + kw - pad
                    if not 0 <= iw < in_w:
                        continue
                    g[(t * out_h + oh) * out_w + ow, ih * in_w + iw] = 1.0
    return g


def prep_kernel_params(params):
    """One-time layout prep: PyTorch-layout params -> kernel-ready constants.
    Batch-size independent (per-image im2col gathers)."""
    esd = params["lin2_w"].shape[0]
    f32 = jnp.float32
    return {
        # conv weights -> (tap, cin, cout), tap = kh*3 + kw
        "w1": jnp.transpose(params["conv1_w"], (2, 3, 1, 0)).reshape(9, 8).astype(f32),
        "w2": jnp.transpose(params["conv2_w"], (2, 3, 1, 0)).reshape(9, 8, 16).astype(f32),
        "w3": jnp.transpose(params["conv3_w"], (2, 3, 1, 0)).reshape(9, 16, 32).astype(f32),
        # Linear(288,128): PyTorch flattens (c, h, w); fold that permutation into
        # per-spatial-position (p, cin, cout) slices consumed by the channels-last conv3.
        "w4": jnp.transpose(params["lin1_w"].reshape(128, 32, 9), (2, 1, 0)).astype(f32),
        "w5": jnp.transpose(params["lin2_w"], (1, 0)).astype(f32),
        "b1": params["conv1_b"].reshape(1, 8).astype(f32),
        "b2": params["conv2_b"].reshape(1, 16).astype(f32),
        "b3": params["conv3_b"].reshape(1, 32).astype(f32),
        "b4": params["lin1_b"].reshape(1, 128).astype(f32),
        "b5": params["lin2_b"].reshape(1, esd).astype(f32),
        "gamma": params["bn_gamma"].reshape(1, 16).astype(f32),
        "beta": params["bn_beta"].reshape(1, 16).astype(f32),
        # Per-image 0/1 im2col gathers (exact in bf16 -> half the DMA bytes):
        #   conv2: 14x14 (pad 1, stride 2) -> 7x7 ; conv3: 7x7 (stride 2) -> 3x3.
        "g2": jnp.asarray(_conv_gather_matrix(14, 14, 7, 7, 2, 1), dtype=jnp.bfloat16),
        "g3": jnp.asarray(_conv_gather_matrix(7, 7, 3, 3, 2, 0), dtype=jnp.bfloat16),
    }


# ----------------------------- pure-JAX reference -----------------------------

def reference_forward(x, params, eps=1e-5):
    def conv(z, w, b, stride, pad):
        y = jax.lax.conv_general_dilated(
            z, w, window_strides=(stride, stride),
            padding=[(pad, pad), (pad, pad)],
            dimension_numbers=("NCHW", "OIHW", "NCHW"))
        return y + b.reshape(1, -1, 1, 1)

    y = jax.nn.relu(conv(x, params["conv1_w"], params["conv1_b"], 2, 1))
    y = conv(y, params["conv2_w"], params["conv2_b"], 2, 1)
    mean = jnp.mean(y, axis=(0, 2, 3), keepdims=True)
    var = jnp.mean((y - mean) ** 2, axis=(0, 2, 3), keepdims=True)
    y = (y - mean) * jax.lax.rsqrt(var + eps)
    y = y * params["bn_gamma"].reshape(1, -1, 1, 1) + params["bn_beta"].reshape(1, -1, 1, 1)
    y = jax.nn.relu(y)
    y = jax.nn.relu(conv(y, params["conv3_w"], params["conv3_b"], 2, 0))
    flat = y.reshape(y.shape[0], -1)                      # PyTorch Flatten: (c, h, w)
    h = jax.nn.relu(flat @ params["lin1_w"].T + params["lin1_b"])
    return jnp.tanh(h @ params["lin2_w"].T + params["lin2_b"])


# ----------------------------- main -----------------------------

if __name__ == "__main__":
    encoded_space_dim = 16
    batch = 2
    key = jax.random.PRNGKey(0)
    k_x, k_p = jax.random.split(key)

    # MNIST-shaped input (spatial dims are fixed by the module: flatten expects 3*3*32).
    x = jax.random.normal(k_x, (batch, 1, 28, 28), dtype=jnp.float32)
    params = init_params(k_p, encoded_space_dim)
    kparams = prep_kernel_params(params)

    fwd = jax.jit(encoder_forward)
    out = fwd(x, kparams)
    jax.block_until_ready(out)

    assert out.shape == (batch, encoded_space_dim), out.shape
    assert bool(jnp.all(jnp.isfinite(out)))

    ref = jax.jit(reference_forward)(x, params)
    max_err = float(jnp.max(jnp.abs(out - ref)))
    assert max_err < 1e-3, f"mismatch vs pure-JAX reference: {max_err}"

    print("KERNEL_OK")
</pallas_src>

<mosaic_0001>
module attributes {stable_mosaic.version = 11 : i64} {
  func.func @_encoder_kernel(%arg0: memref<2x196x9xf32, #tpu.memory_space<vmem>>, %arg1: memref<9x8xf32, #tpu.memory_space<vmem>>, %arg2: memref<1x8xf32, #tpu.memory_space<vmem>>, %arg3: memref<441x196xbf16, #tpu.memory_space<vmem>>, %arg4: memref<9x8x16xf32, #tpu.memory_space<vmem>>, %arg5: memref<1x16xf32, #tpu.memory_space<vmem>>, %arg6: memref<1x16xf32, #tpu.memory_space<vmem>>, %arg7: memref<1x16xf32, #tpu.memory_space<vmem>>, %arg8: memref<81x49xbf16, #tpu.memory_space<vmem>>, %arg9: memref<9x16x32xf32, #tpu.memory_space<vmem>>, %arg10: memref<1x32xf32, #tpu.memory_space<vmem>>, %arg11: memref<9x32x128xf32, #tpu.memory_space<vmem>>, %arg12: memref<1x128xf32, #tpu.memory_space<vmem>>, %arg13: memref<128x16xf32, #tpu.memory_space<vmem>>, %arg14: memref<1x16xf32, #tpu.memory_space<vmem>>, %arg15: memref<2x16xf32, #tpu.memory_space<vmem>>) attributes {dimension_semantics = [], scalar_prefetch = 0 : i64, scratch_operands = 0 : i64, tpu.core_type = #tpu.core_type<tc>} {
    %c0 = arith.constant 0 : index
    %c0_0 = arith.constant 0 : index
    %0 = vector.load %arg1[%c0, %c0_0] : memref<9x8xf32, #tpu.memory_space<vmem>>, vector<9x8xf32>
    %c0_1 = arith.constant 0 : index
    %c0_2 = arith.constant 0 : index
    %c0_3 = arith.constant 0 : index
    %1 = vector.load %arg4[%c0_1, %c0_2, %c0_3] : memref<9x8x16xf32, #tpu.memory_space<vmem>>, vector<9x8x16xf32>
    %c0_4 = arith.constant 0 : index
    %c0_5 = arith.constant 0 : index
    %c0_6 = arith.constant 0 : index
    %2 = vector.load %arg9[%c0_4, %c0_5, %c0_6] : memref<9x16x32xf32, #tpu.memory_space<vmem>>, vector<9x16x32xf32>
    %c0_7 = arith.constant 0 : index
    %c0_8 = arith.constant 0 : index
    %c0_9 = arith.constant 0 : index
    %3 = vector.load %arg11[%c0_7, %c0_8, %c0_9] : memref<9x32x128xf32, #tpu.memory_space<vmem>>, vector<9x32x128xf32>
    %c0_10 = arith.constant 0 : index
    %c0_11 = arith.constant 0 : index
    %4 = vector.load %arg13[%c0_10, %c0_11] : memref<128x16xf32, #tpu.memory_space<vmem>>, vector<128x16xf32>
    %c0_12 = arith.constant 0 : index
    %c0_13 = arith.constant 0 : index
    %5 = vector.load %arg2[%c0_12, %c0_13] : memref<1x8xf32, #tpu.memory_space<vmem>>, vector<1x8xf32>
    %c0_14 = arith.constant 0 : index
    %c0_15 = arith.constant 0 : index
    %6 = vector.load %arg5[%c0_14, %c0_15] : memref<1x16xf32, #tpu.memory_space<vmem>>, vector<1x16xf32>
    %c0_16 = arith.constant 0 : index
    %c0_17 = arith.constant 0 : index
    %7 = vector.load %arg10[%c0_16, %c0_17] : memref<1x32xf32, #tpu.memory_space<vmem>>, vector<1x32xf32>
    %c0_18 = arith.constant 0 : index
    %c0_19 = arith.constant 0 : index
    %8 = vector.load %arg12[%c0_18, %c0_19] : memref<1x128xf32, #tpu.memory_space<vmem>>, vector<1x128xf32>
    %c0_20 = arith.constant 0 : index
    %c0_21 = arith.constant 0 : index
    %9 = vector.load %arg14[%c0_20, %c0_21] : memref<1x16xf32, #tpu.memory_space<vmem>>, vector<1x16xf32>
    %c0_22 = arith.constant 0 : index
    %c0_23 = arith.constant 0 : index
    %10 = vector.load %arg6[%c0_22, %c0_23] : memref<1x16xf32, #tpu.memory_space<vmem>>, vector<1x16xf32>
    %c0_24 = arith.constant 0 : index
    %c0_25 = arith.constant 0 : index
    %11 = vector.load %arg7[%c0_24, %c0_25] : memref<1x16xf32, #tpu.memory_space<vmem>>, vector<1x16xf32>
    %c0_26 = arith.constant 0 : index
    %c0_27 = arith.constant 0 : index
    %12 = vector.load %arg3[%c0_26, %c0_27] : memref<441x196xbf16, #tpu.memory_space<vmem>>, vector<441x196xbf16>
    %13 = arith.extf %12 : vector<441x196xbf16> to vector<441x196xf32>
    %c0_28 = arith.constant 0 : index
    %c0_29 = arith.constant 0 : index
    %14 = vector.load %arg8[%c0_28, %c0_29] : memref<81x49xbf16, #tpu.memory_space<vmem>>, vector<81x49xbf16>
    %15 = arith.extf %14 : vector<81x49xbf16> to vector<81x49xf32>
    %c0_30 = arith.constant 0 : index
    %c0_31 = arith.constant 0 : index
    %c0_32 = arith.constant 0 : index
    %16 = vector.load %arg0[%c0_30, %c0_31, %c0_32] : memref<2x196x9xf32, #tpu.memory_space<vmem>>, vector<1x196x9xf32>
    %17 = vector.shape_cast %16 : vector<1x196x9xf32> to vector<196x9xf32>
    %cst = arith.constant dense<0.000000e+00> : vector<196x8xf32>
    %18 = tpu.matmul %17, %0, %cst {dimension_numbers = #tpu.dot_dimension_numbers<[1], [0], [0], [1], [0, 0, 1, 1], [], []>} : vector<196x9xf32>, vector<9x8xf32>, vector<196x8xf32> -> vector<196x8xf32>
    %19 = vector.broadcast %5 : vector<1x8xf32> to vector<196x8xf32>
    %20 = arith.addf %18, %19 : vector<196x8xf32>
    %cst_33 = arith.constant 0.000000e+00 : f32
    %21 = vector.broadcast %cst_33 : f32 to vector<196x8xf32>
    %22 = arith.maximumf %20, %21 : vector<196x8xf32>
    %c1 = arith.constant 1 : index
    %c0_34 = arith.constant 0 : index
    %c0_35 = arith.constant 0 : index
    %23 = vector.load %arg0[%c1, %c0_34, %c0_35] : memref<2x196x9xf32, #tpu.memory_space<vmem>>, vector<1x196x9xf32>
    %24 = vector.shape_cast %23 : vector<1x196x9xf32> to vector<196x9xf32>
    %cst_36 = arith.constant dense<0.000000e+00> : vector<196x8xf32>
    %25 = tpu.matmul %24, %0, %cst_36 {dimension_numbers = #tpu.dot_dimension_numbers<[1], [0], [0], [1], [0, 0, 1, 1], [], []>} : vector<196x9xf32>, vector<9x8xf32>, vector<196x8xf32> -> vector<196x8xf32>
    %26 = vector.broadcast %5 : vector<1x8xf32> to vector<196x8xf32>
    %27 = arith.addf %25, %26 : vector<196x8xf32>
    %cst_37 = arith.constant 0.000000e+00 : f32
    %28 = vector.broadcast %cst_37 : f32 to vector<196x8xf32>
    %29 = arith.maximumf %27, %28 : vector<196x8xf32>
    %cst_38 = arith.constant dense<0.000000e+00> : vector<441x8xf32>
    %30 = tpu.matmul %13, %22, %cst_38 {dimension_numbers = #tpu.dot_dimension_numbers<[1], [0], [0], [1], [0, 0, 1, 1], [], []>} : vector<441x196xf32>, vector<196x8xf32>, vector<441x8xf32> -> vector<441x8xf32>
    %cst_39 = arith.constant 0.000000e+00 : f32
    %31 = vector.broadcast %cst_39 : f32 to vector<49x16xf32>
    %32 = vector.extract_strided_slice %30 {offsets = [0, 0], sizes = [49, 8], strides = [1, 1]} : vector<441x8xf32> to vector<49x8xf32>
    %33 = vector.extract_strided_slice %1 {offsets = [0, 0, 0], sizes = [1, 8, 16], strides = [1, 1, 1]} : vector<9x8x16xf32> to vector<1x8x16xf32>
    %34 = vector.shape_cast %33 : vector<1x8x16xf32> to vector<8x16xf32>
    %cst_40 = arith.constant dense<0.000000e+00> : vector<49x16xf32>
    %35 = tpu.matmul %32, %34, %cst_40 {dimension_numbers = #tpu.dot_dimension_numbers<[1], [0], [0], [1], [0, 0, 1, 1], [], []>} : vector<49x8xf32>, vector<8x16xf32>, vector<49x16xf32> -> vector<49x16xf32>
    %36 = arith.addf %31, %35 : vector<49x16xf32>
    %37 = vector.extract_strided_slice %30 {offsets = [49, 0], sizes = [49, 8], strides = [1, 1]} : vector<441x8xf32> to vector<49x8xf32>
    %38 = vector.extract_strided_slice %1 {offsets = [1, 0, 0], sizes = [1, 8, 16], strides = [1, 1, 1]} : vector<9x8x16xf32> to vector<1x8x16xf32>
    %39 = vector.shape_cast %38 : vector<1x8x16xf32> to vector<8x16xf32>
    %cst_41 = arith.constant dense<0.000000e+00> : vector<49x16xf32>
    %40 = tpu.matmul %37, %39, %cst_41 {dimension_numbers = #tpu.dot_dimension_numbers<[1], [0], [0], [1], [0, 0, 1, 1], [], []>} : vector<49x8xf32>, vector<8x16xf32>, vector<49x16xf32> -> vector<49x16xf32>
    %41 = arith.addf %36, %40 : vector<49x16xf32>
    %42 = vector.extract_strided_slice %30 {offsets = [98, 0], sizes = [49, 8], strides = [1, 1]} : vector<441x8xf32> to vector<49x8xf32>
    %43 = vector.extract_strided_slice %1 {offsets = [2, 0, 0], sizes = [1, 8, 16], strides = [1, 1, 1]} : vector<9x8x16xf32> to vector<1x8x16xf32>
    %44 = vector.shape_cast %43 : vector<1x8x16xf32> to vector<8x16xf32>
    %cst_42 = arith.constant dense<0.000000e+00> : vector<49x16xf32>
    %45 = tpu.matmul %42, %44, %cst_42 {dimension_numbers = #tpu.dot_dimension_numbers<[1], [0], [0], [1], [0, 0, 1, 1], [], []>} : vector<49x8xf32>, vector<8x16xf32>, vector<49x16xf32> -> vector<49x16xf32>
    %46 = arith.addf %41, %45 : vector<49x16xf32>
    %47 = vector.extract_strided_slice %30 {offsets = [147, 0], sizes = [49, 8], strides = [1, 1]} : vector<441x8xf32> to vector<49x8xf32>
    %48 = vector.extract_strided_slice %1 {offsets = [3, 0, 0], sizes = [1, 8, 16], strides = [1, 1, 1]} : vector<9x8x16xf32> to vector<1x8x16xf32>
    %49 = vector.shape_cast %48 : vector<1x8x16xf32> to vector<8x16xf32>
    %cst_43 = arith.constant dense<0.000000e+00> : vector<49x16xf32>
    %50 = tpu.matmul %47, %49, %cst_43 {dimension_numbers = #tpu.dot_dimension_numbers<[1], [0], [0], [1], [0, 0, 1, 1], [], []>} : vector<49x8xf32>, vector<8x16xf32>, vector<49x16xf32> -> vector<49x16xf32>
    %51 = arith.addf %46, %50 : vector<49x16xf32>
    %52 = vector.extract_strided_slice %30 {offsets = [196, 0], sizes = [49, 8], strides = [1, 1]} : vector<441x8xf32> to vector<49x8xf32>
    %53 = vector.extract_strided_slice %1 {offsets = [4, 0, 0], sizes = [1, 8, 16], strides = [1, 1, 1]} : vector<9x8x16xf32> to vector<1x8x16xf32>
    %54 = vector.shape_cast %53 : vector<1x8x16xf32> to vector<8x16xf32>
    %cst_44 = arith.constant dense<0.000000e+00> : vector<49x16xf32>
    %55 = tpu.matmul %52, %54, %cst_44 {dimension_numbers = #tpu.dot_dimension_numbers<[1], [0], [0], [1], [0, 0, 1, 1], [], []>} : vector<49x8xf32>, vector<8x16xf32>, vector<49x16xf32> -> vector<49x16xf32>
    %56 = arith.addf %51, %55 : vector<49x16xf32>
    %57 = vector.extract_strided_slice %30 {offsets = [245, 0], sizes = [49, 8], strides = [1, 1]} : vector<441x8xf32> to vector<49x8xf32>
    %58 = vector.extract_strided_slice %1 {offsets = [5, 0, 0], sizes = [1, 8, 16], strides = [1, 1, 1]} : vector<9x8x16xf32> to vector<1x8x16xf32>
    %59 = vector.shape_cast %58 : vector<1x8x16xf32> to vector<8x16xf32>
    %cst_45 = arith.constant dense<0.000000e+00> : vector<49x16xf32>
    %60 = tpu.matmul %57, %59, %cst_45 {dimension_numbers = #tpu.dot_dimension_numbers<[1], [0], [0], [1], [0, 0, 1, 1], [], []>} : vector<49x8xf32>, vector<8x16xf32>, vector<49x16xf32> -> vector<49x16xf32>
    %61 = arith.addf %56, %60 : vector<49x16xf32>
    %62 = vector.extract_strided_slice %30 {offsets = [294, 0], sizes = [49, 8], strides = [1, 1]} : vector<441x8xf32> to vector<49x8xf32>
    %63 = vector.extract_strided_slice %1 {offsets = [6, 0, 0], sizes = [1, 8, 16], strides = [1, 1, 1]} : vector<9x8x16xf32> to vector<1x8x16xf32>
    %64 = vector.shape_cast %63 : vector<1x8x16xf32> to vector<8x16xf32>
    %cst_46 = arith.constant dense<0.000000e+00> : vector<49x16xf32>
    %65 = tpu.matmul %62, %64, %cst_46 {dimension_numbers = #tpu.dot_dimension_numbers<[1], [0], [0], [1], [0, 0, 1, 1], [], []>} : vector<49x8xf32>, vector<8x16xf32>, vector<49x16xf32> -> vector<49x16xf32>
    %66 = arith.addf %61, %65 : vector<49x16xf32>
    %67 = vector.extract_strided_slice %30 {offsets = [343, 0], sizes = [49, 8], strides = [1, 1]} : vector<441x8xf32> to vector<49x8xf32>
    %68 = vector.extract_strided_slice %1 {offsets = [7, 0, 0], sizes = [1, 8, 16], strides = [1, 1, 1]} : vector<9x8x16xf32> to vector<1x8x16xf32>
    %69 = vector.shape_cast %68 : vector<1x8x16xf32> to vector<8x16xf32>
    %cst_47 = arith.constant dense<0.000000e+00> : vector<49x16xf32>
    %70 = tpu.matmul %67, %69, %cst_47 {dimension_numbers = #tpu.dot_dimension_numbers<[1], [0], [0], [1], [0, 0, 1, 1], [], []>} : vector<49x8xf32>, vector<8x16xf32>, vector<49x16xf32> -> vector<49x16xf32>
    %71 = arith.addf %66, %70 : vector<49x16xf32>
    %72 = vector.extract_strided_slice %30 {offsets = [392, 0], sizes = [49, 8], strides = [1, 1]} : vector<441x8xf32> to vector<49x8xf32>
    %73 = vector.extract_strided_slice %1 {offsets = [8, 0, 0], sizes = [1, 8, 16], strides = [1, 1, 1]} : vector<9x8x16xf32> to vector<1x8x16xf32>
    %74 = vector.shape_cast %73 : vector<1x8x16xf32> to vector<8x16xf32>
    %cst_48 = arith.constant dense<0.000000e+00> : vector<49x16xf32>
    %75 = tpu.matmul %72, %74, %cst_48 {dimension_numbers = #tpu.dot_dimension_numbers<[1], [0], [0], [1], [0, 0, 1, 1], [], []>} : vector<49x8xf32>, vector<8x16xf32>, vector<49x16xf32> -> vector<49x16xf32>
    %76 = arith.addf %71, %75 : vector<49x16xf32>
    %77 = vector.broadcast %6 : vector<1x16xf32> to vector<49x16xf32>
    %78 = arith.addf %76, %77 : vector<49x16xf32>
    %cst_49 = arith.constant dense<0.000000e+00> : vector<441x8xf32>
    %79 = tpu.matmul %13, %29, %cst_49 {dimension_numbers = #tpu.dot_dimension_numbers<[1], [0], [0], [1], [0, 0, 1, 1], [], []>} : vector<441x196xf32>, vector<196x8xf32>, vector<441x8xf32> -> vector<441x8xf32>
    %cst_50 = arith.constant 0.000000e+00 : f32
    %80 = vector.broadcast %cst_50 : f32 to vector<49x16xf32>
    %81 = vector.extract_strided_slice %79 {offsets = [0, 0], sizes = [49, 8], strides = [1, 1]} : vector<441x8xf32> to vector<49x8xf32>
    %82 = vector.extract_strided_slice %1 {offsets = [0, 0, 0], sizes = [1, 8, 16], strides = [1, 1, 1]} : vector<9x8x16xf32> to vector<1x8x16xf32>
    %83 = vector.shape_cast %82 : vector<1x8x16xf32> to vector<8x16xf32>
    %cst_51 = arith.constant dense<0.000000e+00> : vector<49x16xf32>
    %84 = tpu.matmul %81, %83, %cst_51 {dimension_numbers = #tpu.dot_dimension_numbers<[1], [0], [0], [1], [0, 0, 1, 1], [], []>} : vector<49x8xf32>, vector<8x16xf32>, vector<49x16xf32> -> vector<49x16xf32>
    %85 = arith.addf %80, %84 : vector<49x16xf32>
    %86 = vector.extract_strided_slice %79 {offsets = [49, 0], sizes = [49, 8], strides = [1, 1]} : vector<441x8xf32> to vector<49x8xf32>
    %87 = vector.extract_strided_slice %1 {offsets = [1, 0, 0], sizes = [1, 8, 16], strides = [1, 1, 1]} : vector<9x8x16xf32> to vector<1x8x16xf32>
    %88 = vector.shape_cast %87 : vector<1x8x16xf32> to vector<8x16xf32>
    %cst_52 = arith.constant dense<0.000000e+00> : vector<49x16xf32>
    %89 = tpu.matmul %86, %88, %cst_52 {dimension_numbers = #tpu.dot_dimension_numbers<[1], [0], [0], [1], [0, 0, 1, 1], [], []>} : vector<49x8xf32>, vector<8x16xf32>, vector<49x16xf32> -> vector<49x16xf32>
    %90 = arith.addf %85, %89 : vector<49x16xf32>
    %91 = vector.extract_strided_slice %79 {offsets = [98, 0], sizes = [49, 8], strides = [1, 1]} : vector<441x8xf32> to vector<49x8xf32>
    %92 = vector.extract_strided_slice %1 {offsets = [2, 0, 0], sizes = [1, 8, 16], strides = [1, 1, 1]} : vector<9x8x16xf32> to vector<1x8x16xf32>
    %93 = vector.shape_cast %92 : vector<1x8x16xf32> to vector<8x16xf32>
    %cst_53 = arith.constant dense<0.000000e+00> : vector<49x16xf32>
    %94 = tpu.matmul %91, %93, %cst_53 {dimension_numbers = #tpu.dot_dimension_numbers<[1], [0], [0], [1], [0, 0, 1, 1], [], []>} : vector<49x8xf32>, vector<8x16xf32>, vector<49x16xf32> -> vector<49x16xf32>
    %95 = arith.addf %90, %94 : vector<49x16xf32>
    %96 = vector.extract_strided_slice %79 {offsets = [147, 0], sizes = [49, 8], strides = [1, 1]} : vector<441x8xf32> to vector<49x8xf32>
    %97 = vector.extract_strided_slice %1 {offsets = [3, 0, 0], sizes = [1, 8, 16], strides = [1, 1, 1]} : vector<9x8x16xf32> to vector<1x8x16xf32>
    %98 = vector.shape_cast %97 : vector<1x8x16xf32> to vector<8x16xf32>
    %cst_54 = arith.constant dense<0.000000e+00> : vector<49x16xf32>
    %99 = tpu.matmul %96, %98, %cst_54 {dimension_numbers = #tpu.dot_dimension_numbers<[1], [0], [0], [1], [0, 0, 1, 1], [], []>} : vector<49x8xf32>, vector<8x16xf32>, vector<49x16xf32> -> vector<49x16xf32>
    %100 = arith.addf %95, %99 : vector<49x16xf32>
    %101 = vector.extract_strided_slice %79 {offsets = [196, 0], sizes = [49, 8], strides = [1, 1]} : vector<441x8xf32> to vector<49x8xf32>
    %102 = vector.extract_strided_slice %1 {offsets = [4, 0, 0], sizes = [1, 8, 16], strides = [1, 1, 1]} : vector<9x8x16xf32> to vector<1x8x16xf32>
    %103 = vector.shape_cast %102 : vector<1x8x16xf32> to vector<8x16xf32>
    %cst_55 = arith.constant dense<0.000000e+00> : vector<49x16xf32>
    %104 = tpu.matmul %101, %103, %cst_55 {dimension_numbers = #tpu.dot_dimension_numbers<[1], [0], [0], [1], [0, 0, 1, 1], [], []>} : vector<49x8xf32>, vector<8x16xf32>, vector<49x16xf32> -> vector<49x16xf32>
    %105 = arith.addf %100, %104 : vector<49x16xf32>
    %106 = vector.extract_strided_slice %79 {offsets = [245, 0], sizes = [49, 8], strides = [1, 1]} : vector<441x8xf32> to vector<49x8xf32>
    %107 = vector.extract_strided_slice %1 {offsets = [5, 0, 0], sizes = [1, 8, 16], strides = [1, 1, 1]} : vector<9x8x16xf32> to vector<1x8x16xf32>
    %108 = vector.shape_cast %107 : vector<1x8x16xf32> to vector<8x16xf32>
    %cst_56 = arith.constant dense<0.000000e+00> : vector<49x16xf32>
    %109 = tpu.matmul %106, %108, %cst_56 {dimension_numbers = #tpu.dot_dimension_numbers<[1], [0], [0], [1], [0, 0, 1, 1], [], []>} : vector<49x8xf32>, vector<8x16xf32>, vector<49x16xf32> -> vector<49x16xf32>
    %110 = arith.addf %105, %109 : vector<49x16xf32>
    %111 = vector.extract_strided_slice %79 {offsets = [294, 0], sizes = [49, 8], strides = [1, 1]} : vector<441x8xf32> to vector<49x8xf32>
    %112 = vector.extract_strided_slice %1 {offsets = [6, 0, 0], sizes = [1, 8, 16], strides = [1, 1, 1]} : vector<9x8x16xf32> to vector<1x8x16xf32>
    %113 = vector.shape_cast %112 : vector<1x8x16xf32> to vector<8x16xf32>
    %cst_57 = arith.constant dense<0.000000e+00> : vector<49x16xf32>
    %114 = tpu.matmul %111, %113, %cst_57 {dimension_numbers = #tpu.dot_dimension_numbers<[1], [0], [0], [1], [0, 0, 1, 1], [], []>} : vector<49x8xf32>, vector<8x16xf32>, vector<49x16xf32> -> vector<49x16xf32>
    %115 = arith.addf %110, %114 : vector<49x16xf32>
    %116 = vector.extract_strided_slice %79 {offsets = [343, 0], sizes = [49, 8], strides = [1, 1]} : vector<441x8xf32> to vector<49x8xf32>
    %117 = vector.extract_strided_slice %1 {offsets = [7, 0, 0], sizes = [1, 8, 16], strides = [1, 1, 1]} : vector<9x8x16xf32> to vector<1x8x16xf32>
    %118 = vector.shape_cast %117 : vector<1x8x16xf32> to vector<8x16xf32>
    %cst_58 = arith.constant dense<0.000000e+00> : vector<49x16xf32>
    %119 = tpu.matmul %116, %118, %cst_58 {dimension_numbers = #tpu.dot_dimension_numbers<[1], [0], [0], [1], [0, 0, 1, 1], [], []>} : vector<49x8xf32>, vector<8x16xf32>, vector<49x16xf32> -> vector<49x16xf32>
    %120 = arith.addf %115, %119 : vector<49x16xf32>
    %121 = vector.extract_strided_slice %79 {offsets = [392, 0], sizes = [49, 8], strides = [1, 1]} : vector<441x8xf32> to vector<49x8xf32>
    %122 = vector.extract_strided_slice %1 {offsets = [8, 0, 0], sizes = [1, 8, 16], strides = [1, 1, 1]} : vector<9x8x16xf32> to vector<1x8x16xf32>
    %123 = vector.shape_cast %122 : vector<1x8x16xf32> to vector<8x16xf32>
    %cst_59 = arith.constant dense<0.000000e+00> : vector<49x16xf32>
    %124 = tpu.matmul %121, %123, %cst_59 {dimension_numbers = #tpu.dot_dimension_numbers<[1], [0], [0], [1], [0, 0, 1, 1], [], []>} : vector<49x8xf32>, vector<8x16xf32>, vector<49x16xf32> -> vector<49x16xf32>
    %125 = arith.addf %120, %124 : vector<49x16xf32>
    %126 = vector.broadcast %6 : vector<1x16xf32> to vector<49x16xf32>
    %127 = arith.addf %125, %126 : vector<49x16xf32>
    %cst_60 = arith.constant 0.000000e+00 : f32
    %128 = vector.broadcast %cst_60 : f32 to vector<1x16xf32>
    %cst_61 = arith.constant dense<0.000000e+00> : vector<16xf32>
    %129 = vector.multi_reduction <add>, %78, %cst_61 [0] : vector<49x16xf32> to vector<16xf32>
    %130 = vector.shape_cast %129 : vector<16xf32> to vector<1x16xf32>
    %131 = arith.addf %128, %130 : vector<1x16xf32>
    %cst_62 = arith.constant dense<0.000000e+00> : vector<16xf32>
    %132 = vector.multi_reduction <add>, %127, %cst_62 [0] : vector<49x16xf32> to vector<16xf32>
    %133 = vector.shape_cast %132 : vector<16xf32> to vector<1x16xf32>
    %134 = arith.addf %131, %133 : vector<1x16xf32>
    %cst_63 = arith.constant 9.800000e+01 : f32
    %135 = vector.broadcast %cst_63 : f32 to vector<1x16xf32>
    %136 = arith.divf %134, %135 : vector<1x16xf32>
    %cst_64 = arith.constant 0.000000e+00 : f32
    %137 = vector.broadcast %cst_64 : f32 to vector<1x16xf32>
    %138 = vector.broadcast %136 : vector<1x16xf32> to vector<49x16xf32>
    %139 = arith.subf %78, %138 : vector<49x16xf32>
    %140 = arith.mulf %139, %139 : vector<49x16xf32>
    %cst_65 = arith.constant dense<0.000000e+00> : vector<16xf32>
    %141 = vector.multi_reduction <add>, %140, %cst_65 [0] : vector<49x16xf32> to vector<16xf32>
    %142 = vector.shape_cast %141 : vector<16xf32> to vector<1x16xf32>
    %143 = arith.addf %137, %142 : vector<1x16xf32>
    %144 = vector.broadcast %136 : vector<1x16xf32> to vector<49x16xf32>
    %145 = arith.subf %127, %144 : vector<49x16xf32>
    %146 = arith.mulf %145, %145 : vector<49x16xf32>
    %cst_66 = arith.constant dense<0.000000e+00> : vector<16xf32>
    %147 = vector.multi_reduction <add>, %146, %cst_66 [0] : vector<49x16xf32> to vector<16xf32>
    %148 = vector.shape_cast %147 : vector<16xf32> to vector<1x16xf32>
    %149 = arith.addf %143, %148 : vector<1x16xf32>
    %cst_67 = arith.constant 9.800000e+01 : f32
    %150 = vector.broadcast %cst_67 : f32 to vector<1x16xf32>
    %151 = arith.divf %149, %150 : vector<1x16xf32>
    %cst_68 = arith.constant 9.99999974E-6 : f32
    %152 = vector.broadcast %cst_68 : f32 to vector<1x16xf32>
    %153 = arith.addf %151, %152 : vector<1x16xf32>
    %154 = math.rsqrt %153 : vector<1x16xf32>
    %155 = arith.mulf %10, %154 : vector<1x16xf32>
    %156 = arith.mulf %136, %155 : vector<1x16xf32>
    %157 = arith.subf %11, %156 : vector<1x16xf32>
    %158 = vector.broadcast %155 : vector<1x16xf32> to vector<49x16xf32>
    %159 = arith.mulf %78, %158 : vector<49x16xf32>
    %160 = vector.broadcast %157 : vector<1x16xf32> to vector<49x16xf32>
    %161 = arith.addf %159, %160 : vector<49x16xf32>
    %cst_69 = arith.constant 0.000000e+00 : f32
    %162 = vector.broadcast %cst_69 : f32 to vector<49x16xf32>
    %163 = arith.maximumf %161, %162 : vector<49x16xf32>
    %cst_70 = arith.constant dense<0.000000e+00> : vector<81x16xf32>
    %164 = tpu.matmul %15, %163, %cst_70 {dimension_numbers = #tpu.dot_dimension_numbers<[1], [0], [0], [1], [0, 0, 1, 1], [], []>} : vector<81x49xf32>, vector<49x16xf32>, vector<81x16xf32> -> vector<81x16xf32>
    %cst_71 = arith.constant 0.000000e+00 : f32
    %165 = vector.broadcast %cst_71 : f32 to vector<9x32xf32>
    %166 = vector.extract_strided_slice %164 {offsets = [0, 0], sizes = [9, 16], strides = [1, 1]} : vector<81x16xf32> to vector<9x16xf32>
    %167 = vector.extract_strided_slice %2 {offsets = [0, 0, 0], sizes = [1, 16, 32], strides = [1, 1, 1]} : vector<9x16x32xf32> to vector<1x16x32xf32>
    %168 = vector.shape_cast %167 : vector<1x16x32xf32> to vector<16x32xf32>
    %cst_72 = arith.constant dense<0.000000e+00> : vector<9x32xf32>
    %169 = tpu.matmul %166, %168, %cst_72 {dimension_numbers = #tpu.dot_dimension_numbers<[1], [0], [0], [1], [0, 0, 1, 1], [], []>} : vector<9x16xf32>, vector<16x32xf32>, vector<9x32xf32> -> vector<9x32xf32>
    %170 = arith.addf %165, %169 : vector<9x32xf32>
    %171 = vector.extract_strided_slice %164 {offsets = [9, 0], sizes = [9, 16], strides = [1, 1]} : vector<81x16xf32> to vector<9x16xf32>
    %172 = vector.extract_strided_slice %2 {offsets = [1, 0, 0], sizes = [1, 16, 32], strides = [1, 1, 1]} : vector<9x16x32xf32> to vector<1x16x32xf32>
    %173 = vector.shape_cast %172 : vector<1x16x32xf32> to vector<16x32xf32>
    %cst_73 = arith.constant dense<0.000000e+00> : vector<9x32xf32>
    %174 = tpu.matmul %171, %173, %cst_73 {dimension_numbers = #tpu.dot_dimension_numbers<[1], [0], [0], [1], [0, 0, 1, 1], [], []>} : vector<9x16xf32>, vector<16x32xf32>, vector<9x32xf32> -> vector<9x32xf32>
    %175 = arith.addf %170, %174 : vector<9x32xf32>
    %176 = vector.extract_strided_slice %164 {offsets = [18, 0], sizes = [9, 16], strides = [1, 1]} : vector<81x16xf32> to vector<9x16xf32>
    %177 = vector.extract_strided_slice %2 {offsets = [2, 0, 0], sizes = [1, 16, 32], strides = [1, 1, 1]} : vector<9x16x32xf32> to vector<1x16x32xf32>
    %178 = vector.shape_cast %177 : vector<1x16x32xf32> to vector<16x32xf32>
    %cst_74 = arith.constant dense<0.000000e+00> : vector<9x32xf32>
    %179 = tpu.matmul %176, %178, %cst_74 {dimension_numbers = #tpu.dot_dimension_numbers<[1], [0], [0], [1], [0, 0, 1, 1], [], []>} : vector<9x16xf32>, vector<16x32xf32>, vector<9x32xf32> -> vector<9x32xf32>
    %180 = arith.addf %175, %179 : vector<9x32xf32>
    %181 = vector.extract_strided_slice %164 {offsets = [27, 0], sizes = [9, 16], strides = [1, 1]} : vector<81x16xf32> to vector<9x16xf32>
    %182 = vector.extract_strided_slice %2 {offsets = [3, 0, 0], sizes = [1, 16, 32], strides = [1, 1, 1]} : vector<9x16x32xf32> to vector<1x16x32xf32>
    %183 = vector.shape_cast %182 : vector<1x16x32xf32> to vector<16x32xf32>
    %cst_75 = arith.constant dense<0.000000e+00> : vector<9x32xf32>
    %184 = tpu.matmul %181, %183, %cst_75 {dimension_numbers = #tpu.dot_dimension_numbers<[1], [0], [0], [1], [0, 0, 1, 1], [], []>} : vector<9x16xf32>, vector<16x32xf32>, vector<9x32xf32> -> vector<9x32xf32>
    %185 = arith.addf %180, %184 : vector<9x32xf32>
    %186 = vector.extract_strided_slice %164 {offsets = [36, 0], sizes = [9, 16], strides = [1, 1]} : vector<81x16xf32> to vector<9x16xf32>
    %187 = vector.extract_strided_slice %2 {offsets = [4, 0, 0], sizes = [1, 16, 32], strides = [1, 1, 1]} : vector<9x16x32xf32> to vector<1x16x32xf32>
    %188 = vector.shape_cast %187 : vector<1x16x32xf32> to vector<16x32xf32>
    %cst_76 = arith.constant dense<0.000000e+00> : vector<9x32xf32>
    %189 = tpu.matmul %186, %188, %cst_76 {dimension_numbers = #tpu.dot_dimension_numbers<[1], [0], [0], [1], [0, 0, 1, 1], [], []>} : vector<9x16xf32>, vector<16x32xf32>, vector<9x32xf32> -> vector<9x32xf32>
    %190 = arith.addf %185, %189 : vector<9x32xf32>
    %191 = vector.extract_strided_slice %164 {offsets = [45, 0], sizes = [9, 16], strides = [1, 1]} : vector<81x16xf32> to vector<9x16xf32>
    %192 = vector.extract_strided_slice %2 {offsets = [5, 0, 0], sizes = [1, 16, 32], strides = [1, 1, 1]} : vector<9x16x32xf32> to vector<1x16x32xf32>
    %193 = vector.shape_cast %192 : vector<1x16x32xf32> to vector<16x32xf32>
    %cst_77 = arith.constant dense<0.000000e+00> : vector<9x32xf32>
    %194 = tpu.matmul %191, %193, %cst_77 {dimension_numbers = #tpu.dot_dimension_numbers<[1], [0], [0], [1], [0, 0, 1, 1], [], []>} : vector<9x16xf32>, vector<16x32xf32>, vector<9x32xf32> -> vector<9x32xf32>
    %195 = arith.addf %190, %194 : vector<9x32xf32>
    %196 = vector.extract_strided_slice %164 {offsets = [54, 0], sizes = [9, 16], strides = [1, 1]} : vector<81x16xf32> to vector<9x16xf32>
    %197 = vector.extract_strided_slice %2 {offsets = [6, 0, 0], sizes = [1, 16, 32], strides = [1, 1, 1]} : vector<9x16x32xf32> to vector<1x16x32xf32>
    %198 = vector.shape_cast %197 : vector<1x16x32xf32> to vector<16x32xf32>
    %cst_78 = arith.constant dense<0.000000e+00> : vector<9x32xf32>
    %199 = tpu.matmul %196, %198, %cst_78 {dimension_numbers = #tpu.dot_dimension_numbers<[1], [0], [0], [1], [0, 0, 1, 1], [], []>} : vector<9x16xf32>, vector<16x32xf32>, vector<9x32xf32> -> vector<9x32xf32>
    %200 = arith.addf %195, %199 : vector<9x32xf32>
    %201 = vector.extract_strided_slice %164 {offsets = [63, 0], sizes = [9, 16], strides = [1, 1]} : vector<81x16xf32> to vector<9x16xf32>
    %202 = vector.extract_strided_slice %2 {offsets = [7, 0, 0], sizes = [1, 16, 32], strides = [1, 1, 1]} : vector<9x16x32xf32> to vector<1x16x32xf32>
    %203 = vector.shape_cast %202 : vector<1x16x32xf32> to vector<16x32xf32>
    %cst_79 = arith.constant dense<0.000000e+00> : vector<9x32xf32>
    %204 = tpu.matmul %201, %203, %cst_79 {dimension_numbers = #tpu.dot_dimension_numbers<[1], [0], [0], [1], [0, 0, 1, 1], [], []>} : vector<9x16xf32>, vector<16x32xf32>, vector<9x32xf32> -> vector<9x32xf32>
    %205 = arith.addf %200, %204 : vector<9x32xf32>
    %206 = vector.extract_strided_slice %164 {offsets = [72, 0], sizes = [9, 16], strides = [1, 1]} : vector<81x16xf32> to vector<9x16xf32>
    %207 = vector.extract_strided_slice %2 {offsets = [8, 0, 0], sizes = [1, 16, 32], strides = [1, 1, 1]} : vector<9x16x32xf32> to vector<1x16x32xf32>
    %208 = vector.shape_cast %207 : vector<1x16x32xf32> to vector<16x32xf32>
    %cst_80 = arith.constant dense<0.000000e+00> : vector<9x32xf32>
    %209 = tpu.matmul %206, %208, %cst_80 {dimension_numbers = #tpu.dot_dimension_numbers<[1], [0], [0], [1], [0, 0, 1, 1], [], []>} : vector<9x16xf32>, vector<16x32xf32>, vector<9x32xf32> -> vector<9x32xf32>
    %210 = arith.addf %205, %209 : vector<9x32xf32>
    %211 = vector.broadcast %7 : vector<1x32xf32> to vector<9x32xf32>
    %212 = arith.addf %210, %211 : vector<9x32xf32>
    %cst_81 = arith.constant 0.000000e+00 : f32
    %213 = vector.broadcast %cst_81 : f32 to vector<9x32xf32>
    %214 = arith.maximumf %212, %213 : vector<9x32xf32>
    %cst_82 = arith.constant 0.000000e+00 : f32
    %215 = vector.broadcast %cst_82 : f32 to vector<1x128xf32>
    %216 = vector.extract_strided_slice %214 {offsets = [0, 0], sizes = [1, 32], strides = [1, 1]} : vector<9x32xf32> to vector<1x32xf32>
    %217 = vector.extract_strided_slice %3 {offsets = [0, 0, 0], sizes = [1, 32, 128], strides = [1, 1, 1]} : vector<9x32x128xf32> to vector<1x32x128xf32>
    %218 = vector.shape_cast %217 : vector<1x32x128xf32> to vector<32x128xf32>
    %cst_83 = arith.constant dense<0.000000e+00> : vector<1x128xf32>
    %219 = tpu.matmul %216, %218, %cst_83 {dimension_numbers = #tpu.dot_dimension_numbers<[1], [0], [0], [1], [0, 0, 1, 1], [], []>} : vector<1x32xf32>, vector<32x128xf32>, vector<1x128xf32> -> vector<1x128xf32>
    %220 = arith.addf %215, %219 : vector<1x128xf32>
    %221 = vector.extract_strided_slice %214 {offsets = [1, 0], sizes = [1, 32], strides = [1, 1]} : vector<9x32xf32> to vector<1x32xf32>
    %222 = vector.extract_strided_slice %3 {offsets = [1, 0, 0], sizes = [1, 32, 128], strides = [1, 1, 1]} : vector<9x32x128xf32> to vector<1x32x128xf32>
    %223 = vector.shape_cast %222 : vector<1x32x128xf32> to vector<32x128xf32>
    %cst_84 = arith.constant dense<0.000000e+00> : vector<1x128xf32>
    %224 = tpu.matmul %221, %223, %cst_84 {dimension_numbers = #tpu.dot_dimension_numbers<[1], [0], [0], [1], [0, 0, 1, 1], [], []>} : vector<1x32xf32>, vector<32x128xf32>, vector<1x128xf32> -> vector<1x128xf32>
    %225 = arith.addf %220, %224 : vector<1x128xf32>
    %226 = vector.extract_strided_slice %214 {offsets = [2, 0], sizes = [1, 32], strides = [1, 1]} : vector<9x32xf32> to vector<1x32xf32>
    %227 = vector.extract_strided_slice %3 {offsets = [2, 0, 0], sizes = [1, 32, 128], strides = [1, 1, 1]} : vector<9x32x128xf32> to vector<1x32x128xf32>
    %228 = vector.shape_cast %227 : vector<1x32x128xf32> to vector<32x128xf32>
    %cst_85 = arith.constant dense<0.000000e+00> : vector<1x128xf32>
    %229 = tpu.matmul %226, %228, %cst_85 {dimension_numbers = #tpu.dot_dimension_numbers<[1], [0], [0], [1], [0, 0, 1, 1], [], []>} : vector<1x32xf32>, vector<32x128xf32>, vector<1x128xf32> -> vector<1x128xf32>
    %230 = arith.addf %225, %229 : vector<1x128xf32>
    %231 = vector.extract_strided_slice %214 {offsets = [3, 0], sizes = [1, 32], strides = [1, 1]} : vector<9x32xf32> to vector<1x32xf32>
    %232 = vector.extract_strided_slice %3 {offsets = [3, 0, 0], sizes = [1, 32, 128], strides = [1, 1, 1]} : vector<9x32x128xf32> to vector<1x32x128xf32>
    %233 = vector.shape_cast %232 : vector<1x32x128xf32> to vector<32x128xf32>
    %cst_86 = arith.constant dense<0.000000e+00> : vector<1x128xf32>
    %234 = tpu.matmul %231, %233, %cst_86 {dimension_numbers = #tpu.dot_dimension_numbers<[1], [0], [0], [1], [0, 0, 1, 1], [], []>} : vector<1x32xf32>, vector<32x128xf32>, vector<1x128xf32> -> vector<1x128xf32>
    %235 = arith.addf %230, %234 : vector<1x128xf32>
    %236 = vector.extract_strided_slice %214 {offsets = [4, 0], sizes = [1, 32], strides = [1, 1]} : vector<9x32xf32> to vector<1x32xf32>
    %237 = vector.extract_strided_slice %3 {offsets = [4, 0, 0], sizes = [1, 32, 128], strides = [1, 1, 1]} : vector<9x32x128xf32> to vector<1x32x128xf32>
    %238 = vector.shape_cast %237 : vector<1x32x128xf32> to vector<32x128xf32>
    %cst_87 = arith.constant dense<0.000000e+00> : vector<1x128xf32>
    %239 = tpu.matmul %236, %238, %cst_87 {dimension_numbers = #tpu.dot_dimension_numbers<[1], [0], [0], [1], [0, 0, 1, 1], [], []>} : vector<1x32xf32>, vector<32x128xf32>, vector<1x128xf32> -> vector<1x128xf32>
    %240 = arith.addf %235, %239 : vector<1x128xf32>
    %241 = vector.extract_strided_slice %214 {offsets = [5, 0], sizes = [1, 32], strides = [1, 1]} : vector<9x32xf32> to vector<1x32xf32>
    %242 = vector.extract_strided_slice %3 {offsets = [5, 0, 0], sizes = [1, 32, 128], strides = [1, 1, 1]} : vector<9x32x128xf32> to vector<1x32x128xf32>
    %243 = vector.shape_cast %242 : vector<1x32x128xf32> to vector<32x128xf32>
    %cst_88 = arith.constant dense<0.000000e+00> : vector<1x128xf32>
    %244 = tpu.matmul %241, %243, %cst_88 {dimension_numbers = #tpu.dot_dimension_numbers<[1], [0], [0], [1], [0, 0, 1, 1], [], []>} : vector<1x32xf32>, vector<32x128xf32>, vector<1x128xf32> -> vector<1x128xf32>
    %245 = arith.addf %240, %244 : vector<1x128xf32>
    %246 = vector.extract_strided_slice %214 {offsets = [6, 0], sizes = [1, 32], strides = [1, 1]} : vector<9x32xf32> to vector<1x32xf32>
    %247 = vector.extract_strided_slice %3 {offsets = [6, 0, 0], sizes = [1, 32, 128], strides = [1, 1, 1]} : vector<9x32x128xf32> to vector<1x32x128xf32>
    %248 = vector.shape_cast %247 : vector<1x32x128xf32> to vector<32x128xf32>
    %cst_89 = arith.constant dense<0.000000e+00> : vector<1x128xf32>
    %249 = tpu.matmul %246, %248, %cst_89 {dimension_numbers = #tpu.dot_dimension_numbers<[1], [0], [0], [1], [0, 0, 1, 1], [], []>} : vector<1x32xf32>, vector<32x128xf32>, vector<1x128xf32> -> vector<1x128xf32>
    %250 = arith.addf %245, %249 : vector<1x128xf32>
    %251 = vector.extract_strided_slice %214 {offsets = [7, 0], sizes = [1, 32], strides = [1, 1]} : vector<9x32xf32> to vector<1x32xf32>
    %252 = vector.extract_strided_slice %3 {offsets = [7, 0, 0], sizes = [1, 32, 128], strides = [1, 1, 1]} : vector<9x32x128xf32> to vector<1x32x128xf32>
    %253 = vector.shape_cast %252 : vector<1x32x128xf32> to vector<32x128xf32>
    %cst_90 = arith.constant dense<0.000000e+00> : vector<1x128xf32>
    %254 = tpu.matmul %251, %253, %cst_90 {dimension_numbers = #tpu.dot_dimension_numbers<[1], [0], [0], [1], [0, 0, 1, 1], [], []>} : vector<1x32xf32>, vector<32x128xf32>, vector<1x128xf32> -> vector<1x128xf32>
    %255 = arith.addf %250, %254 : vector<1x128xf32>
    %256 = vector.extract_strided_slice %214 {offsets = [8, 0], sizes = [1, 32], strides = [1, 1]} : vector<9x32xf32> to vector<1x32xf32>
    %257 = vector.extract_strided_slice %3 {offsets = [8, 0, 0], sizes = [1, 32, 128], strides = [1, 1, 1]} : vector<9x32x128xf32> to vector<1x32x128xf32>
    %258 = vector.shape_cast %257 : vector<1x32x128xf32> to vector<32x128xf32>
    %cst_91 = arith.constant dense<0.000000e+00> : vector<1x128xf32>
    %259 = tpu.matmul %256, %258, %cst_91 {dimension_numbers = #tpu.dot_dimension_numbers<[1], [0], [0], [1], [0, 0, 1, 1], [], []>} : vector<1x32xf32>, vector<32x128xf32>, vector<1x128xf32> -> vector<1x128xf32>
    %260 = arith.addf %255, %259 : vector<1x128xf32>
    %261 = arith.addf %260, %8 : vector<1x128xf32>
    %cst_92 = arith.constant 0.000000e+00 : f32
    %262 = vector.broadcast %cst_92 : f32 to vector<1x128xf32>
    %263 = arith.maximumf %261, %262 : vector<1x128xf32>
    %cst_93 = arith.constant dense<0.000000e+00> : vector<1x16xf32>
    %264 = tpu.matmul %263, %4, %cst_93 {dimension_numbers = #tpu.dot_dimension_numbers<[1], [0], [0], [1], [0, 0, 1, 1], [], []>} : vector<1x128xf32>, vector<128x16xf32>, vector<1x16xf32> -> vector<1x16xf32>
    %265 = arith.addf %264, %9 : vector<1x16xf32>
    %266 = math.tanh %265 : vector<1x16xf32>
    %c0_94 = arith.constant 0 : index
    %c0_95 = arith.constant 0 : index
    %267 = vector.load %arg15[%c0_94, %c0_95] : memref<2x16xf32, #tpu.memory_space<vmem>>, vector<1x16xf32>
    tpu.vector_store %arg15[%c0_94, %c0_95], %266 {strides = array<i32>} : memref<2x16xf32, #tpu.memory_space<vmem>>, vector<1x16xf32>,
    %268 = vector.broadcast %155 : vector<1x16xf32> to vector<49x16xf32>
    %269 = arith.mulf %127, %268 : vector<49x16xf32>
    %270 = vector.broadcast %157 : vector<1x16xf32> to vector<49x16xf32>
    %271 = arith.addf %269, %270 : vector<49x16xf32>
    %cst_96 = arith.constant 0.000000e+00 : f32
    %272 = vector.broadcast %cst_96 : f32 to vector<49x16xf32>
    %273 = arith.maximumf %271, %272 : vector<49x16xf32>
    %cst_97 = arith.constant dense<0.000000e+00> : vector<81x16xf32>
    %274 = tpu.matmul %15, %273, %cst_97 {dimension_numbers = #tpu.dot_dimension_numbers<[1], [0], [0], [1], [0, 0, 1, 1], [], []>} : vector<81x49xf32>, vector<49x16xf32>, vector<81x16xf32> -> vector<81x16xf32>
    %cst_98 = arith.constant 0.000000e+00 : f32
    %275 = vector.broadcast %cst_98 : f32 to vector<9x32xf32>
    %276 = vector.extract_strided_slice %274 {offsets = [0, 0], sizes = [9, 16], strides = [1, 1]} : vector<81x16xf32> to vector<9x16xf32>
    %277 = vector.extract_strided_slice %2 {offsets = [0, 0, 0], sizes = [1, 16, 32], strides = [1, 1, 1]} : vector<9x16x32xf32> to vector<1x16x32xf32>
    %278 = vector.shape_cast %277 : vector<1x16x32xf32> to vector<16x32xf32>
    %cst_99 = arith.constant dense<0.000000e+00> : vector<9x32xf32>
    %279 = tpu.matmul %276, %278, %cst_99 {dimension_numbers = #tpu.dot_dimension_numbers<[1], [0], [0], [1], [0, 0, 1, 1], [], []>} : vector<9x16xf32>, vector<16x32xf32>, vector<9x32xf32> -> vector<9x32xf32>
    %280 = arith.addf %275, %279 : vector<9x32xf32>
    %281 = vector.extract_strided_slice %274 {offsets = [9, 0], sizes = [9, 16], strides = [1, 1]} : vector<81x16xf32> to vector<9x16xf32>
    %282 = vector.extract_strided_slice %2 {offsets = [1, 0, 0], sizes = [1, 16, 32], strides = [1, 1, 1]} : vector<9x16x32xf32> to vector<1x16x32xf32>
    %283 = vector.shape_cast %282 : vector<1x16x32xf32> to vector<16x32xf32>
    %cst_100 = arith.constant dense<0.000000e+00> : vector<9x32xf32>
    %284 = tpu.matmul %281, %283, %cst_100 {dimension_numbers = #tpu.dot_dimension_numbers<[1], [0], [0], [1], [0, 0, 1, 1], [], []>} : vector<9x16xf32>, vector<16x32xf32>, vector<9x32xf32> -> vector<9x32xf32>
    %285 = arith.addf %280, %284 : vector<9x32xf32>
    %286 = vector.extract_strided_slice %274 {offsets = [18, 0], sizes = [9, 16], strides = [1, 1]} : vector<81x16xf32> to vector<9x16xf32>
    %287 = vector.extract_strided_slice %2 {offsets = [2, 0, 0], sizes = [1, 16, 32], strides = [1, 1, 1]} : vector<9x16x32xf32> to vector<1x16x32xf32>
    %288 = vector.shape_cast %287 : vector<1x16x32xf32> to vector<16x32xf32>
    %cst_101 = arith.constant dense<0.000000e+00> : vector<9x32xf32>
    %289 = tpu.matmul %286, %288, %cst_101 {dimension_numbers = #tpu.dot_dimension_numbers<[1], [0], [0], [1], [0, 0, 1, 1], [], []>} : vector<9x16xf32>, vector<16x32xf32>, vector<9x32xf32> -> vector<9x32xf32>
    %290 = arith.addf %285, %289 : vector<9x32xf32>
    %291 = vector.extract_strided_slice %274 {offsets = [27, 0], sizes = [9, 16], strides = [1, 1]} : vector<81x16xf32> to vector<9x16xf32>
    %292 = vector.extract_strided_slice %2 {offsets = [3, 0, 0], sizes = [1, 16, 32], strides = [1, 1, 1]} : vector<9x16x32xf32> to vector<1x16x32xf32>
    %293 = vector.shape_cast %292 : vector<1x16x32xf32> to vector<16x32xf32>
    %cst_102 = arith.constant dense<0.000000e+00> : vector<9x32xf32>
    %294 = tpu.matmul %291, %293, %cst_102 {dimension_numbers = #tpu.dot_dimension_numbers<[1], [0], [0], [1], [0, 0, 1, 1], [], []>} : vector<9x16xf32>, vector<16x32xf32>, vector<9x32xf32> -> vector<9x32xf32>
    %295 = arith.addf %290, %294 : vector<9x32xf32>
    %296 = vector.extract_strided_slice %274 {offsets = [36, 0], sizes = [9, 16], strides = [1, 1]} : vector<81x16xf32> to vector<9x16xf32>
    %297 = vector.extract_strided_slice %2 {offsets = [4, 0, 0], sizes = [1, 16, 32], strides = [1, 1, 1]} : vector<9x16x32xf32> to vector<1x16x32xf32>
    %298 = vector.shape_cast %297 : vector<1x16x32xf32> to vector<16x32xf32>
    %cst_103 = arith.constant dense<0.000000e+00> : vector<9x32xf32>
    %299 = tpu.matmul %296, %298, %cst_103 {dimension_numbers = #tpu.dot_dimension_numbers<[1], [0], [0], [1], [0, 0, 1, 1], [], []>} : vector<9x16xf32>, vector<16x32xf32>, vector<9x32xf32> -> vector<9x32xf32>
    %300 = arith.addf %295, %299 : vector<9x32xf32>
    %301 = vector.extract_strided_slice %274 {offsets = [45, 0], sizes = [9, 16], strides = [1, 1]} : vector<81x16xf32> to vector<9x16xf32>
    %302 = vector.extract_strided_slice %2 {offsets = [5, 0, 0], sizes = [1, 16, 32], strides = [1, 1, 1]} : vector<9x16x32xf32> to vector<1x16x32xf32>
    %303 = vector.shape_cast %302 : vector<1x16x32xf32> to vector<16x32xf32>
    %cst_104 = arith.constant dense<0.000000e+00> : vector<9x32xf32>
    %304 = tpu.matmul %301, %303, %cst_104 {dimension_numbers = #tpu.dot_dimension_numbers<[1], [0], [0], [1], [0, 0, 1, 1], [], []>} : vector<9x16xf32>, vector<16x32xf32>, vector<9x32xf32> -> vector<9x32xf32>
    %305 = arith.addf %300, %304 : vector<9x32xf32>
    %306 = vector.extract_strided_slice %274 {offsets = [54, 0], sizes = [9, 16], strides = [1, 1]} : vector<81x16xf32> to vector<9x16xf32>
    %307 = vector.extract_strided_slice %2 {offsets = [6, 0, 0], sizes = [1, 16, 32], strides = [1, 1, 1]} : vector<9x16x32xf32> to vector<1x16x32xf32>
    %308 = vector.shape_cast %307 : vector<1x16x32xf32> to vector<16x32xf32>
    %cst_105 = arith.constant dense<0.000000e+00> : vector<9x32xf32>
    %309 = tpu.matmul %306, %308, %cst_105 {dimension_numbers = #tpu.dot_dimension_numbers<[1], [0], [0], [1], [0, 0, 1, 1], [], []>} : vector<9x16xf32>, vector<16x32xf32>, vector<9x32xf32> -> vector<9x32xf32>
    %310 = arith.addf %305, %309 : vector<9x32xf32>
    %311 = vector.extract_strided_slice %274 {offsets = [63, 0], sizes = [9, 16], strides = [1, 1]} : vector<81x16xf32> to vector<9x16xf32>
    %312 = vector.extract_strided_slice %2 {offsets = [7, 0, 0], sizes = [1, 16, 32], strides = [1, 1, 1]} : vector<9x16x32xf32> to vector<1x16x32xf32>
    %313 = vector.shape_cast %312 : vector<1x16x32xf32> to vector<16x32xf32>
    %cst_106 = arith.constant dense<0.000000e+00> : vector<9x32xf32>
    %314 = tpu.matmul %311, %313, %cst_106 {dimension_numbers = #tpu.dot_dimension_numbers<[1], [0], [0], [1], [0, 0, 1, 1], [], []>} : vector<9x16xf32>, vector<16x32xf32>, vector<9x32xf32> -> vector<9x32xf32>
    %315 = arith.addf %310, %314 : vector<9x32xf32>
    %316 = vector.extract_strided_slice %274 {offsets = [72, 0], sizes = [9, 16], strides = [1, 1]} : vector<81x16xf32> to vector<9x16xf32>
    %317 = vector.extract_strided_slice %2 {offsets = [8, 0, 0], sizes = [1, 16, 32], strides = [1, 1, 1]} : vector<9x16x32xf32> to vector<1x16x32xf32>
    %318 = vector.shape_cast %317 : vector<1x16x32xf32> to vector<16x32xf32>
    %cst_107 = arith.constant dense<0.000000e+00> : vector<9x32xf32>
    %319 = tpu.matmul %316, %318, %cst_107 {dimension_numbers = #tpu.dot_dimension_numbers<[1], [0], [0], [1], [0, 0, 1, 1], [], []>} : vector<9x16xf32>, vector<16x32xf32>, vector<9x32xf32> -> vector<9x32xf32>
    %320 = arith.addf %315, %319 : vector<9x32xf32>
    %321 = vector.broadcast %7 : vector<1x32xf32> to vector<9x32xf32>
    %322 = arith.addf %320, %321 : vector<9x32xf32>
    %cst_108 = arith.constant 0.000000e+00 : f32
    %323 = vector.broadcast %cst_108 : f32 to vector<9x32xf32>
    %324 = arith.maximumf %322, %323 : vector<9x32xf32>
    %cst_109 = arith.constant 0.000000e+00 : f32
    %325 = vector.broadcast %cst_109 : f32 to vector<1x128xf32>
    %326 = vector.extract_strided_slice %324 {offsets = [0, 0], sizes = [1, 32], strides = [1, 1]} : vector<9x32xf32> to vector<1x32xf32>
    %327 = vector.extract_strided_slice %3 {offsets = [0, 0, 0], sizes = [1, 32, 128], strides = [1, 1, 1]} : vector<9x32x128xf32> to vector<1x32x128xf32>
    %328 = vector.shape_cast %327 : vector<1x32x128xf32> to vector<32x128xf32>
    %cst_110 = arith.constant dense<0.000000e+00> : vector<1x128xf32>
    %329 = tpu.matmul %326, %328, %cst_110 {dimension_numbers = #tpu.dot_dimension_numbers<[1], [0], [0], [1], [0, 0, 1, 1], [], []>} : vector<1x32xf32>, vector<32x128xf32>, vector<1x128xf32> -> vector<1x128xf32>
    %330 = arith.addf %325, %329 : vector<1x128xf32>
    %331 = vector.extract_strided_slice %324 {offsets = [1, 0], sizes = [1, 32], strides = [1, 1]} : vector<9x32xf32> to vector<1x32xf32>
    %332 = vector.extract_strided_slice %3 {offsets = [1, 0, 0], sizes = [1, 32, 128], strides = [1, 1, 1]} : vector<9x32x128xf32> to vector<1x32x128xf32>
    %333 = vector.shape_cast %332 : vector<1x32x128xf32> to vector<32x128xf32>
    %cst_111 = arith.constant dense<0.000000e+00> : vector<1x128xf32>
    %334 = tpu.matmul %331, %333, %cst_111 {dimension_numbers = #tpu.dot_dimension_numbers<[1], [0], [0], [1], [0, 0, 1, 1], [], []>} : vector<1x32xf32>, vector<32x128xf32>, vector<1x128xf32> -> vector<1x128xf32>
    %335 = arith.addf %330, %334 : vector<1x128xf32>
    %336 = vector.extract_strided_slice %324 {offsets = [2, 0], sizes = [1, 32], strides = [1, 1]} : vector<9x32xf32> to vector<1x32xf32>
    %337 = vector.extract_strided_slice %3 {offsets = [2, 0, 0], sizes = [1, 32, 128], strides = [1, 1, 1]} : vector<9x32x128xf32> to vector<1x32x128xf32>
    %338 = vector.shape_cast %337 : vector<1x32x128xf32> to vector<32x128xf32>
    %cst_112 = arith.constant dense<0.000000e+00> : vector<1x128xf32>
    %339 = tpu.matmul %336, %338, %cst_112 {dimension_numbers = #tpu.dot_dimension_numbers<[1], [0], [0], [1], [0, 0, 1, 1], [], []>} : vector<1x32xf32>, vector<32x128xf32>, vector<1x128xf32> -> vector<1x128xf32>
    %340 = arith.addf %335, %339 : vector<1x128xf32>
    %341 = vector.extract_strided_slice %324 {offsets = [3, 0], sizes = [1, 32], strides = [1, 1]} : vector<9x32xf32> to vector<1x32xf32>
    %342 = vector.extract_strided_slice %3 {offsets = [3, 0, 0], sizes = [1, 32, 128], strides = [1, 1, 1]} : vector<9x32x128xf32> to vector<1x32x128xf32>
    %343 = vector.shape_cast %342 : vector<1x32x128xf32> to vector<32x128xf32>
    %cst_113 = arith.constant dense<0.000000e+00> : vector<1x128xf32>
    %344 = tpu.matmul %341, %343, %cst_113 {dimension_numbers = #tpu.dot_dimension_numbers<[1], [0], [0], [1], [0, 0, 1, 1], [], []>} : vector<1x32xf32>, vector<32x128xf32>, vector<1x128xf32> -> vector<1x128xf32>
    %345 = arith.addf %340, %344 : vector<1x128xf32>
    %346 = vector.extract_strided_slice %324 {offsets = [4, 0], sizes = [1, 32], strides = [1, 1]} : vector<9x32xf32> to vector<1x32xf32>
    %347 = vector.extract_strided_slice %3 {offsets = [4, 0, 0], sizes = [1, 32, 128], strides = [1, 1, 1]} : vector<9x32x128xf32> to vector<1x32x128xf32>
    %348 = vector.shape_cast %347 : vector<1x32x128xf32> to vector<32x128xf32>
    %cst_114 = arith.constant dense<0.000000e+00> : vector<1x128xf32>
    %349 = tpu.matmul %346, %348, %cst_114 {dimension_numbers = #tpu.dot_dimension_numbers<[1], [0], [0], [1], [0, 0, 1, 1], [], []>} : vector<1x32xf32>, vector<32x128xf32>, vector<1x128xf32> -> vector<1x128xf32>
    %350 = arith.addf %345, %349 : vector<1x128xf32>
    %351 = vector.extract_strided_slice %324 {offsets = [5, 0], sizes = [1, 32], strides = [1, 1]} : vector<9x32xf32> to vector<1x32xf32>
    %352 = vector.extract_strided_slice %3 {offsets = [5, 0, 0], sizes = [1, 32, 128], strides = [1, 1, 1]} : vector<9x32x128xf32> to vector<1x32x128xf32>
    %353 = vector.shape_cast %352 : vector<1x32x128xf32> to vector<32x128xf32>
    %cst_115 = arith.constant dense<0.000000e+00> : vector<1x128xf32>
    %354 = tpu.matmul %351, %353, %cst_115 {dimension_numbers = #tpu.dot_dimension_numbers<[1], [0], [0], [1], [0, 0, 1, 1], [], []>} : vector<1x32xf32>, vector<32x128xf32>, vector<1x128xf32> -> vector<1x128xf32>
    %355 = arith.addf %350, %354 : vector<1x128xf32>
    %356 = vector.extract_strided_slice %324 {offsets = [6, 0], sizes = [1, 32], strides = [1, 1]} : vector<9x32xf32> to vector<1x32xf32>
    %357 = vector.extract_strided_slice %3 {offsets = [6, 0, 0], sizes = [1, 32, 128], strides = [1, 1, 1]} : vector<9x32x128xf32> to vector<1x32x128xf32>
    %358 = vector.shape_cast %357 : vector<1x32x128xf32> to vector<32x128xf32>
    %cst_116 = arith.constant dense<0.000000e+00> : vector<1x128xf32>
    %359 = tpu.matmul %356, %358, %cst_116 {dimension_numbers = #tpu.dot_dimension_numbers<[1], [0], [0], [1], [0, 0, 1, 1], [], []>} : vector<1x32xf32>, vector<32x128xf32>, vector<1x128xf32> -> vector<1x128xf32>
    %360 = arith.addf %355, %359 : vector<1x128xf32>
    %361 = vector.extract_strided_slice %324 {offsets = [7, 0], sizes = [1, 32], strides = [1, 1]} : vector<9x32xf32> to vector<1x32xf32>
    %362 = vector.extract_strided_slice %3 {offsets = [7, 0, 0], sizes = [1, 32, 128], strides = [1, 1, 1]} : vector<9x32x128xf32> to vector<1x32x128xf32>
    %363 = vector.shape_cast %362 : vector<1x32x128xf32> to vector<32x128xf32>
    %cst_117 = arith.constant dense<0.000000e+00> : vector<1x128xf32>
    %364 = tpu.matmul %361, %363, %cst_117 {dimension_numbers = #tpu.dot_dimension_numbers<[1], [0], [0], [1], [0, 0, 1, 1], [], []>} : vector<1x32xf32>, vector<32x128xf32>, vector<1x128xf32> -> vector<1x128xf32>
    %365 = arith.addf %360, %364 : vector<1x128xf32>
    %366 = vector.extract_strided_slice %324 {offsets = [8, 0], sizes = [1, 32], strides = [1, 1]} : vector<9x32xf32> to vector<1x32xf32>
    %367 = vector.extract_strided_slice %3 {offsets = [8, 0, 0], sizes = [1, 32, 128], strides = [1, 1, 1]} : vector<9x32x128xf32> to vector<1x32x128xf32>
    %368 = vector.shape_cast %367 : vector<1x32x128xf32> to vector<32x128xf32>
    %cst_118 = arith.constant dense<0.000000e+00> : vector<1x128xf32>
    %369 = tpu.matmul %366, %368, %cst_118 {dimension_numbers = #tpu.dot_dimension_numbers<[1], [0], [0], [1], [0, 0, 1, 1], [], []>} : vector<1x32xf32>, vector<32x128xf32>, vector<1x128xf32> -> vector<1x128xf32>
    %370 = arith.addf %365, %369 : vector<1x128xf32>
    %371 = arith.addf %370, %8 : vector<1x128xf32>
    %cst_119 = arith.constant 0.000000e+00 : f32
    %372 = vector.broadcast %cst_119 : f32 to vector<1x128xf32>
    %373 = arith.maximumf %371, %372 : vector<1x128xf32>
    %cst_120 = arith.constant dense<0.000000e+00> : vector<1x16xf32>
    %374 = tpu.matmul %373, %4, %cst_120 {dimension_numbers = #tpu.dot_dimension_numbers<[1], [0], [0], [1], [0, 0, 1, 1], [], []>} : vector<1x128xf32>, vector<128x16xf32>, vector<1x16xf32> -> vector<1x16xf32>
    %375 = arith.addf %374, %9 : vector<1x16xf32>
    %376 = math.tanh %375 : vector<1x16xf32>
    %c1_121 = arith.constant 1 : index
    %c0_122 = arith.constant 0 : index
    %377 = vector.load %arg15[%c1_121, %c0_122] : memref<2x16xf32, #tpu.memory_space<vmem>>, vector<1x16xf32>
    tpu.vector_store %arg15[%c1_121, %c0_122], %376 {strides = array<i32>} : memref<2x16xf32, #tpu.memory_space<vmem>>, vector<1x16xf32>,
    return
  }
}

</mosaic_0001>

<bundles_post_ra>
// kernel: encoder_forward.1
= control target key start
LH: loop header
LB: loop body
LE: loop exit
PB: predicated region body
PF: predicated region fallthrough
CT: control target
= control target key end

     0   :  { %vm436_vm0 = vcmask 1040384   ;;  %v13482_v2 = vmov 0.0|0.0   ;;  %vm10095_vm1 = vmmov 1   ;;  %vm10096_vm3 = vmmov 0   ;;  %s13361_s0 = inlined_call_operand.vmem [shape: f32[2,196,9], index: 0, kind: input, shape index: {}]   ;;  %s13362_s1 = inlined_call_operand.vmem [shape: f32[9,8], index: 1, kind: input, shape index: {}]   ;;  %s13363_s2 = inlined_call_operand.vmem [shape: f32[1,8], index: 2, kind: input, shape index: {}]   ;;  %s13364_s3 = inlined_call_operand.vmem [shape: bf16[441,196], index: 3, kind: input, shape index: {}]   ;;  %s13365_s4 = inlined_call_operand.vmem [shape: f32[9,8,16], index: 4, kind: input, shape index: {}]   ;;  %s13366_s5 = inlined_call_operand.vmem [shape: f32[1,16], index: 5, kind: input, shape index: {}]   ;;  %s13367_s6 = inlined_call_operand.vmem [shape: f32[1,16], index: 6, kind: input, shape index: {}]   ;;  %s13368_s7 = inlined_call_operand.vmem [shape: f32[1,16], index: 7, kind: input, shape index: {}]   ;;  %s13369_s8 = inlined_call_operand.vmem [shape: bf16[81,49], index: 8, kind: input, shape index: {}]   ;;  %s13370_s9 = inlined_call_operand.vmem [shape: f32[9,16,32], index: 9, kind: input, shape index: {}]   ;;  %s13371_s10 = inlined_call_operand.vmem [shape: f32[1,32], index: 10, kind: input, shape index: {}]   ;;  %s13372_s11 = inlined_call_operand.vmem [shape: f32[9,32,128], index: 11, kind: input, shape index: {}]   ;;  %s13373_s12 = inlined_call_operand.vmem [shape: f32[1,128], index: 12, kind: input, shape index: {}]   ;;  %s13374_s13 = inlined_call_operand.vmem [shape: f32[128,16], index: 13, kind: input, shape index: {}]   ;;  %s13375_s14 = inlined_call_operand.vmem [shape: f32[1,16], index: 14, kind: input, shape index: {}]   ;;  %s13376_s15 = inlined_call_operand.hbm [shape: f32[2,16], index: 15, kind: output, shape index: {}]  }
   0x1   :  { %v51_v0 = vld [vmem:[%s13362_s1] sm:$0xff]  ;;  %v52_v1 = vld [vmem:[%s13362_s1 + $0x8] sm:$0x1]  ;;  %9690 = vmatprep.subr.bf16.mxu0 %v13482_v2  ;;  %vm10187_vm2 = vmpackc.low %vm436_vm0, %vm10095_vm1  ;;  %10016 = vmatprep.subr.bf16.mxu1 %v13482_v2  ;;  %v13486_v5 = vmov 0.0   ;;  %vm360_vm4 = vcmask 72704  }
   0x2   :  { %v9691_v3 = vpack.c.bf16 %v52_v1, %v51_v0  ;;  %8634 = vmatprep.mubr.msk.f32.mxu0 %vm10096_vm3, %v13486_v5  ;;  %8700 = vmatprep.mubr.msk.f32.mxu1 %vm10096_vm3, %v13486_v5  ;;  %v329_v6 = vld [vmem:[%s13361_s0] sm:$0xff]  ;;  %v330_v7 = vld [vmem:[%s13361_s0 + $0x8] sm:$0xff]  ;;  %v351_v8 = vld [vmem:[%s13361_s0 + $0xb0] sm:$0xff] }
   0x3   :  { %v352_v9 = vld [vmem:[%s13361_s0 + $0xb8] sm:$0xff] }
   0x4   :  { %9693 = vmatpush3.bf16.msk.msra.mxu0 %vm10187_vm2, %v9691_v3  ;;  %10017 = vmatpush3.bf16.msk.msra.mxu1 %vm10187_vm2, %v9691_v3 }
   0x5   :  { %9698 = vmatprep.subr.bf16.mxu0 %v13482_v2  ;;  %9694 = vmatprep.subr.bf16.mxu1 %v13482_v2 }
   0x7   :  { %8635 = vmatmul.mubr.msk.f32.vlgmr.msra.gmra.mrb[0].mxu0 %vm360_vm4, %v329_v6  ;;  %8701 = vmatmul.mubr.msk.f32.vlgmr.msra.gmra.mrb[0].mxu1 %vm360_vm4, %v351_v8 }
   0x8   :  { %8637 = vmatprep.mubr.msk.f32.mxu0 %vm10096_vm3, %v13486_v5  ;;  %8703 = vmatprep.mubr.msk.f32.mxu1 %vm10096_vm3, %v13486_v5 }
   0xb   :  { %8638 = vmatmul.mubr.msk.f32.gmra.mrb[2].mxu0 %vm360_vm4, %v330_v7 }
   0xc   :  { %20 = vsyncpa [#allocation3], 0  ;;  %8640 = vmatprep.mubr.msk.f32.mxu0 %vm10096_vm3, %v13486_v5  ;;  %v331_v10 = vld [vmem:[%s13361_s0 + $0x10] sm:$0xff]  ;;  %9697 = vmatpush3.bf16.msk.msra.mxu1 %vm10187_vm2, %v9691_v3  ;;  %v353_v11 = vld [vmem:[%s13361_s0 + $0xc0] sm:$0xf]  ;;  %vm971_vm5 = vcmask 556032  }
   0xd   :  { %8788 = vmatprep.subr.mxu1 %v13486_v5  ;;  %8704 = vmatmul.mubr.msk.f32.gmra.mrb[2].mxu1 %vm360_vm4, %v352_v9  ;;  %v332_v12 = vld [vmem:[%s13361_s0 + $0x18] sm:$0xff]  ;;  %v333_v13 = vld [vmem:[%s13361_s0 + $0x20] sm:$0xff]  ;;  %v334_v14 = vld [vmem:[%s13361_s0 + $0x28] sm:$0xff]  ;;  %vm1140_vm6 = vcmask 1043456   ;;  %vm1496_vm7 = vcmask 1046528   ;;  %vm1510_vm8 = vcmask 64512  }
   0xe   :  { %8706 = vmatprep.mubr.msk.f32.mxu1 %vm10096_vm3, %v13486_v5  ;;  %v335_v15 = vld [vmem:[%s13361_s0 + $0x30] sm:$0xff]  ;;  %v336_v16 = vld [vmem:[%s13361_s0 + $0x38] sm:$0xff]  ;;  %v337_v17 = vld [vmem:[%s13361_s0 + $0x40] sm:$0xff]  ;;  %vm1751_vm9 = vcmask 1045504   ;;  %vm1892_vm10 = vcmask 1044480   ;;  %vm2173_vm11 = vcmask 1042432  }
   0xf   :  { %8641 = vmatmul.mubr.msk.f32.gmra.mrb[4].mxu0 %vm360_vm4, %v331_v10  ;;  %v338_v18 = vld [vmem:[%s13361_s0 + $0x48] sm:$0xff]  ;;  %v339_v19 = vld [vmem:[%s13361_s0 + $0x50] sm:$0xff]  ;;  %v340_v20 = vld [vmem:[%s13361_s0 + $0x58] sm:$0xff]  ;;  %vm2314_vm12 = vcmask 1041408   ;;  %vm4307_vm13 = vcmask 130048   ;;  %vm4319_vm14 = vcmask 122880  }
  0x10   :  { %8643 = vmatprep.mubr.msk.f32.mxu0 %vm10096_vm3, %v13486_v5  ;;  %v341_v21 = vld [vmem:[%s13361_s0 + $0x60] sm:$0xff]  ;;  %v342_v22 = vld [vmem:[%s13361_s0 + $0x68] sm:$0xff]  ;;  %v343_v23 = vld [vmem:[%s13361_s0 + $0x70] sm:$0xff]  ;;  %vm4458_vm15 = vcmask 400384   ;;  %vm5384_vm1 = vcmask 261120  }
  0x11   :  { %8707 = vmatmul.mubr.msk.f32.gmra.mrb[4].mxu1 %vm360_vm4, %v353_v11  ;;  %v344_v24 = vld [vmem:[%s13361_s0 + $0x78] sm:$0xff]  ;;  %v345_v25 = vld [vmem:[%s13361_s0 + $0x80] sm:$0xff]  ;;  %v346_v26 = vld [vmem:[%s13361_s0 + $0x88] sm:$0xff] }
  0x12   :  { %8713 = vmatprep.mubr.msk.f32.mxu1 %vm10096_vm3, %v13486_v5  ;;  %v347_v27 = vld [vmem:[%s13361_s0 + $0x90] sm:$0xff]  ;;  %v348_v28 = vld [vmem:[%s13361_s0 + $0x98] sm:$0xff]  ;;  %v349_v29 = vld [vmem:[%s13361_s0 + $0xa0] sm:$0xff] }
  0x13   :  { %8644 = vmatmul.mubr.msk.f32.gmra.mrb[6].mxu0 %vm360_vm4, %v332_v12  ;;  %v350_v30 = vld [vmem:[%s13361_s0 + $0xa8] sm:$0xff]  ;;  %v10356_v31 = vld [vmem:[%s13364_s3] sm:$0xff] }
  0x14   :  { %8646 = vmatprep.mubr.msk.f32.mxu0 %vm10096_vm3, %v13486_v5  ;;  %v13481_v32 = vunpack.c.h.bf16 %v10356_v31  ;;  %v10365_v33 = vld [vmem:[%s13363_s2] ss:$0 sm:$0xff] }
  0x17   :  { %8647 = vmatmul.mubr.msk.f32.gmra.mrb[8].mxu0 %vm360_vm4, %v333_v13 }
  0x18   :  { %8649 = vmatprep.mubr.msk.f32.mxu0 %vm10096_vm3, %v13486_v5 }
  0x1b   :  { %8650 = vmatmul.mubr.msk.f32.gmra.mrb[10].mxu0 %vm360_vm4, %v334_v14 }
  0x1c   :  { %8652 = vmatprep.mubr.msk.f32.mxu0 %vm10096_vm3, %v13486_v5 }
  0x1f   :  { %8653 = vmatmul.mubr.msk.f32.gmra.mrb[12].mxu0 %vm360_vm4, %v335_v15 }
  0x20   :  { %8655 = vmatprep.mubr.msk.f32.mxu0 %vm10096_vm3, %v13486_v5 }
  0x23   :  { %8656 = vmatmul.mubr.msk.f32.gmra.mrb[14].mxu0 %vm360_vm4, %v336_v16 }
  0x24   :  { %8658 = vmatprep.mubr.msk.f32.mxu0 %vm10096_vm3, %v13486_v5 }
  0x27   :  { %8659 = vmatmul.mubr.msk.f32.gmra.mrb[16].mxu0 %vm360_vm4, %v337_v17 }
  0x28   :  { %8661 = vmatprep.mubr.msk.f32.mxu0 %vm10096_vm3, %v13486_v5 }
  0x2b   :  { %8662 = vmatmul.mubr.msk.f32.gmra.mrb[18].mxu0 %vm360_vm4, %v338_v18 }
  0x2c   :  { %8664 = vmatprep.mubr.msk.f32.mxu0 %vm10096_vm3, %v13486_v5 }
  0x2f   :  { %8665 = vmatmul.mubr.msk.f32.gmra.mrb[20].mxu0 %vm360_vm4, %v339_v19 }
  0x30   :  { %8667 = vmatprep.mubr.msk.f32.mxu0 %vm10096_vm3, %v13486_v5 }
  0x33   :  { %8668 = vmatmul.mubr.msk.f32.gmra.mrb[22].mxu0 %vm360_vm4, %v340_v20 }
  0x34   :  { %8670 = vmatprep.mubr.msk.f32.mxu0 %vm10096_vm3, %v13486_v5 }
  0x37   :  { %8671 = vmatmul.mubr.msk.f32.gmra.mrb[24].mxu0 %vm360_vm4, %v341_v21 }
  0x38   :  { %8673 = vmatprep.mubr.msk.f32.mxu0 %vm10096_vm3, %v13486_v5 }
  0x3b   :  { %8674 = vmatmul.mubr.msk.f32.gmra.mrb[26].mxu0 %vm360_vm4, %v342_v22 }
  0x3c   :  { %8676 = vmatprep.mubr.msk.f32.mxu0 %vm10096_vm3, %v13486_v5 }
  0x3f   :  { %8677 = vmatmul.mubr.msk.f32.gmra.mrb[28].mxu0 %vm360_vm4, %v343_v23 }
  0x40   :  { %8679 = vmatprep.mubr.msk.f32.mxu0 %vm10096_vm3, %v13486_v5 }
  0x43   :  { %8680 = vmatmul.mubr.msk.f32.gmra.mrb[30].mxu0 %vm360_vm4, %v344_v24 }
  0x44   :  { %8682 = vmatprep.mubr.msk.f32.mxu0 %vm10096_vm3, %v13486_v5 }
  0x47   :  { %8683 = vmatmul.mubr.msk.f32.gmra.mrb[32].mxu0 %vm360_vm4, %v345_v25 }
  0x48   :  { %8685 = vmatprep.mubr.msk.f32.mxu0 %vm10096_vm3, %v13486_v5 }
  0x4b   :  { %8686 = vmatmul.mubr.msk.f32.gmra.mrb[34].mxu0 %vm360_vm4, %v346_v26 }
  0x4c   :  { %8688 = vmatprep.mubr.msk.f32.mxu0 %vm10096_vm3, %v13486_v5 }
  0x4f   :  { %8689 = vmatmul.mubr.msk.f32.gmra.mrb[36].mxu0 %vm360_vm4, %v347_v27 }
  0x50   :  { %8691 = vmatprep.mubr.msk.f32.mxu0 %vm10096_vm3, %v13486_v5 }
  0x53   :  { %8692 = vmatmul.mubr.msk.f32.gmra.mrb[38].mxu0 %vm360_vm4, %v348_v28 }
  0x54   :  { %8694 = vmatprep.mubr.msk.f32.mxu0 %vm10096_vm3, %v13486_v5 }
  0x57   :  { %8695 = vmatmul.mubr.msk.f32.gmra.mrb[40].mxu0 %vm360_vm4, %v349_v29 }
  0x58   :  { %8697 = vmatprep.mubr.msk.f32.mxu0 %vm10096_vm3, %v13486_v5 }
  0x5b   :  { %8698 = vmatmul.mubr.msk.f32.gmra.mrb[42].mxu0 %vm360_vm4, %v350_v30 }
  0x5c   :  { %7857 = vmatprep.mubr.msk.f32.mxu0 %vm971_vm5, %v13481_v32 }
  0xda   :  { %v506_v34 = vpop.f32.mrb[0].mxu0  ;;  %v616_v37 = vpop.f32.mrb[0].mxu1 }
  0xdb   :  { %v8636_v35 = vpop.f32.mrb[1].mxu0  ;;  %v507_v36 = vadd.f32 %v10365_v33, %v506_v34  ;;  %v617_v39 = vadd.f32 %v10365_v33, %v616_v37  ;;  %v8702_v40 = vpop.f32.mrb[1].mxu1 }
  0xdd   :  { %v630_v43 = vmax.f32 %v507_v36, 0.0  ;;  %v652_v47 = vmax.f32 %v617_v39, 0.0 }
  0xde   :  { %v511_v38 = vpop.f32.mrb[2].mxu0 }
  0xdf   :  { %v512_v41 = vadd.f32 %v10365_v33, %v511_v38  ;;  %v8639_v42 = vpop.f32.mrb[3].mxu0 }
  0xe0   :  { %v621_v45 = vpop.f32.mrb[2].mxu1 }
  0xe1   :  { %v631_v44 = vmax.f32 %v512_v41, 0.0  ;;  %v622_v48 = vadd.f32 %v10365_v33, %v621_v45  ;;  %v8705_v49 = vpop.f32.mrb[3].mxu1 }
  0xe2   :  { %v516_v46 = vpop.f32.mrb[4].mxu0 }
  0xe3   :  { %v9699_v50 = vpack.c.bf16 %v631_v44, %v630_v43  ;;  %v8642_v51 = vpop.f32.mrb[5].mxu0  ;;  %v653_v52 = vmax.f32 %v622_v48, 0.0  ;;  %v517_v53 = vadd.f32 %v10365_v33, %v516_v46 }
  0xe4   :  { %v10372_v54 = vpop.f32.mrb[4].mxu1 }
  0xe5   :  { %9700 = vmatpush1.bf16.msra.mxu0 %v9699_v50  ;;  %v10375_v56 = vpack.c.bf16 %v653_v52, %v652_v47  ;;  %v8708_v57 = vpop.f32.mrb[5].mxu1  ;;  %v632_v60 = vmax.f32 %v517_v53, 0.0 }
  0xe6   :  { %v521_v55 = vpop.f32.mrb[6].mxu0  ;;  %9701 = vmatprep.subr.bf16.mxu0 %v13482_v2 }
  0xe7   :  { %v522_v58 = vadd.f32 %v10365_v33, %v521_v55  ;;  %v8645_v59 = vpop.f32.mrb[7].mxu0 }
  0xe9   :  { %v633_v61 = vmax.f32 %v522_v58, 0.0 }
  0xea   :  { %v526_v62 = vpop.f32.mrb[8].mxu0 }
  0xeb   :  { %v9702_v63 = vpack.c.bf16 %v633_v61, %v632_v60  ;;  %v8648_v0 = vpop.f32.mrb[9].mxu0  ;;  %v527_v1 = vadd.f32 %v10365_v33, %v526_v62 }
  0xed   :  { %9703 = vmatpush1.bf16.msra.mxu0 %v9702_v63  ;;  %v634_v7 = vmax.f32 %v527_v1, 0.0 }
  0xee   :  { %v531_v3 = vpop.f32.mrb[10].mxu0  ;;  %9704 = vmatprep.subr.bf16.mxu0 %v13482_v2 }
  0xef   :  { %v532_v4 = vadd.f32 %v10365_v33, %v531_v3  ;;  %v8651_v6 = vpop.f32.mrb[11].mxu0 }
  0xf1   :  { %v635_v8 = vmax.f32 %v532_v4, 0.0 }
  0xf2   :  { %v536_v9 = vpop.f32.mrb[12].mxu0 }
  0xf3   :  { %v9705_v10 = vpack.c.bf16 %v635_v8, %v634_v7  ;;  %v8654_v11 = vpop.f32.mrb[13].mxu0  ;;  %v537_v12 = vadd.f32 %v10365_v33, %v536_v9 }
  0xf4   :  { %v7805_v11 = vld [vmem:[%s13361_s0 + $0xc8] sm:$0xff] }
  0xf5   :  { %9706 = vmatpush1.bf16.msra.mxu0 %v9705_v10  ;;  %v636_v16 = vmax.f32 %v537_v12, 0.0  ;;  %8714 = vmatmul.mubr.msk.f32.vlgmr.msra.gmra.mrb[6].mxu1 %vm360_vm4, %v7805_v11 }
  0xf6   :  { %v541_v13 = vpop.f32.mrb[14].mxu0  ;;  %9707 = vmatprep.subr.bf16.mxu0 %v13482_v2  ;;  %8716 = vmatprep.mubr.msk.f32.mxu1 %vm10096_vm3, %v13486_v5 }
  0xf7   :  { %v542_v14 = vadd.f32 %v10365_v33, %v541_v13  ;;  %v8657_v15 = vpop.f32.mrb[15].mxu0 }
  0xf9   :  { %v637_v17 = vmax.f32 %v542_v14, 0.0 }
  0xfa   :  { %v546_v18 = vpop.f32.mrb[16].mxu0 }
  0xfb   :  { %v9708_v19 = vpack.c.bf16 %v637_v17, %v636_v16  ;;  %v8660_v20 = vpop.f32.mrb[17].mxu0  ;;  %v547_v21 = vadd.f32 %v10365_v33, %v546_v18  ;;  %v7806_v17 = vld [vmem:[%s13361_s0 + $0xd0] sm:$0xff] }
  0xfc   :  { %8717 = vmatmul.mubr.msk.f32.gmra.mrb[8].mxu1 %vm360_vm4, %v7806_v17 }
  0xfd   :  { %9709 = vmatpush1.bf16.msra.mxu0 %v9708_v19  ;;  %v638_v25 = vmax.f32 %v547_v21, 0.0  ;;  %8719 = vmatprep.mubr.msk.f32.mxu1 %vm10096_vm3, %v13486_v5 }
  0xfe   :  { %v551_v22 = vpop.f32.mrb[18].mxu0  ;;  %9710 = vmatprep.subr.bf16.mxu0 %v13482_v2 }
  0xff   :  { %v552_v23 = vadd.f32 %v10365_v33, %v551_v22  ;;  %v8663_v24 = vpop.f32.mrb[19].mxu0  ;;  %v7807_v22 = vld [vmem:[%s13361_s0 + $0xd8] sm:$0xff] }
 0x100   :  { %8720 = vmatmul.mubr.msk.f32.gmra.mrb[10].mxu1 %vm360_vm4, %v7807_v22  ;;  %v10657_v22 = vld [vmem:[%s13364_s3 + $0x68] sm:$0xff] }
 0x101   :  { %v639_v26 = vmax.f32 %v552_v23, 0.0  ;;  %8722 = vmatprep.mubr.msk.f32.mxu1 %vm10096_vm3, %v13486_v5 }
 0x102   :  { %v556_v27 = vpop.f32.mrb[20].mxu0 }
 0x103   :  { %v9711_v28 = vpack.c.bf16 %v639_v26, %v638_v25  ;;  %v8666_v29 = vpop.f32.mrb[21].mxu0  ;;  %v557_v30 = vadd.f32 %v10365_v33, %v556_v27  ;;  %v7808_v27 = vld [vmem:[%s13361_s0 + $0xe0] sm:$0xff] }
 0x104   :  { %8723 = vmatmul.mubr.msk.f32.gmra.mrb[12].mxu1 %vm360_vm4, %v7808_v27  ;;  %v627_v29 = vadd.f32 %v10365_v33, %v10372_v54  ;;  %v13478_v54 = vunpack.c.l.bf16 %v10356_v31  ;;  %v13400_v27 = vunpack.c.l.bf16 %v10657_v22 }
 0x105   :  { %9712 = vmatpush1.bf16.msra.mxu0 %v9711_v28  ;;  %v640_v37 = vmax.f32 %v557_v30, 0.0  ;;  %8725 = vmatprep.mubr.msk.f32.mxu1 %vm10096_vm3, %v13486_v5  ;;  %v7809_v30 = vld [vmem:[%s13361_s0 + $0xe8] sm:$0xff] }
 0x106   :  { %v561_v34 = vpop.f32.mrb[22].mxu0  ;;  %9713 = vmatprep.subr.bf16.mxu0 %v13482_v2 }
 0x107   :  { %v562_v35 = vadd.f32 %v10365_v33, %v561_v34  ;;  %v8669_v36 = vpop.f32.mrb[23].mxu0  ;;  %v10439_v34 = vld [vmem:[%s13364_s3 + $0x8] sm:$0xff] }
 0x108   :  { %8726 = vmatmul.mubr.msk.f32.gmra.mrb[14].mxu1 %vm360_vm4, %v7809_v30  ;;  %v54_v36 = vld [vmem:[%s13365_s4 + $0x8] sm:$0xff]  ;;  %v10693_v30 = vld [vmem:[%s13364_s3 + $0x78] sm:$0xff] }
 0x109   :  { %v641_v38 = vmax.f32 %v562_v35, 0.0  ;;  %8728 = vmatprep.mubr.msk.f32.mxu1 %vm10096_vm3, %v13486_v5  ;;  %v654_v35 = vmax.f32 %v627_v29, 0.0  ;;  %8789 = vmatpush3.msra.mxu1 %v54_v36  ;;  %v13391_v36 = vunpack.c.h.bf16 %v10693_v30 }
 0x10a   :  { %v566_v39 = vpop.f32.mrb[24].mxu0  ;;  %8811 = vmatprep.subr.mxu1 %v13486_v5 }
 0x10b   :  { %v9714_v40 = vpack.c.bf16 %v641_v38, %v640_v37  ;;  %v8672_v41 = vpop.f32.mrb[25].mxu0  ;;  %v567_v42 = vadd.f32 %v10365_v33, %v566_v39  ;;  %v7810_v37 = vld [vmem:[%s13361_s0 + $0xf0] sm:$0xff]  ;;  %v13475_v38 = vunpack.c.h.bf16 %v10439_v34  ;;  %v13472_v39 = vunpack.c.l.bf16 %v10439_v34 }
 0x10c   :  { %8729 = vmatmul.mubr.msk.f32.gmra.mrb[16].mxu1 %vm360_vm4, %v7810_v37  ;;  %v10708_v37 = vld [vmem:[%s13364_s3 + $0x80] sm:$0xff] }
 0x10d   :  { %9715 = vmatpush1.bf16.msra.mxu0 %v9714_v40  ;;  %v642_v46 = vmax.f32 %v567_v42, 0.0  ;;  %8731 = vmatprep.mubr.msk.f32.mxu1 %vm10096_vm3, %v13486_v5  ;;  %v7811_v40 = vld [vmem:[%s13361_s0 + $0xf8] sm:$0xff] }
 0x10e   :  { %v571_v43 = vpop.f32.mrb[26].mxu0  ;;  %9716 = vmatprep.subr.bf16.mxu0 %v13482_v2  ;;  %v10477_v42 = vld [vmem:[%s13364_s3 + $0x18] sm:$0xff] }
 0x10f   :  { %v572_v44 = vadd.f32 %v10365_v33, %v571_v43  ;;  %v8675_v45 = vpop.f32.mrb[27].mxu0 }
 0x110   :  { %8732 = vmatmul.mubr.msk.f32.gmra.mrb[18].mxu1 %vm360_vm4, %v7811_v40  ;;  %v13463_v45 = vunpack.c.h.bf16 %v10477_v42  ;;  %v13388_v40 = vunpack.c.l.bf16 %v10693_v30 }
 0x111   :  { %v643_v47 = vmax.f32 %v572_v44, 0.0  ;;  %8734 = vmatprep.mubr.msk.f32.mxu1 %vm10096_vm3, %v13486_v5  ;;  %v7812_v44 = vld [vmem:[%s13361_s0 + $0x100] sm:$0xff] }
 0x112   :  { %v576_v48 = vpop.f32.mrb[28].mxu0 }
 0x113   :  { %v9717_v49 = vpack.c.bf16 %v643_v47, %v642_v46  ;;  %v8678_v50 = vpop.f32.mrb[29].mxu0  ;;  %v577_v51 = vadd.f32 %v10365_v33, %v576_v48  ;;  %v10495_v46 = vld [vmem:[%s13364_s3 + $0x20] sm:$0xff]  ;;  %v13460_v47 = vunpack.c.l.bf16 %v10477_v42  ;;  %v7813_v48 = vld [vmem:[%s13361_s0 + $0x108] sm:$0xff] }
 0x114   :  { %8735 = vmatmul.mubr.msk.f32.gmra.mrb[20].mxu1 %vm360_vm4, %v7812_v44  ;;  %v10513_v50 = vld [vmem:[%s13364_s3 + $0x28] sm:$0xff]  ;;  %v13385_v44 = vunpack.c.h.bf16 %v10708_v37 }
 0x115   :  { %9718 = vmatpush1.bf16.msra.mxu0 %v9717_v49  ;;  %v644_v57 = vmax.f32 %v577_v51, 0.0  ;;  %8737 = vmatprep.mubr.msk.f32.mxu1 %vm10096_vm3, %v13486_v5  ;;  %v13457_v49 = vunpack.c.h.bf16 %v10495_v46  ;;  %v13454_v51 = vunpack.c.l.bf16 %v10495_v46 }
 0x116   :  { %v581_v52 = vpop.f32.mrb[30].mxu0  ;;  %9719 = vmatprep.subr.bf16.mxu0 %v13482_v2 }
 0x117   :  { %v582_v53 = vadd.f32 %v10365_v33, %v581_v52  ;;  %v8681_v55 = vpop.f32.mrb[31].mxu0  ;;  %v7814_v52 = vld [vmem:[%s13361_s0 + $0x110] sm:$0xff] }
 0x118   :  { %8738 = vmatmul.mubr.msk.f32.gmra.mrb[22].mxu1 %vm360_vm4, %v7813_v48  ;;  %v10531_v55 = vld [vmem:[%s13364_s3 + $0x30] sm:$0xff]  ;;  %v10720_v48 = vld [vmem:[%s13364_s3 + $0x88] sm:$0xff] }
 0x119   :  { %v645_v58 = vmax.f32 %v582_v53, 0.0  ;;  %8740 = vmatprep.mubr.msk.f32.mxu1 %vm10096_vm3, %v13486_v5  ;;  %v13451_v53 = vunpack.c.h.bf16 %v10513_v50 }
 0x11a   :  { %v586_v59 = vpop.f32.mrb[32].mxu0 }
 0x11b   :  { %v9720_v60 = vpack.c.bf16 %v645_v58, %v644_v57  ;;  %v8684_v61 = vpop.f32.mrb[33].mxu0  ;;  %v587_v62 = vadd.f32 %v10365_v33, %v586_v59  ;;  %v13448_v57 = vunpack.c.l.bf16 %v10513_v50  ;;  %v7815_v58 = vld [vmem:[%s13361_s0 + $0x118] sm:$0xff]  ;;  %v13445_v59 = vunpack.c.h.bf16 %v10531_v55 }
 0x11c   :  { %8741 = vmatmul.mubr.msk.f32.gmra.mrb[24].mxu1 %vm360_vm4, %v7814_v52  ;;  %v13442_v61 = vunpack.c.l.bf16 %v10531_v55  ;;  %v13382_v52 = vunpack.c.l.bf16 %v10708_v37 }
 0x11d   :  { %9721 = vmatpush1.bf16.msra.mxu0 %v9720_v60  ;;  %v646_v3 = vmax.f32 %v587_v62, 0.0  ;;  %8743 = vmatprep.mubr.msk.f32.mxu1 %vm10096_vm3, %v13486_v5  ;;  %v10549_v60 = vld [vmem:[%s13364_s3 + $0x38] sm:$0xff]  ;;  %v7816_v62 = vld [vmem:[%s13361_s0 + $0x120] sm:$0xff] }
 0x11e   :  { %v591_v63 = vpop.f32.mrb[34].mxu0  ;;  %9722 = vmatprep.subr.bf16.mxu0 %v13482_v2 }
 0x11f   :  { %v592_v0 = vadd.f32 %v10365_v33, %v591_v63  ;;  %v8687_v1 = vpop.f32.mrb[35].mxu0  ;;  %v13439_v63 = vunpack.c.h.bf16 %v10549_v60 }
 0x120   :  { %8744 = vmatmul.mubr.msk.f32.gmra.mrb[26].mxu1 %vm360_vm4, %v7815_v58  ;;  %v13436_v1 = vunpack.c.l.bf16 %v10549_v60  ;;  %v13379_v58 = vunpack.c.h.bf16 %v10720_v48 }
 0x121   :  { %v647_v4 = vmax.f32 %v592_v0, 0.0  ;;  %8746 = vmatprep.mubr.msk.f32.mxu1 %vm10096_vm3, %v13486_v5  ;;  %v10567_v0 = vld [vmem:[%s13364_s3 + $0x40] sm:$0xff] }
 0x122   :  { %v596_v6 = vpop.f32.mrb[36].mxu0 }
 0x123   :  { %v9723_v7 = vpack.c.bf16 %v647_v4, %v646_v3  ;;  %v8690_v8 = vpop.f32.mrb[37].mxu0  ;;  %v597_v9 = vadd.f32 %v10365_v33, %v596_v6  ;;  %v7817_v3 = vld [vmem:[%s13361_s0 + $0x128] sm:$0xff]  ;;  %v13433_v4 = vunpack.c.h.bf16 %v10567_v0 }
 0x124   :  { %8747 = vmatmul.mubr.msk.f32.gmra.mrb[28].mxu1 %vm360_vm4, %v7816_v62  ;;  %v10585_v6 = vld [vmem:[%s13364_s3 + $0x48] sm:$0xff]  ;;  %v7818_v8 = vld [vmem:[%s13361_s0 + $0x130] sm:$0xff] }
 0x125   :  { %9724 = vmatpush1.bf16.msra.mxu0 %v9723_v7  ;;  %v648_v14 = vmax.f32 %v597_v9, 0.0  ;;  %8749 = vmatprep.mubr.msk.f32.mxu1 %vm10096_vm3, %v13486_v5  ;;  %v13430_v7 = vunpack.c.l.bf16 %v10567_v0  ;;  %v13427_v9 = vunpack.c.h.bf16 %v10585_v6  ;;  %v13424_v11 = vunpack.c.l.bf16 %v10585_v6  ;;  %v10732_v62 = vld [vmem:[%s13364_s3 + $0x90] sm:$0xff] }
 0x126   :  { %v601_v10 = vpop.f32.mrb[38].mxu0  ;;  %9725 = vmatprep.subr.bf16.mxu0 %v13482_v2 }
 0x127   :  { %v602_v12 = vadd.f32 %v10365_v33, %v601_v10  ;;  %v8693_v13 = vpop.f32.mrb[39].mxu0  ;;  %v10603_v10 = vld [vmem:[%s13364_s3 + $0x50] sm:$0xff] }
 0x128   :  { %8750 = vmatmul.mubr.msk.f32.gmra.mrb[30].mxu1 %vm360_vm4, %v7817_v3  ;;  %v13421_v13 = vunpack.c.h.bf16 %v10603_v10  ;;  %v13377_v3 = vunpack.c.l.bf16 %v10720_v48 }
 0x129   :  { %v649_v15 = vmax.f32 %v602_v12, 0.0  ;;  %8752 = vmatprep.mubr.msk.f32.mxu1 %vm10096_vm3, %v13486_v5  ;;  %v7819_v12 = vld [vmem:[%s13361_s0 + $0x138] sm:$0xff] }
 0x12a   :  { %v606_v16 = vpop.f32.mrb[40].mxu0 }
 0x12b   :  { %v9726_v18 = vpack.c.bf16 %v649_v15, %v648_v14  ;;  %v8696_v19 = vpop.f32.mrb[41].mxu0  ;;  %v607_v20 = vadd.f32 %v10365_v33, %v606_v16  ;;  %v10621_v14 = vld [vmem:[%s13364_s3 + $0x58] sm:$0xff]  ;;  %v13418_v15 = vunpack.c.l.bf16 %v10603_v10  ;;  %v7820_v16 = vld [vmem:[%s13361_s0 + $0x140] sm:$0xff] }
 0x12c   :  { %8753 = vmatmul.mubr.msk.f32.gmra.mrb[32].mxu1 %vm360_vm4, %v7818_v8  ;;  %v13415_v17 = vunpack.c.h.bf16 %v10621_v14  ;;  %v13412_v19 = vunpack.c.l.bf16 %v10621_v14  ;;  %v13378_v8 = vunpack.c.h.bf16 %v10732_v62 }
 0x12d   :  { %9727 = vmatpush1.bf16.msra.mxu0 %v9726_v18  ;;  %v650_v25 = vmax.f32 %v607_v20, 0.0  ;;  %8755 = vmatprep.mubr.msk.f32.mxu1 %vm10096_vm3, %v13486_v5  ;;  %v10639_v18 = vld [vmem:[%s13364_s3 + $0x60] sm:$0xff]  ;;  %v7821_v20 = vld [vmem:[%s13361_s0 + $0x148] sm:$0xff] }
 0x12e   :  { %v611_v21 = vpop.f32.mrb[42].mxu0  ;;  %9728 = vmatprep.subr.bf16.mxu0 %v13482_v2 }
 0x12f   :  { %v612_v23 = vadd.f32 %v10365_v33, %v611_v21  ;;  %v8699_v24 = vpop.f32.mrb[43].mxu0  ;;  %v13409_v21 = vunpack.c.h.bf16 %v10639_v18 }
 0x130   :  { %8756 = vmatmul.mubr.msk.f32.gmra.mrb[34].mxu1 %vm360_vm4, %v7819_v12  ;;  %v7822_v24 = vld [vmem:[%s13361_s0 + $0x150] sm:$0xff]  ;;  %v10744_v12 = vld [vmem:[%s13364_s3 + $0x98] sm:$0xff] }
 0x131   :  { %v651_v26 = vmax.f32 %v612_v23, 0.0  ;;  %8758 = vmatprep.mubr.msk.f32.mxu1 %vm10096_vm3, %v13486_v5  ;;  %v13406_v23 = vunpack.c.l.bf16 %v10639_v18 }
 0x133   :  { %v9729_v28 = vpack.c.bf16 %v651_v26, %v650_v25  ;;  %v13403_v25 = vunpack.c.h.bf16 %v10657_v22  ;;  %v10675_v26 = vld [vmem:[%s13364_s3 + $0x70] sm:$0xff] }
 0x134   :  { %8759 = vmatmul.mubr.msk.f32.gmra.mrb[36].mxu1 %vm360_vm4, %v7820_v16  ;;  %v13397_v29 = vunpack.c.h.bf16 %v10675_v26  ;;  %v13380_v16 = vunpack.c.l.bf16 %v10732_v62 }
 0x135   :  { %9730 = vmatpush1.bf16.msra.mxu0 %v9729_v28  ;;  %8761 = vmatprep.mubr.msk.f32.mxu1 %vm10096_vm3, %v13486_v5  ;;  %v7823_v28 = vld [vmem:[%s13361_s0 + $0x158] sm:$0xff] }
 0x136   :  { %9731 = vmatprep.subr.bf16.mxu0 %v13482_v2 }
 0x138   :  { %8762 = vmatmul.mubr.msk.f32.gmra.mrb[38].mxu1 %vm360_vm4, %v7821_v20  ;;  %v13381_v20 = vunpack.c.h.bf16 %v10744_v12 }
 0x139   :  { %9733 = vmatpush1.bf16.msra.mxu0 %v10375_v56  ;;  %v10456_v56 = vld [vmem:[%s13364_s3 + $0x10] sm:$0xff]  ;;  %8764 = vmatprep.mubr.msk.f32.mxu1 %vm10096_vm3, %v13486_v5 }
 0x13a   :  { %1192 = vmatprep.subr.mxu0 %v13486_v5  ;;  %v13469_v41 = vunpack.c.h.bf16 %v10456_v56  ;;  %v13466_v43 = vunpack.c.l.bf16 %v10456_v56 }
 0x13c   :  { %8765 = vmatmul.mubr.msk.f32.gmra.mrb[40].mxu1 %vm360_vm4, %v7822_v24  ;;  %v10756_v24 = vld [vmem:[%s13364_s3 + $0xa0] sm:$0xff] }
 0x13d   :  { %7856 = vmatpush1.msk.msra.mxu0 %vm1140_vm6, %v654_v35  ;;  %8767 = vmatprep.mubr.msk.f32.mxu1 %vm10096_vm3, %v13486_v5  ;;  %v13394_v35 = vunpack.c.l.bf16 %v10675_v26 }
 0x13e   :  { %1209 = vmatmul.mubr.f32.vlgmr.msra.gmra.mrb[44].mxu0 %v13478_v54  ;;  %8972 = vmatprep.subr.mxu0 %v13486_v5 }
 0x13f   :  { %7858 = vmatprep.mubr.msk.f32.mxu0 %vm971_vm5, %v13475_v38 }
 0x140   :  { %8768 = vmatmul.mubr.msk.f32.gmra.mrb[42].mxu1 %vm360_vm4, %v7823_v28  ;;  %v13383_v28 = vunpack.c.l.bf16 %v10744_v12 }
 0x141   :  { %8770 = vmatprep.mubr.msk.f32.mxu1 %vm10096_vm3, %v13486_v5 }
 0x142   :  { %1214 = vmatmul.mubr.f32.gmra.mrb[46].mxu0 %v13472_v39 }
 0x143   :  { %7859 = vmatprep.mubr.msk.f32.mxu0 %vm971_vm5, %v13469_v41 }
 0x146   :  { %1219 = vmatmul.mubr.f32.gmra.mrb[48].mxu0 %v13466_v43 }
 0x147   :  { %7860 = vmatprep.mubr.msk.f32.mxu0 %vm971_vm5, %v13463_v45 }
 0x14a   :  { %1224 = vmatmul.mubr.f32.gmra.mrb[50].mxu0 %v13460_v47 }
 0x14b   :  { %7861 = vmatprep.mubr.msk.f32.mxu0 %vm971_vm5, %v13457_v49 }
 0x14e   :  { %1229 = vmatmul.mubr.f32.gmra.mrb[52].mxu0 %v13454_v51 }
 0x14f   :  { %7862 = vmatprep.mubr.msk.f32.mxu0 %vm971_vm5, %v13451_v53 }
 0x152   :  { %1234 = vmatmul.mubr.f32.gmra.mrb[54].mxu0 %v13448_v57 }
 0x153   :  { %7863 = vmatprep.mubr.msk.f32.mxu0 %vm971_vm5, %v13445_v59 }
 0x156   :  { %1239 = vmatmul.mubr.f32.gmra.mrb[56].mxu0 %v13442_v61 }
 0x157   :  { %7864 = vmatprep.mubr.msk.f32.mxu0 %vm971_vm5, %v13439_v63 }
 0x15a   :  { %1244 = vmatmul.mubr.f32.gmra.mrb[58].mxu0 %v13436_v1 }
 0x15b   :  { %7865 = vmatprep.mubr.msk.f32.mxu0 %vm971_vm5, %v13433_v4 }
 0x15e   :  { %1249 = vmatmul.mubr.f32.gmra.mrb[60].mxu0 %v13430_v7 }
 0x15f   :  { %7866 = vmatprep.mubr.msk.f32.mxu0 %vm971_vm5, %v13427_v9 }
 0x162   :  { %1254 = vmatmul.mubr.f32.gmra.mrb[62].mxu0 %v13424_v11 }
 0x163   :  { %7867 = vmatprep.mubr.msk.f32.mxu0 %vm971_vm5, %v13421_v13 }
 0x166   :  { %1259 = vmatmul.mubr.f32.gmra.mrb[64].mxu0 %v13418_v15 }
 0x167   :  { %7868 = vmatprep.mubr.msk.f32.mxu0 %vm971_vm5, %v13415_v17 }
 0x16a   :  { %1264 = vmatmul.mubr.f32.gmra.mrb[66].mxu0 %v13412_v19 }
 0x16b   :  { %7869 = vmatprep.mubr.msk.f32.mxu0 %vm971_vm5, %v13409_v21 }
 0x16e   :  { %1269 = vmatmul.mubr.f32.gmra.mrb[68].mxu0 %v13406_v23  ;;  %v10910_v23 = vld [vmem:[%s13364_s3 + $0xf0] sm:$0xff] }
 0x16f   :  { %7870 = vmatprep.mubr.msk.f32.mxu0 %vm971_vm5, %v13403_v25  ;;  %13566 = vst [vmem:[#allocation10_spill] sm:$0xff] %v10910_v23  ;;  %v13416_v21 = vunpack.c.l.bf16 %v10910_v23 }
 0x172   :  { %1274 = vmatmul.mubr.f32.gmra.mrb[70].mxu0 %v13400_v27  ;;  %v10880_v27 = vld [vmem:[%s13364_s3 + $0xe0] sm:$0xff] }
 0x173   :  { %7871 = vmatprep.mubr.msk.f32.mxu0 %vm971_vm5, %v13397_v29  ;;  %v10862_v29 = vld [vmem:[%s13364_s3 + $0xd8] sm:$0xff]  ;;  %13564 = vst [vmem:[#allocation8_spill] sm:$0xff] %v10880_v27  ;;  %v13410_v25 = vunpack.c.l.bf16 %v10880_v27 }
 0x174   :  { %13563 = vst [vmem:[#allocation7_spill] sm:$0xff] %v10862_v29 }
 0x176   :  { %1279 = vmatmul.mubr.f32.gmra.mrb[72].mxu0 %v13394_v35  ;;  %v10844_v35 = vld [vmem:[%s13364_s3 + $0xd0] sm:$0xff] }
 0x177   :  { %7872 = vmatprep.mubr.msk.f32.mxu0 %vm971_vm5, %v13391_v36  ;;  %v10826_v36 = vld [vmem:[%s13364_s3 + $0xc8] sm:$0xff]  ;;  %13562 = vst [vmem:[#allocation6_spill] sm:$0xff] %v10844_v35 }
 0x178   :  { %13561 = vst [vmem:[#allocation5_spill] sm:$0xff] %v10826_v36 }
 0x17a   :  { %1284 = vmatmul.mubr.f32.gmra.mrb[74].mxu0 %v13388_v40  ;;  %v10808_v40 = vld [vmem:[%s13364_s3 + $0xc0] sm:$0xff] }
 0x17b   :  { %7873 = vmatprep.mubr.msk.f32.mxu0 %vm971_vm5, %v13385_v44 }
 0x17e   :  { %1289 = vmatmul.mubr.f32.gmra.mrb[76].mxu0 %v13382_v52 }
 0x17f   :  { %7874 = vmatprep.mubr.msk.f32.mxu0 %vm971_vm5, %v13379_v58  ;;  %v13386_v58 = vunpack.c.l.bf16 %v10756_v24 }
 0x182   :  { %1294 = vmatmul.mubr.f32.gmra.mrb[78].mxu0 %v13377_v3  ;;  %v13384_v3 = vunpack.c.h.bf16 %v10756_v24 }
 0x183   :  { %7875 = vmatprep.mubr.msk.f32.mxu0 %vm971_vm5, %v13378_v8  ;;  %v10768_v8 = vld [vmem:[%s13364_s3 + $0xa8] sm:$0xff] }
 0x184   :  { %v13389_v52 = vunpack.c.l.bf16 %v10768_v8 }
 0x186   :  { %1299 = vmatmul.mubr.f32.gmra.mrb[80].mxu0 %v13380_v16  ;;  %v13387_v16 = vunpack.c.h.bf16 %v10768_v8 }
 0x187   :  { %7876 = vmatprep.mubr.msk.f32.mxu0 %vm971_vm5, %v13381_v20  ;;  %v10780_v20 = vld [vmem:[%s13364_s3 + $0xb0] sm:$0xff] }
 0x188   :  { %v13392_v44 = vunpack.c.l.bf16 %v10780_v20 }
 0x18a   :  { %1304 = vmatmul.mubr.f32.gmra.mrb[82].mxu0 %v13383_v28  ;;  %v13390_v28 = vunpack.c.h.bf16 %v10780_v20 }
 0x18b   :  { %7877 = vmatprep.mubr.msk.f32.mxu0 %vm971_vm5, %v13384_v3  ;;  %v10792_v3 = vld [vmem:[%s13364_s3 + $0xb8] sm:$0xff] }
 0x18e   :  { %1309 = vmatmul.mubr.f32.gmra.mrb[84].mxu0 %v13386_v58  ;;  %v7824_v58 = vld [vmem:[%s13361_s0 + $0x160] sm:$0xff] }
 0x18f   :  { %7878 = vmatprep.mubr.msk.f32.mxu0 %vm971_vm5, %v13387_v16  ;;  %v13393_v16 = vunpack.c.h.bf16 %v10792_v3  ;;  %8771 = vmatmul.mubr.msk.f32.gmra.mrb[44].mxu1 %vm360_vm4, %v7824_v58  ;;  %v13396_v58 = vunpack.c.h.bf16 %v10808_v40 }
 0x190   :  { %8773 = vmatprep.mubr.msk.f32.mxu1 %vm10096_vm3, %v13486_v5 }
 0x192   :  { %1314 = vmatmul.mubr.f32.gmra.mrb[86].mxu0 %v13389_v52  ;;  %v13395_v52 = vunpack.c.l.bf16 %v10792_v3 }
 0x193   :  { %7879 = vmatprep.mubr.msk.f32.mxu0 %vm971_vm5, %v13390_v28  ;;  %v7825_v28 = vld [vmem:[%s13361_s0 + $0x168] sm:$0xff] }
 0x194   :  { %8774 = vmatmul.mubr.msk.f32.gmra.mrb[46].mxu1 %vm360_vm4, %v7825_v28  ;;  %v13399_v28 = vunpack.c.h.bf16 %v10826_v36 }
 0x195   :  { %8776 = vmatprep.mubr.msk.f32.mxu1 %vm10096_vm3, %v13486_v5 }
 0x196   :  { %1319 = vmatmul.mubr.f32.gmra.mrb[88].mxu0 %v13392_v44  ;;  %v13398_v44 = vunpack.c.l.bf16 %v10808_v40 }
 0x197   :  { %7880 = vmatprep.mubr.msk.f32.mxu0 %vm971_vm5, %v13393_v16  ;;  %v7826_v16 = vld [vmem:[%s13361_s0 + $0x170] sm:$0xff] }
 0x198   :  { %8777 = vmatmul.mubr.msk.f32.gmra.mrb[48].mxu1 %vm360_vm4, %v7826_v16  ;;  %v13402_v16 = vunpack.c.h.bf16 %v10844_v35 }
 0x199   :  { %8779 = vmatprep.mubr.msk.f32.mxu1 %vm10096_vm3, %v13486_v5 }
 0x19a   :  { %1324 = vmatmul.mubr.f32.gmra.mrb[90].mxu0 %v13395_v52  ;;  %v13401_v52 = vunpack.c.l.bf16 %v10826_v36 }
 0x19b   :  { %7881 = vmatprep.mubr.msk.f32.mxu0 %vm971_vm5, %v13396_v58  ;;  %v7827_v58 = vld [vmem:[%s13361_s0 + $0x178] sm:$0xff] }
 0x19c   :  { %8780 = vmatmul.mubr.msk.f32.gmra.mrb[50].mxu1 %vm360_vm4, %v7827_v58  ;;  %v13405_v58 = vunpack.c.h.bf16 %v10862_v29 }
 0x19d   :  { %8782 = vmatprep.mubr.msk.f32.mxu1 %vm10096_vm3, %v13486_v5 }
 0x19e   :  { %1329 = vmatmul.mubr.f32.gmra.mrb[92].mxu0 %v13398_v44  ;;  %v13404_v44 = vunpack.c.l.bf16 %v10844_v35 }
 0x19f   :  { %7882 = vmatprep.mubr.msk.f32.mxu0 %vm971_vm5, %v13399_v28  ;;  %v7828_v28 = vld [vmem:[%s13361_s0 + $0x180] sm:$0xff] }
 0x1a0   :  { %8783 = vmatmul.mubr.msk.f32.gmra.mrb[52].mxu1 %vm360_vm4, %v7828_v28  ;;  %v10894_v28 = vld [vmem:[%s13364_s3 + $0xe8] sm:$0xff] }
 0x1a1   :  { %8785 = vmatprep.mubr.msk.f32.mxu1 %vm10096_vm3, %v13486_v5  ;;  %13565 = vst [vmem:[#allocation9_spill] sm:$0xff] %v10894_v28 }
 0x1a2   :  { %1334 = vmatmul.mubr.f32.gmra.mrb[94].mxu0 %v13401_v52  ;;  %v13407_v52 = vunpack.c.l.bf16 %v10862_v29 }
 0x1a3   :  { %7883 = vmatprep.mubr.msk.f32.mxu0 %vm971_vm5, %v13402_v16  ;;  %v13408_v16 = vunpack.c.h.bf16 %v10880_v27 }
 0x1a6   :  { %1339 = vmatmul.mubr.f32.gmra.mrb[96].mxu0 %v13404_v44  ;;  %v7829_v44 = vld [vmem:[%s13361_s0 + $0x188] sm:$0xf] }
 0x1a7   :  { %7884 = vmatprep.mubr.msk.f32.mxu0 %vm971_vm5, %v13405_v58  ;;  %v13411_v58 = vunpack.c.h.bf16 %v10894_v28  ;;  %8786 = vmatmul.mubr.msk.f32.gmra.mrb[54].mxu1 %vm360_vm4, %v7829_v44  ;;  %v10924_v44 = vld [vmem:[%s13364_s3 + $0xf8] sm:$0xff] }
 0x1a8   :  { %8790 = vmatprep.mubr.msk.f32.mxu1 %vm10096_vm3, %v13486_v5  ;;  %13567 = vst [vmem:[#allocation11_spill] sm:$0xff] %v10924_v44  ;;  %v13419_v19 = vunpack.c.l.bf16 %v10924_v44 }
 0x1aa   :  { %1344 = vmatmul.mubr.f32.gmra.mrb[98].mxu0 %v13407_v52  ;;  %v13413_v52 = vunpack.c.l.bf16 %v10894_v28 }
 0x1ab   :  { %7885 = vmatprep.mubr.msk.f32.mxu0 %vm971_vm5, %v13408_v16  ;;  %v13414_v16 = vunpack.c.h.bf16 %v10910_v23 }
 0x1ae   :  { %1349 = vmatmul.mubr.f32.gmra.mrb[100].mxu0 %v13410_v25  ;;  %v13417_v25 = vunpack.c.h.bf16 %v10924_v44 }
 0x1af   :  { %7886 = vmatprep.mubr.msk.f32.mxu0 %vm971_vm5, %v13411_v58  ;;  %v10936_v58 = vld [vmem:[%s13364_s3 + $0x100] sm:$0xff] }
 0x1b0   :  { %13568 = vst [vmem:[#allocation12_spill] sm:$0xff] %v10936_v58  ;;  %v13422_v17 = vunpack.c.l.bf16 %v10936_v58 }
 0x1b2   :  { %1354 = vmatmul.mubr.f32.gmra.mrb[102].mxu0 %v13413_v52  ;;  %v13420_v52 = vunpack.c.h.bf16 %v10936_v58 }
 0x1b3   :  { %7887 = vmatprep.mubr.msk.f32.mxu0 %vm971_vm5, %v13414_v16  ;;  %v10948_v16 = vld [vmem:[%s13364_s3 + $0x108] sm:$0xff] }
 0x1b4   :  { %13569 = vst [vmem:[#allocation13_spill] sm:$0xff] %v10948_v16  ;;  %v13425_v15 = vunpack.c.l.bf16 %v10948_v16 }
 0x1b6   :  { %1359 = vmatmul.mubr.f32.gmra.mrb[104].mxu0 %v13416_v21  ;;  %v13423_v21 = vunpack.c.h.bf16 %v10948_v16 }
 0x1b7   :  { %7888 = vmatprep.mubr.msk.f32.mxu0 %vm971_vm5, %v13417_v25  ;;  %v10960_v25 = vld [vmem:[%s13364_s3 + $0x110] sm:$0xff] }
 0x1b8   :  { %13570 = vst [vmem:[#allocation14_spill] sm:$0xff] %v10960_v25  ;;  %v13428_v13 = vunpack.c.l.bf16 %v10960_v25 }
 0x1ba   :  { %1364 = vmatmul.mubr.f32.gmra.mrb[106].mxu0 %v13419_v19  ;;  %v13426_v19 = vunpack.c.h.bf16 %v10960_v25 }
 0x1bb   :  { %7889 = vmatprep.mubr.msk.f32.mxu0 %vm971_vm5, %v13420_v52  ;;  %v10972_v52 = vld [vmem:[%s13364_s3 + $0x118] sm:$0xff] }
 0x1bc   :  { %13571 = vst [vmem:[#allocation15_spill] sm:$0xff] %v10972_v52  ;;  %v13431_v11 = vunpack.c.l.bf16 %v10972_v52 }
 0x1be   :  { %1369 = vmatmul.mubr.f32.gmra.mrb[108].mxu0 %v13422_v17  ;;  %v13429_v17 = vunpack.c.h.bf16 %v10972_v52 }
 0x1bf   :  { %7890 = vmatprep.mubr.msk.f32.mxu0 %vm971_vm5, %v13423_v21  ;;  %v10984_v21 = vld [vmem:[%s13364_s3 + $0x120] sm:$0xff] }
 0x1c0   :  { %13572 = vst [vmem:[#allocation16_spill] sm:$0xff] %v10984_v21  ;;  %v13434_v9 = vunpack.c.l.bf16 %v10984_v21 }
 0x1c2   :  { %1374 = vmatmul.mubr.f32.gmra.mrb[110].mxu0 %v13425_v15  ;;  %v13432_v15 = vunpack.c.h.bf16 %v10984_v21 }
 0x1c3   :  { %7891 = vmatprep.mubr.msk.f32.mxu0 %vm971_vm5, %v13426_v19  ;;  %v10996_v19 = vld [vmem:[%s13364_s3 + $0x128] sm:$0xff] }
 0x1c4   :  { %13573 = vst [vmem:[#allocation17_spill] sm:$0xff] %v10996_v19  ;;  %v13437_v7 = vunpack.c.l.bf16 %v10996_v19 }
 0x1c6   :  { %1379 = vmatmul.mubr.f32.gmra.mrb[112].mxu0 %v13428_v13  ;;  %v13435_v13 = vunpack.c.h.bf16 %v10996_v19 }
 0x1c7   :  { %7892 = vmatprep.mubr.msk.f32.mxu0 %vm971_vm5, %v13429_v17  ;;  %v11008_v17 = vld [vmem:[%s13364_s3 + $0x130] sm:$0xff] }
 0x1c8   :  { %13574 = vst [vmem:[#allocation18_spill] sm:$0xff] %v11008_v17  ;;  %v13440_v4 = vunpack.c.l.bf16 %v11008_v17 }
 0x1ca   :  { %1384 = vmatmul.mubr.f32.gmra.mrb[114].mxu0 %v13431_v11  ;;  %v13438_v11 = vunpack.c.h.bf16 %v11008_v17 }
 0x1cb   :  { %7893 = vmatprep.mubr.msk.f32.mxu0 %vm971_vm5, %v13432_v15  ;;  %v11020_v15 = vld [vmem:[%s13364_s3 + $0x138] sm:$0xff] }
 0x1cc   :  { %13575 = vst [vmem:[#allocation19_spill] sm:$0xff] %v11020_v15  ;;  %v13443_v1 = vunpack.c.l.bf16 %v11020_v15 }
 0x1ce   :  { %1389 = vmatmul.mubr.f32.gmra.mrb[116].mxu0 %v13434_v9  ;;  %v13441_v9 = vunpack.c.h.bf16 %v11020_v15 }
 0x1cf   :  { %7894 = vmatprep.mubr.msk.f32.mxu0 %vm971_vm5, %v13435_v13  ;;  %v11032_v13 = vld [vmem:[%s13364_s3 + $0x140] sm:$0xff] }
 0x1d0   :  { %13576 = vst [vmem:[#allocation20_spill] sm:$0xff] %v11032_v13  ;;  %v13446_v63 = vunpack.c.l.bf16 %v11032_v13 }
 0x1d2   :  { %1394 = vmatmul.mubr.f32.gmra.mrb[118].mxu0 %v13437_v7  ;;  %v13444_v7 = vunpack.c.h.bf16 %v11032_v13 }
 0x1d3   :  { %7895 = vmatprep.mubr.msk.f32.mxu0 %vm971_vm5, %v13438_v11  ;;  %v11044_v11 = vld [vmem:[%s13364_s3 + $0x148] sm:$0xff] }
 0x1d4   :  { %13577 = vst [vmem:[#allocation21_spill] sm:$0xff] %v11044_v11  ;;  %v13449_v61 = vunpack.c.l.bf16 %v11044_v11 }
 0x1d6   :  { %1399 = vmatmul.mubr.f32.gmra.mrb[120].mxu0 %v13440_v4  ;;  %v13447_v4 = vunpack.c.h.bf16 %v11044_v11 }
 0x1d7   :  { %7896 = vmatprep.mubr.msk.f32.mxu0 %vm971_vm5, %v13441_v9  ;;  %v11056_v9 = vld [vmem:[%s13364_s3 + $0x150] sm:$0xff] }
 0x1d8   :  { %13578 = vst [vmem:[#allocation22_spill] sm:$0xff] %v11056_v9  ;;  %v13452_v59 = vunpack.c.l.bf16 %v11056_v9 }
 0x1da   :  { %1404 = vmatmul.mubr.f32.gmra.mrb[122].mxu0 %v13443_v1  ;;  %v13450_v1 = vunpack.c.h.bf16 %v11056_v9 }
 0x1db   :  { %7897 = vmatprep.mubr.msk.f32.mxu0 %vm971_vm5, %v13444_v7  ;;  %v11068_v7 = vld [vmem:[%s13364_s3 + $0x158] sm:$0xff] }
 0x1dc   :  { %13579 = vst [vmem:[#allocation23_spill] sm:$0xff] %v11068_v7  ;;  %v13455_v57 = vunpack.c.l.bf16 %v11068_v7 }
 0x1de   :  { %1409 = vmatmul.mubr.f32.gmra.mrb[124].mxu0 %v13446_v63  ;;  %v13453_v63 = vunpack.c.h.bf16 %v11068_v7 }
 0x1df   :  { %7898 = vmatprep.mubr.msk.f32.mxu0 %vm971_vm5, %v13447_v4  ;;  %v11080_v4 = vld [vmem:[%s13364_s3 + $0x160] sm:$0xff] }
 0x1e0   :  { %13580 = vst [vmem:[#allocation24_spill] sm:$0xff] %v11080_v4  ;;  %v13458_v53 = vunpack.c.l.bf16 %v11080_v4 }
 0x1e2   :  { %1414 = vmatmul.mubr.f32.gmra.mrb[126].mxu0 %v13449_v61  ;;  %v13456_v61 = vunpack.c.h.bf16 %v11080_v4 }
 0x1e3   :  { %7899 = vmatprep.mubr.msk.f32.mxu0 %vm971_vm5, %v13450_v1  ;;  %v11092_v1 = vld [vmem:[%s13364_s3 + $0x168] sm:$0xff] }
 0x1e4   :  { %13581 = vst [vmem:[#allocation25_spill] sm:$0xff] %v11092_v1  ;;  %v13461_v51 = vunpack.c.l.bf16 %v11092_v1 }
 0x1e6   :  { %1419 = vmatmul.mubr.f32.gmra.mrb[128].mxu0 %v13452_v59  ;;  %v13459_v59 = vunpack.c.h.bf16 %v11092_v1 }
 0x1e7   :  { %7900 = vmatprep.mubr.msk.f32.mxu0 %vm971_vm5, %v13453_v63  ;;  %v11104_v63 = vld [vmem:[%s13364_s3 + $0x170] sm:$0xff] }
 0x1e8   :  { %13582 = vst [vmem:[#allocation26_spill] sm:$0xff] %v11104_v63  ;;  %v13464_v49 = vunpack.c.l.bf16 %v11104_v63 }
 0x1ea   :  { %1424 = vmatmul.mubr.f32.gmra.mrb[130].mxu0 %v13455_v57  ;;  %v13462_v57 = vunpack.c.h.bf16 %v11104_v63 }
 0x1eb   :  { %7901 = vmatprep.mubr.msk.f32.mxu0 %vm971_vm5, %v13456_v61  ;;  %v11116_v61 = vld [vmem:[%s13364_s3 + $0x178] sm:$0xff] }
 0x1ec   :  { %13583 = vst [vmem:[#allocation27_spill] sm:$0xff] %v11116_v61  ;;  %v13467_v47 = vunpack.c.l.bf16 %v11116_v61 }
 0x1ee   :  { %1429 = vmatmul.mubr.f32.gmra.mrb[132].mxu0 %v13458_v53  ;;  %v13465_v53 = vunpack.c.h.bf16 %v11116_v61 }
 0x1ef   :  { %7902 = vmatprep.mubr.msk.f32.mxu0 %vm971_vm5, %v13459_v59  ;;  %v11128_v59 = vld [vmem:[%s13364_s3 + $0x180] sm:$0xff] }
 0x1f0   :  { %13584 = vst [vmem:[#allocation28_spill] sm:$0xff] %v11128_v59  ;;  %v13470_v45 = vunpack.c.l.bf16 %v11128_v59 }
 0x1f2   :  { %1434 = vmatmul.mubr.f32.gmra.mrb[134].mxu0 %v13461_v51  ;;  %v13468_v51 = vunpack.c.h.bf16 %v11128_v59 }
 0x1f3   :  { %7903 = vmatprep.mubr.msk.f32.mxu0 %vm971_vm5, %v13462_v57  ;;  %v11140_v57 = vld [vmem:[%s13364_s3 + $0x188] sm:$0xff] }
 0x1f4   :  { %13585 = vst [vmem:[#allocation29_spill] sm:$0xff] %v11140_v57  ;;  %v13473_v43 = vunpack.c.l.bf16 %v11140_v57 }
 0x1f6   :  { %1439 = vmatmul.mubr.f32.gmra.mrb[136].mxu0 %v13464_v49  ;;  %v13471_v49 = vunpack.c.h.bf16 %v11140_v57 }
 0x1f7   :  { %7904 = vmatprep.mubr.msk.f32.mxu0 %vm971_vm5, %v13465_v53  ;;  %v11152_v53 = vld [vmem:[%s13364_s3 + $0x190] sm:$0xff] }
 0x1f8   :  { %13586 = vst [vmem:[#allocation30_spill] sm:$0xff] %v11152_v53  ;;  %v13476_v41 = vunpack.c.l.bf16 %v11152_v53 }
 0x1fa   :  { %1444 = vmatmul.mubr.f32.gmra.mrb[138].mxu0 %v13467_v47  ;;  %v13474_v47 = vunpack.c.h.bf16 %v11152_v53 }
 0x1fb   :  { %7905 = vmatprep.mubr.msk.f32.mxu0 %vm971_vm5, %v13468_v51  ;;  %v11164_v51 = vld [vmem:[%s13364_s3 + $0x198] sm:$0xff] }
 0x1fc   :  { %13587 = vst [vmem:[#allocation31_spill] sm:$0xff] %v11164_v51  ;;  %v13479_v39 = vunpack.c.l.bf16 %v11164_v51 }
 0x1fe   :  { %1449 = vmatmul.mubr.f32.gmra.mrb[140].mxu0 %v13470_v45  ;;  %v13477_v45 = vunpack.c.h.bf16 %v11164_v51 }
 0x1ff   :  { %7906 = vmatprep.mubr.msk.f32.mxu0 %vm971_vm5, %v13471_v49  ;;  %v11176_v49 = vld [vmem:[%s13364_s3 + $0x1a0] sm:$0xff] }
 0x200   :  { %13588 = vst [vmem:[#allocation32_spill] sm:$0xff] %v11176_v49  ;;  %v13484_v38 = vunpack.c.l.bf16 %v11176_v49 }
 0x202   :  { %1454 = vmatmul.mubr.f32.gmra.mrb[142].mxu0 %v13473_v43  ;;  %v13480_v43 = vunpack.c.h.bf16 %v11176_v49 }
 0x203   :  { %7907 = vmatprep.mubr.msk.f32.mxu0 %vm971_vm5, %v13474_v47  ;;  %v11188_v47 = vld [vmem:[%s13364_s3 + $0x1a8] sm:$0xff] }
 0x204   :  { %13589 = vst [vmem:[#allocation33_spill] sm:$0xff] %v11188_v47  ;;  %v13492_v54 = vunpack.c.l.bf16 %v11188_v47 }
 0x206   :  { %1459 = vmatmul.mubr.f32.gmra.mrb[144].mxu0 %v13476_v41  ;;  %v13485_v41 = vunpack.c.h.bf16 %v11188_v47 }
 0x207   :  { %7908 = vmatprep.mubr.msk.f32.mxu0 %vm971_vm5, %v13477_v45  ;;  %v11200_v45 = vld [vmem:[%s13364_s3 + $0x1b0] sm:$0xff] }
 0x208   :  { %13590 = vst [vmem:[#allocation34_spill] sm:$0xff] %v11200_v45 }
 0x20a   :  { %1464 = vmatmul.mubr.f32.gmra.mrb[146].mxu0 %v13479_v39  ;;  %v13493_v39 = vunpack.c.h.bf16 %v11200_v45 }
 0x20b   :  { %7909 = vmatprep.mubr.msk.f32.mxu0 %vm971_vm5, %v13480_v43  ;;  %v11212_v43 = vld [vmem:[%s13364_s3 + $0x1b8] sm:$0x11] }
 0x20c   :  { %13591 = vst [vmem:[#allocation35_spill] sm:$0xff] %v11212_v43  ;;  %v13512_v51 = vunpack.c.l.bf16 %v11212_v43 }
 0x20e   :  { %1469 = vmatmul.mubr.f32.gmra.mrb[148].mxu0 %v13484_v38  ;;  %v13498_v38 = vunpack.c.l.bf16 %v11200_v45 }
 0x20f   :  { %7910 = vmatprep.mubr.msk.f32.mxu0 %vm971_vm5, %v13485_v41  ;;  %v13505_v41 = vunpack.c.h.bf16 %v11212_v43 }
 0x211   :  { %v11214_v32 = vpop.f32.mrb[44].mxu0 }
 0x212   :  { %v1212_v2 = vpop.f32.mrb[45].mxu0  ;;  %1474 = vmatmul.mubr.f32.gmra.mrb[150].mxu0 %v13492_v54 }
 0x213   :  { %7911 = vmatprep.mubr.msk.f32.mxu0 %vm971_vm5, %v13493_v39  ;;  %v13592_v39 = vmov 0.0  }
 0x215   :  { %v11223_v5 = vpop.f32.mrb[46].mxu0 }
 0x216   :  { %v1217_v49 = vpop.f32.mrb[47].mxu0  ;;  %1479 = vmatmul.mubr.f32.gmra.mrb[152].mxu0 %v13498_v38 }
 0x217   :  { %7912 = vmatprep.mubr.msk.f32.mxu0 %vm971_vm5, %v13505_v41  ;;  %v822_v49 = vpop.f32.mrb[6].mxu1 }
 0x218   :  { %v823_v38 = vadd.f32 %v10365_v33, %v822_v49  ;;  %v8715_v53 = vpop.f32.mrb[7].mxu1 }
 0x219   :  { %v11231_v2 = vpop.f32.mrb[48].mxu0  ;;  %v827_v57 = vpop.f32.mrb[8].mxu1 }
 0x21a   :  { %v1222_v54 = vpop.f32.mrb[49].mxu0  ;;  %1484 = vmatmul.mubr.f32.gmra.mrb[154].mxu0 %v13512_v51  ;;  %v946_v59 = vmax.f32 %v823_v38, 0.0  ;;  %v828_v41 = vadd.f32 %v10365_v33, %v827_v57  ;;  %v8718_v61 = vpop.f32.mrb[9].mxu1 }
 0x21b   :  { %8974 = vmatprep.mubr.msk.f32.mxu0 %vm10096_vm3, %v13592_v39  ;;  %v832_v4 = vpop.f32.mrb[10].mxu1 }
 0x21c   :  { %v947_v43 = vmax.f32 %v828_v41, 0.0  ;;  %v8721_v53 = vpop.f32.mrb[11].mxu1 }
 0x21d   :  { %v11237_v47 = vpop.f32.mrb[50].mxu0  ;;  %v837_v33 = vpop.f32.mrb[12].mxu1  ;;  %v53_v53 = vld [vmem:[%s13365_s4] sm:$0xff] }
 0x21e   :  { %v1227_v45 = vpop.f32.mrb[51].mxu0  ;;  %v11243_v51 = vpack.c.bf16 %v947_v43, %v946_v59  ;;  %v8724_v49 = vpop.f32.mrb[13].mxu1 }
 0x21f   :  { %v11250_v45 = vld [vmem:[%s13363_s2] ss:$0 sm:$0xff]  ;;  %v842_v9 = vpop.f32.mrb[14].mxu1 }
 0x220   :  { %v833_v38 = vadd.f32 %v11250_v45, %v832_v4  ;;  %v838_v61 = vadd.f32 %v11250_v45, %v837_v33  ;;  %v843_v4 = vadd.f32 %v11250_v45, %v842_v9 }
 0x221   :  { %v11241_v63 = vpop.f32.mrb[52].mxu0 }
 0x222   :  { %v1232_v54 = vpop.f32.mrb[53].mxu0  ;;  %v948_v57 = vmax.f32 %v833_v38, 0.0  ;;  %v949_v59 = vmax.f32 %v838_v61, 0.0  ;;  %v8727_v38 = vpop.f32.mrb[15].mxu1 }
 0x223   :  { %v847_v33 = vpop.f32.mrb[16].mxu1 }
 0x224   :  { %v11256_v54 = vpack.c.bf16 %v949_v59, %v948_v57  ;;  %v950_v57 = vmax.f32 %v843_v4, 0.0  ;;  %v848_v49 = vadd.f32 %v11250_v45, %v847_v33 }
 0x225   :  { %v11245_v1 = vpop.f32.mrb[54].mxu0 }
 0x226   :  { %v1237_v7 = vpop.f32.mrb[55].mxu0  ;;  %v951_v9 = vmax.f32 %v848_v49, 0.0 }
 0x228   :  { %v11270_v17 = vpack.c.bf16 %v951_v9, %v950_v57 }
 0x229   :  { %v11254_v41 = vpop.f32.mrb[56].mxu0 }
 0x22a   :  { %v1242_v43 = vpop.f32.mrb[57].mxu0  ;;  %v1497_v11 = vrot.slane %v11254_v41, 1 }
 0x22b   :  { %v8730_v43 = vpop.f32.mrb[17].mxu1 }
 0x22c   :  { %v852_v4 = vpop.f32.mrb[18].mxu1 }
 0x22d   :  { %v1245_v7 = vpop.f32.mrb[58].mxu0 }
 0x22e   :  { %v1498_v13 = vrot.slane %v1245_v7, 1  ;;  %v1247_v15 = vpop.f32.mrb[59].mxu0 }
 0x230   :  { %v1499_v61 = vsel %vm1496_vm7, %v1497_v11, %v1498_v13 }
 0x231   :  { %v1250_v59 = vpop.f32.mrb[60].mxu0  ;;  %8791 = vmatmul.mubr.msk.f32.vlgmr.msra.gmra.mrb[56].mxu1 %vm1510_vm8, %v1499_v61  ;;  %v853_v61 = vadd.f32 %v11250_v45, %v852_v4 }
 0x232   :  { %v1500_v7 = vrot.slane %v1250_v59, 1  ;;  %v1252_v15 = vpop.f32.mrb[61].mxu0  ;;  %8793 = vmatprep.mubr.msk.f32.mxu1 %vm10096_vm3, %v13592_v39  ;;  %8812 = vmatpush3.msra.mxu1 %v53_v53  ;;  %v8733_v59 = vpop.f32.mrb[19].mxu1 }
 0x233   :  { %8834 = vmatprep.subr.mxu1 %v13592_v39  ;;  %v857_v53 = vpop.f32.mrb[20].mxu1  ;;  %v952_v15 = vmax.f32 %v853_v61, 0.0 }
 0x234   :  { %v1501_v38 = vsel %vm1496_vm7, %v1498_v13, %v1500_v7  ;;  %v858_v13 = vadd.f32 %v11250_v45, %v857_v53  ;;  %v8736_v57 = vpop.f32.mrb[21].mxu1 }
 0x235   :  { %v1255_v11 = vpop.f32.mrb[62].mxu0  ;;  %8794 = vmatmul.mubr.msk.f32.gmra.mrb[58].mxu1 %vm1510_vm8, %v1501_v38 }
 0x236   :  { %v1502_v33 = vrot.slane %v1255_v11, 1  ;;  %v1257_v43 = vpop.f32.mrb[63].mxu0  ;;  %8796 = vmatprep.mubr.msk.f32.mxu1 %vm10096_vm3, %v13592_v39  ;;  %v953_v11 = vmax.f32 %v858_v13, 0.0 }
 0x238   :  { %v1503_v49 = vsel %vm1496_vm7, %v1500_v7, %v1502_v33  ;;  %v11282_v4 = vpack.c.bf16 %v953_v11, %v952_v15  ;;  %v862_v7 = vpop.f32.mrb[22].mxu1 }
 0x239   :  { %v1260_v9 = vpop.f32.mrb[64].mxu0  ;;  %8797 = vmatmul.mubr.msk.f32.gmra.mrb[60].mxu1 %vm1510_vm8, %v1503_v49  ;;  %v863_v49 = vadd.f32 %v11250_v45, %v862_v7 }
 0x23a   :  { %v1504_v38 = vrot.slane %v1260_v9, 1  ;;  %v1262_v19 = vpop.f32.mrb[65].mxu0  ;;  %8799 = vmatprep.mubr.msk.f32.mxu1 %vm10096_vm3, %v13592_v39 }
 0x23b   :  { %v8739_v19 = vpop.f32.mrb[23].mxu1  ;;  %v954_v13 = vmax.f32 %v863_v49, 0.0 }
 0x23c   :  { %v1505_v43 = vsel %vm1496_vm7, %v1502_v33, %v1504_v38  ;;  %v867_v57 = vpop.f32.mrb[24].mxu1 }
 0x23d   :  { %v1265_v59 = vpop.f32.mrb[66].mxu0  ;;  %8800 = vmatmul.mubr.msk.f32.gmra.mrb[62].mxu1 %vm1510_vm8, %v1505_v43  ;;  %v868_v33 = vadd.f32 %v11250_v45, %v867_v57  ;;  %v8742_v15 = vpop.f32.mrb[25].mxu1 }
 0x23e   :  { %v1506_v61 = vrot.slane %v1265_v59, 1  ;;  %v1267_v53 = vpop.f32.mrb[67].mxu0  ;;  %8802 = vmatprep.mubr.msk.f32.mxu1 %vm10096_vm3, %v13592_v39 }
 0x23f   :  { %v955_v59 = vmax.f32 %v868_v33, 0.0 }
 0x240   :  { %v1507_v9 = vsel %vm1496_vm7, %v1504_v38, %v1506_v61  ;;  %v872_v38 = vpop.f32.mrb[26].mxu1 }
 0x241   :  { %v1270_v11 = vpop.f32.mrb[68].mxu0  ;;  %8803 = vmatmul.mubr.msk.f32.gmra.mrb[64].mxu1 %vm1510_vm8, %v1507_v9  ;;  %v11294_v7 = vpack.c.bf16 %v955_v59, %v954_v13  ;;  %v8745_v15 = vpop.f32.mrb[27].mxu1 }
 0x242   :  { %v1508_v43 = vrot.slane %v1270_v11, 1  ;;  %v1272_v21 = vpop.f32.mrb[69].mxu0  ;;  %8805 = vmatprep.mubr.msk.f32.mxu1 %vm10096_vm3, %v13592_v39  ;;  %v1752_v49 = vrot.slane %v1270_v11, 2  ;;  %v877_v52 = vpop.f32.mrb[28].mxu1 }
 0x243   :  { %v873_v21 = vadd.f32 %v11250_v45, %v872_v38  ;;  %v878_v13 = vadd.f32 %v11250_v45, %v877_v52  ;;  %v8748_v59 = vpop.f32.mrb[29].mxu1  ;;  %v55_v38 = vld [vmem:[%s13365_s4 + $0x10] sm:$0xff] }
 0x244   :  { %v1509_v53 = vsel %vm1496_vm7, %v1506_v61, %v1508_v43 }
 0x245   :  { %v1275_v19 = vpop.f32.mrb[70].mxu0  ;;  %8806 = vmatmul.mubr.msk.f32.gmra.mrb[66].mxu1 %vm1510_vm8, %v1509_v53  ;;  %v956_v61 = vmax.f32 %v873_v21, 0.0 }
 0x246   :  { %v1753_v57 = vrot.slane %v1275_v19, 2  ;;  %8808 = vmatprep.mubr.msk.f32.mxu1 %vm10096_vm3, %v13592_v39  ;;  %v1277_v9 = vpop.f32.mrb[71].mxu0 }
 0x247   :  { %v957_v9 = vmax.f32 %v878_v13, 0.0 }
 0x248   :  { %v11301_v33 = vsel %vm1751_vm9, %v1752_v49, %v1753_v57 }
 0x249   :  { %8809 = vmatmul.mubr.msk.f32.gmra.mrb[68].mxu1 %vm1510_vm8, %v1508_v43  ;;  %v1280_v53 = vpop.f32.mrb[72].mxu0  ;;  %v11313_v21 = vpack.c.bf16 %v957_v9, %v956_v61  ;;  %v882_v43 = vpop.f32.mrb[30].mxu1 }
 0x24a   :  { %8813 = vmatprep.mubr.msk.f32.mxu1 %vm10096_vm3, %v13592_v39  ;;  %v1755_v11 = vrot.slane %v1280_v53, 2  ;;  %v1282_v19 = vpop.f32.mrb[73].mxu0  ;;  %v883_v59 = vadd.f32 %v11250_v45, %v882_v43  ;;  %v8751_v53 = vpop.f32.mrb[31].mxu1 }
 0x24c   :  { %v11311_v49 = vsel %vm1751_vm9, %v1753_v57, %v1755_v11  ;;  %v887_v57 = vpop.f32.mrb[32].mxu1  ;;  %v958_v19 = vmax.f32 %v883_v59, 0.0 }
 0x24d   :  { %8814 = vmatmul.mubr.msk.f32.vlgmr.msra.gmra.mrb[70].mxu1 %vm1510_vm8, %v11214_v32  ;;  %v1285_v52 = vpop.f32.mrb[74].mxu0  ;;  %v888_v32 = vadd.f32 %v11250_v45, %v887_v57  ;;  %v8754_v9 = vpop.f32.mrb[33].mxu1 }
 0x24e   :  { %8816 = vmatprep.mubr.msk.f32.mxu1 %vm10096_vm3, %v13592_v39  ;;  %8835 = vmatpush3.msra.mxu1 %v55_v38  ;;  %v1757_v15 = vrot.slane %v1285_v52, 2  ;;  %v1287_v13 = vpop.f32.mrb[75].mxu0  ;;  %v892_v59 = vpop.f32.mrb[34].mxu1 }
 0x24f   :  { %8857 = vmatprep.subr.mxu1 %v13592_v39  ;;  %v959_v43 = vmax.f32 %v888_v32, 0.0  ;;  %v893_v9 = vadd.f32 %v11250_v45, %v892_v59 }
 0x250   :  { %v11322_v61 = vsel %vm1751_vm9, %v1755_v11, %v1757_v15 }
 0x251   :  { %8817 = vmatmul.mubr.msk.f32.gmra.mrb[72].mxu1 %vm1510_vm8, %v11223_v5  ;;  %v1290_v25 = vpop.f32.mrb[76].mxu0  ;;  %v11332_v53 = vpack.c.bf16 %v959_v43, %v958_v19 }
 0x252   :  { %8819 = vmatprep.mubr.msk.f32.mxu1 %vm10096_vm3, %v13592_v39  ;;  %v1759_v38 = vrot.slane %v1290_v25, 2  ;;  %v1292_v52 = vpop.f32.mrb[77].mxu0  ;;  %v8757_v25 = vpop.f32.mrb[35].mxu1 }
 0x253   :  { %v897_v52 = vpop.f32.mrb[36].mxu1 }
 0x254   :  { %v11330_v13 = vsel %vm1751_vm9, %v1757_v15, %v1759_v38  ;;  %v960_v15 = vmax.f32 %v893_v9, 0.0  ;;  %v898_v19 = vadd.f32 %v11250_v45, %v897_v52  ;;  %v8760_v43 = vpop.f32.mrb[37].mxu1 }
 0x255   :  { %8820 = vmatmul.mubr.msk.f32.gmra.mrb[74].mxu1 %vm1510_vm8, %v11231_v2  ;;  %v1295_v11 = vpop.f32.mrb[78].mxu0  ;;  %v902_v52 = vpop.f32.mrb[38].mxu1 }
 0x256   :  { %8822 = vmatprep.mubr.msk.f32.mxu1 %vm10096_vm3, %v13592_v39  ;;  %v1761_v5 = vrot.slane %v1295_v11, 2  ;;  %v1297_v57 = vpop.f32.mrb[79].mxu0  ;;  %v903_v16 = vadd.f32 %v11250_v45, %v902_v52 }
 0x257   :  { %v961_v57 = vmax.f32 %v898_v19, 0.0 }
 0x258   :  { %v11340_v32 = vsel %vm1751_vm9, %v1759_v38, %v1761_v5 }
 0x259   :  { %8823 = vmatmul.mubr.msk.f32.gmra.mrb[76].mxu1 %vm1510_vm8, %v11237_v47  ;;  %v11345_v2 = vpop.f32.mrb[80].mxu0  ;;  %v11356_v9 = vpack.c.bf16 %v961_v57, %v960_v15  ;;  %v962_v57 = vmax.f32 %v903_v16, 0.0 }
 0x25a   :  { %8825 = vmatprep.mubr.msk.f32.mxu1 %vm10096_vm3, %v13592_v39  ;;  %v13541_v11 = vrot.slane %v11345_v2, 2  ;;  %v1302_v59 = vpop.f32.mrb[81].mxu0  ;;  %v1893_v25 = vrot.slane %v11345_v2, 3 }
 0x25b   :  { %v8763_v59 = vpop.f32.mrb[39].mxu1 }
 0x25c   :  { %v11354_v38 = vsel %vm1751_vm9, %v1761_v5, %v13541_v11  ;;  %v907_v58 = vpop.f32.mrb[40].mxu1 }
 0x25d   :  { %8826 = vmatmul.mubr.msk.f32.gmra.mrb[78].mxu1 %vm1510_vm8, %v11241_v63  ;;  %v1305_v47 = vpop.f32.mrb[82].mxu0  ;;  %v908_v15 = vadd.f32 %v11250_v45, %v907_v58  ;;  %v8766_v11 = vpop.f32.mrb[41].mxu1 }
 0x25e   :  { %8828 = vmatprep.mubr.msk.f32.mxu1 %vm10096_vm3, %v13592_v39  ;;  %v1894_v43 = vrot.slane %v1305_v47, 3  ;;  %v1307_v19 = vpop.f32.mrb[83].mxu0  ;;  %v912_v58 = vpop.f32.mrb[42].mxu1 }
 0x25f   :  { %v963_v59 = vmax.f32 %v908_v15, 0.0 }
 0x260   :  { %v11364_v5 = vsel %vm1892_vm10, %v1893_v25, %v1894_v43  ;;  %v913_v25 = vadd.f32 %v11250_v45, %v912_v58 }
 0x261   :  { %8829 = vmatmul.mubr.msk.f32.gmra.mrb[80].mxu1 %vm1510_vm8, %v11245_v1  ;;  %v1310_v63 = vpop.f32.mrb[84].mxu0  ;;  %v11374_v44 = vpack.c.bf16 %v963_v59, %v962_v57 }
 0x262   :  { %8831 = vmatprep.mubr.msk.f32.mxu1 %vm10096_vm3, %v13592_v39  ;;  %v1896_v47 = vrot.slane %v1310_v63, 3  ;;  %v1312_v19 = vpop.f32.mrb[85].mxu0  ;;  %v8769_v63 = vpop.f32.mrb[43].mxu1 }
 0x263   :  { %v917_v15 = vpop.f32.mrb[44].mxu1  ;;  %v964_v19 = vmax.f32 %v913_v25, 0.0 }
 0x264   :  { %v11372_v52 = vsel %vm1892_vm10, %v1894_v43, %v1896_v47  ;;  %v56_v43 = vld [vmem:[%s13365_s4 + $0x18] sm:$0xff]  ;;  %v8772_v59 = vpop.f32.mrb[45].mxu1 }
 0x265   :  { %8832 = vmatmul.mubr.msk.f32.gmra.mrb[82].mxu1 %vm1510_vm8, %v11254_v41  ;;  %v1315_v16 = vpop.f32.mrb[86].mxu0  ;;  %v918_v41 = vadd.f32 %v11250_v45, %v917_v15 }
 0x266   :  { %8836 = vmatprep.mubr.msk.f32.mxu1 %vm10096_vm3, %v13592_v39  ;;  %v1898_v1 = vrot.slane %v1315_v16, 3  ;;  %v1317_v11 = vpop.f32.mrb[87].mxu0 }
 0x267   :  { %v965_v63 = vmax.f32 %v918_v41, 0.0 }
 0x268   :  { %v11385_v57 = vsel %vm1892_vm10, %v1896_v47, %v1898_v1 }
 0x269   :  { %8837 = vmatmul.mubr.msk.f32.vlgmr.msra.gmra.mrb[84].mxu1 %vm1510_vm8, %v11301_v33  ;;  %v1320_v16 = vpop.f32.mrb[88].mxu0  ;;  %v11396_v25 = vpack.c.bf16 %v965_v63, %v964_v19  ;;  %v922_v33 = vpop.f32.mrb[46].mxu1 }
 0x26a   :  { %8839 = vmatprep.mubr.msk.f32.mxu1 %vm10096_vm3, %v13592_v39  ;;  %8858 = vmatpush3.msra.mxu1 %v56_v43  ;;  %v1900_v58 = vrot.slane %v1320_v16, 3  ;;  %v1322_v11 = vpop.f32.mrb[89].mxu0  ;;  %v923_v16 = vadd.f32 %v11250_v45, %v922_v33  ;;  %v8775_v41 = vpop.f32.mrb[47].mxu1 }
 0x26b   :  { %8880 = vmatprep.subr.mxu1 %v13592_v39  ;;  %v927_v11 = vpop.f32.mrb[48].mxu1 }
 0x26c   :  { %v11394_v47 = vsel %vm1892_vm10, %v1898_v1, %v1900_v58  ;;  %v8778_v1 = vpop.f32.mrb[49].mxu1  ;;  %v928_v33 = vadd.f32 %v11250_v45, %v927_v11  ;;  %v11427_v11 = vld [vmem:[%s13365_s4 + $0x40] sm:$0xff] }
 0x26d   :  { %8840 = vmatmul.mubr.msk.f32.gmra.mrb[86].mxu1 %vm1510_vm8, %v11311_v49  ;;  %v1325_v15 = vpop.f32.mrb[90].mxu0  ;;  %8973 = vmatpush3.msra.mxu0 %v11427_v11 }
 0x26e   :  { %8842 = vmatprep.mubr.msk.f32.mxu1 %vm10096_vm3, %v13592_v39  ;;  %v1902_v59 = vrot.slane %v1325_v15, 3  ;;  %v1327_v43 = vpop.f32.mrb[91].mxu0  ;;  %v966_v15 = vmax.f32 %v923_v16, 0.0  ;;  %v967_v41 = vmax.f32 %v928_v33, 0.0  ;;  %8995 = vmatprep.subr.mxu0 %v13592_v39 }
 0x26f   :  { %v932_v16 = vpop.f32.mrb[50].mxu1 }
 0x270   :  { %v11404_v23 = vsel %vm1892_vm10, %v1900_v58, %v1902_v59  ;;  %v11429_v28 = vpack.c.bf16 %v967_v41, %v966_v15  ;;  %v8781_v33 = vpop.f32.mrb[51].mxu1 }
 0x271   :  { %8843 = vmatmul.mubr.msk.f32.gmra.mrb[88].mxu1 %vm1510_vm8, %v11322_v61  ;;  %v11408_v19 = vpop.f32.mrb[92].mxu0 }
 0x272   :  { %8845 = vmatprep.mubr.msk.f32.mxu1 %vm10096_vm3, %v13592_v39  ;;  %v13548_v49 = vrot.slane %v11408_v19, 3  ;;  %v1332_v63 = vpop.f32.mrb[93].mxu0  ;;  %v2033_v43 = vrot.slane %v11408_v19, 4 }
 0x274   :  { %v11418_v58 = vsel %vm1892_vm10, %v1902_v59, %v13548_v49  ;;  %v933_v59 = vadd.f32 %v11250_v45, %v932_v16  ;;  %v937_v49 = vpop.f32.mrb[52].mxu1 }
 0x275   :  { %8846 = vmatmul.mubr.msk.f32.gmra.mrb[90].mxu1 %vm1510_vm8, %v11330_v13  ;;  %v1335_v61 = vpop.f32.mrb[94].mxu0  ;;  %v938_v27 = vadd.f32 %v11250_v45, %v937_v49  ;;  %v8784_v15 = vpop.f32.mrb[53].mxu1 }
 0x276   :  { %8848 = vmatprep.mubr.msk.f32.mxu1 %vm10096_vm3, %v13592_v39  ;;  %v2034_v1 = vrot.slane %v1335_v61, 4  ;;  %v1337_v63 = vpop.f32.mrb[95].mxu0 }
 0x277   :  { %v968_v63 = vmax.f32 %v933_v59, 0.0  ;;  %v969_v33 = vmax.f32 %v938_v27, 0.0  ;;  %v13593_v27 = vrot.slane %v11345_v2, 2 }
 0x278   :  { %v11434_v13 = vsel %vm1140_vm6, %v2033_v43, %v2034_v1 }
 0x279   :  { %8849 = vmatmul.mubr.msk.f32.gmra.mrb[92].mxu1 %vm1510_vm8, %v11340_v32  ;;  %v1340_v61 = vpop.f32.mrb[96].mxu0  ;;  %v11447_v35 = vpack.c.bf16 %v969_v33, %v968_v63 }
 0x27a   :  { %8851 = vmatprep.mubr.msk.f32.mxu1 %vm10096_vm3, %v13592_v39  ;;  %v2036_v41 = vrot.slane %v1340_v61, 4  ;;  %v1342_v16 = vpop.f32.mrb[97].mxu0  ;;  %v11451_v59 = vpop.f32.mrb[54].mxu1 }
 0x27b   :  { %v8787_v15 = vpop.f32.mrb[55].mxu1 }
 0x27c   :  { %v11443_v43 = vsel %vm1140_vm6, %v2034_v1, %v2036_v41 }
 0x27d   :  { %8852 = vmatmul.mubr.msk.f32.gmra.mrb[94].mxu1 %vm1510_vm8, %v11354_v38  ;;  %v1345_v29 = vpop.f32.mrb[98].mxu0 }
 0x27e   :  { %8854 = vmatprep.mubr.msk.f32.mxu1 %vm10096_vm3, %v13592_v39  ;;  %v2038_v32 = vrot.slane %v1345_v29, 4  ;;  %v1347_v49 = vpop.f32.mrb[99].mxu0  ;;  %v57_v29 = vld [vmem:[%s13365_s4 + $0x20] sm:$0xff] }
 0x280   :  { %v11454_v61 = vsel %vm1140_vm6, %v2036_v41, %v2038_v32 }
 0x281   :  { %8855 = vmatmul.mubr.msk.f32.gmra.mrb[96].mxu1 %vm1510_vm8, %v13593_v27  ;;  %v1350_v1 = vpop.f32.mrb[100].mxu0 }
 0x282   :  { %8859 = vmatprep.mubr.msk.f32.mxu1 %vm10096_vm3, %v13592_v39  ;;  %v2040_v38 = vrot.slane %v1350_v1, 4  ;;  %v1352_v63 = vpop.f32.mrb[101].mxu0 }
 0x284   :  { %v11465_v16 = vsel %vm1140_vm6, %v2038_v32, %v2040_v38 }
 0x285   :  { %8860 = vmatmul.mubr.msk.f32.vlgmr.msra.gmra.mrb[98].mxu1 %vm1510_vm8, %v11364_v5  ;;  %v1355_v41 = vpop.f32.mrb[102].mxu0 }
 0x286   :  { %8862 = vmatprep.mubr.msk.f32.mxu1 %vm10096_vm3, %v13592_v39  ;;  %8881 = vmatpush3.msra.mxu1 %v57_v29  ;;  %v2042_v2 = vrot.slane %v1355_v41, 4  ;;  %v1357_v33 = vpop.f32.mrb[103].mxu0 }
 0x287   :  { %8903 = vmatprep.subr.mxu1 %v13592_v39 }
 0x288   :  { %v11473_v49 = vsel %vm1140_vm6, %v2040_v38, %v2042_v2 }
 0x289   :  { %8863 = vmatmul.mubr.msk.f32.gmra.mrb[100].mxu1 %vm1510_vm8, %v11372_v52  ;;  %v11477_v32 = vpop.f32.mrb[104].mxu0 }
 0x28a   :  { %8865 = vmatprep.mubr.msk.f32.mxu1 %vm10096_vm3, %v13592_v39  ;;  %v2044_v5 = vrot.slane %v11477_v32, 4  ;;  %v1362_v15 = vpop.f32.mrb[105].mxu0  ;;  %v2174_v27 = vrot.slane %v11477_v32, 5 }
 0x28c   :  { %v11486_v1 = vsel %vm1140_vm6, %v2042_v2, %v2044_v5 }
 0x28d   :  { %8866 = vmatmul.mubr.msk.f32.gmra.mrb[102].mxu1 %vm1510_vm8, %v11385_v57  ;;  %v1365_v38 = vpop.f32.mrb[106].mxu0 }
 0x28e   :  { %8868 = vmatprep.mubr.msk.f32.mxu1 %vm10096_vm3, %v13592_v39  ;;  %v2175_v52 = vrot.slane %v1365_v38, 5  ;;  %v1367_v63 = vpop.f32.mrb[107].mxu0 }
 0x290   :  { %v11493_v29 = vsel %vm2173_vm11, %v2174_v27, %v2175_v52 }
 0x291   :  { %8869 = vmatmul.mubr.msk.f32.gmra.mrb[104].mxu1 %vm1510_vm8, %v11394_v47  ;;  %v1370_v41 = vpop.f32.mrb[108].mxu0 }
 0x292   :  { %8871 = vmatprep.mubr.msk.f32.mxu1 %vm10096_vm3, %v13592_v39  ;;  %v2177_v2 = vrot.slane %v1370_v41, 5  ;;  %v1372_v33 = vpop.f32.mrb[109].mxu0 }
 0x293   :  { %v13594_v33 = vrot.slane %v11408_v19, 3 }
 0x294   :  { %v11500_v57 = vsel %vm2173_vm11, %v2175_v52, %v2177_v2 }
 0x295   :  { %8872 = vmatmul.mubr.msk.f32.gmra.mrb[106].mxu1 %vm1510_vm8, %v11404_v23  ;;  %v1375_v15 = vpop.f32.mrb[110].mxu0 }
 0x296   :  { %8874 = vmatprep.mubr.msk.f32.mxu1 %vm10096_vm3, %v13592_v39  ;;  %v2179_v27 = vrot.slane %v1375_v15, 5  ;;  %v1377_v38 = vpop.f32.mrb[111].mxu0 }
 0x298   :  { %v11507_v47 = vsel %vm2173_vm11, %v2177_v2, %v2179_v27 }
 0x299   :  { %8875 = vmatmul.mubr.msk.f32.gmra.mrb[108].mxu1 %vm1510_vm8, %v11418_v58  ;;  %v1380_v63 = vpop.f32.mrb[112].mxu0  ;;  %v58_v58 = vld [vmem:[%s13365_s4 + $0x28] sm:$0xff] }
 0x29a   :  { %8877 = vmatprep.mubr.msk.f32.mxu1 %vm10096_vm3, %v13592_v39  ;;  %v2181_v52 = vrot.slane %v1380_v63, 5  ;;  %v1382_v41 = vpop.f32.mrb[113].mxu0 }
 0x29c   :  { %v11514_v23 = vsel %vm2173_vm11, %v2179_v27, %v2181_v52 }
 0x29d   :  { %8878 = vmatmul.mubr.msk.f32.gmra.mrb[110].mxu1 %vm1510_vm8, %v13594_v33  ;;  %v1385_v15 = vpop.f32.mrb[114].mxu0 }
 0x29e   :  { %8882 = vmatprep.mubr.msk.f32.mxu1 %vm10096_vm3, %v13592_v39  ;;  %v2183_v2 = vrot.slane %v1385_v15, 5  ;;  %v1387_v38 = vpop.f32.mrb[115].mxu0 }
 0x2a0   :  { %v11525_v63 = vsel %vm2173_vm11, %v2181_v52, %v2183_v2 }
 0x2a1   :  { %8883 = vmatmul.mubr.msk.f32.vlgmr.msra.gmra.mrb[112].mxu1 %vm1510_vm8, %v11434_v13  ;;  %v11529_v27 = vpop.f32.mrb[116].mxu0 }
 0x2a2   :  { %8885 = vmatprep.mubr.msk.f32.mxu1 %vm10096_vm3, %v13592_v39  ;;  %8904 = vmatpush3.msra.mxu1 %v58_v58  ;;  %v13555_v19 = vrot.slane %v11529_v27, 5  ;;  %v1392_v41 = vpop.f32.mrb[117].mxu0  ;;  %v2315_v33 = vrot.slane %v11529_v27, 6 }
 0x2a3   :  { %8926 = vmatprep.subr.mxu1 %v13592_v39 }
 0x2a4   :  { %v11539_v52 = vsel %vm2173_vm11, %v2183_v2, %v13555_v19 }
 0x2a5   :  { %8886 = vmatmul.mubr.msk.f32.gmra.mrb[114].mxu1 %vm1510_vm8, %v11443_v43  ;;  %v1395_v13 = vpop.f32.mrb[118].mxu0 }
 0x2a6   :  { %8888 = vmatprep.mubr.msk.f32.mxu1 %vm10096_vm3, %v13592_v39  ;;  %v2316_v15 = vrot.slane %v1395_v13, 6  ;;  %v1397_v38 = vpop.f32.mrb[119].mxu0 }
 0x2a8   :  { %v11546_v58 = vsel %vm2314_vm12, %v2315_v33, %v2316_v15 }
 0x2a9   :  { %8889 = vmatmul.mubr.msk.f32.gmra.mrb[116].mxu1 %vm1510_vm8, %v11454_v61  ;;  %v1400_v41 = vpop.f32.mrb[120].mxu0 }
 0x2aa   :  { %8891 = vmatprep.mubr.msk.f32.mxu1 %vm10096_vm3, %v13592_v39  ;;  %v2318_v2 = vrot.slane %v1400_v41, 6  ;;  %v1402_v19 = vpop.f32.mrb[121].mxu0 }
 0x2ac   :  { %v11553_v43 = vsel %vm2314_vm12, %v2316_v15, %v2318_v2 }
 0x2ad   :  { %8892 = vmatmul.mubr.msk.f32.gmra.mrb[118].mxu1 %vm1510_vm8, %v11465_v16  ;;  %v1405_v13 = vpop.f32.mrb[122].mxu0 }
 0x2ae   :  { %8894 = vmatprep.mubr.msk.f32.mxu1 %vm10096_vm3, %v13592_v39  ;;  %v2320_v33 = vrot.slane %v1405_v13, 6  ;;  %v1407_v38 = vpop.f32.mrb[123].mxu0 }
 0x2b0   :  { %v11560_v61 = vsel %vm2314_vm12, %v2318_v2, %v2320_v33 }
 0x2b1   :  { %8895 = vmatmul.mubr.msk.f32.gmra.mrb[120].mxu1 %vm1510_vm8, %v11473_v49  ;;  %v1410_v41 = vpop.f32.mrb[124].mxu0 }
 0x2b2   :  { %8897 = vmatprep.mubr.msk.f32.mxu1 %vm10096_vm3, %v13592_v39  ;;  %v2322_v19 = vrot.slane %v1410_v41, 6  ;;  %v1412_v15 = vpop.f32.mrb[125].mxu0 }
 0x2b3   :  { %v59_v15 = vld [vmem:[%s13365_s4 + $0x30] sm:$0xff] }
 0x2b4   :  { %v11567_v16 = vsel %vm2314_vm12, %v2320_v33, %v2322_v19 }
 0x2b5   :  { %8898 = vmatmul.mubr.msk.f32.gmra.mrb[122].mxu1 %vm1510_vm8, %v11486_v1  ;;  %v1415_v13 = vpop.f32.mrb[126].mxu0 }
 0x2b6   :  { %8900 = vmatprep.mubr.msk.f32.mxu1 %vm10096_vm3, %v13592_v39  ;;  %v2324_v2 = vrot.slane %v1415_v13, 6  ;;  %v1417_v38 = vpop.f32.mrb[127].mxu0 }
 0x2b8   :  { %v11574_v49 = vsel %vm2314_vm12, %v2322_v19, %v2324_v2 }
 0x2b9   :  { %8901 = vmatmul.mubr.msk.f32.gmra.mrb[124].mxu1 %vm1510_vm8, %v2044_v5  ;;  %v11579_v41 = vpop.f32.mrb[128].mxu0 }
 0x2ba   :  { %8905 = vmatprep.mubr.msk.f32.mxu1 %vm10096_vm3, %v13592_v39  ;;  %v13556_v1 = vrot.slane %v11579_v41, 6  ;;  %v1422_v33 = vpop.f32.mrb[129].mxu0  ;;  %v2455_v13 = vrot.slane %v11579_v41, 7 }
 0x2bc   :  { %v11591_v32 = vsel %vm2314_vm12, %v2324_v2, %v13556_v1 }
 0x2bd   :  { %8906 = vmatmul.mubr.msk.f32.vlgmr.msra.gmra.mrb[126].mxu1 %vm1510_vm8, %v11493_v29  ;;  %v1425_v5 = vpop.f32.mrb[130].mxu0 }
 0x2be   :  { %8908 = vmatprep.mubr.msk.f32.mxu1 %vm10096_vm3, %v13592_v39  ;;  %8927 = vmatpush3.msra.mxu1 %v59_v15  ;;  %v2456_v19 = vrot.slane %v1425_v5, 7  ;;  %v1427_v38 = vpop.f32.mrb[131].mxu0 }
 0x2bf   :  { %8949 = vmatprep.subr.mxu1 %v13592_v39 }
 0x2c0   :  { %v11599_v33 = vsel %vm436_vm0, %v2455_v13, %v2456_v19 }
 0x2c1   :  { %8909 = vmatmul.mubr.msk.f32.gmra.mrb[128].mxu1 %vm1510_vm8, %v11500_v57  ;;  %v1430_v2 = vpop.f32.mrb[132].mxu0 }
 0x2c2   :  { %8911 = vmatprep.mubr.msk.f32.mxu1 %vm10096_vm3, %v13592_v39  ;;  %v2458_v29 = vrot.slane %v1430_v2, 7  ;;  %v1432_v1 = vpop.f32.mrb[133].mxu0 }
 0x2c4   :  { %v11606_v36 = vsel %vm436_vm0, %v2456_v19, %v2458_v29 }
 0x2c5   :  { %8912 = vmatmul.mubr.msk.f32.gmra.mrb[130].mxu1 %vm1510_vm8, %v11507_v47  ;;  %v1435_v15 = vpop.f32.mrb[134].mxu0 }
 0x2c6   :  { %8914 = vmatprep.mubr.msk.f32.mxu1 %vm10096_vm3, %v13592_v39  ;;  %v2460_v13 = vrot.slane %v1435_v15, 7  ;;  %v1437_v5 = vpop.f32.mrb[135].mxu0 }
 0x2c8   :  { %v11613_v57 = vsel %vm436_vm0, %v2458_v29, %v2460_v13 }
 0x2c9   :  { %8915 = vmatmul.mubr.msk.f32.gmra.mrb[132].mxu1 %vm1510_vm8, %v11514_v23  ;;  %v1440_v38 = vpop.f32.mrb[136].mxu0 }
 0x2ca   :  { %8917 = vmatprep.mubr.msk.f32.mxu1 %vm10096_vm3, %v13592_v39  ;;  %v2462_v1 = vrot.slane %v1440_v38, 7  ;;  %v1442_v19 = vpop.f32.mrb[137].mxu0 }
 0x2cb   :  { %v13595_v19 = vrot.slane %v11529_v27, 5  ;;  %v10062_v27 = vld [vmem:[%s13365_s4 + $0x8] sm:$0xff] }
 0x2cc   :  { %v11620_v47 = vsel %vm436_vm0, %v2460_v13, %v2462_v1 }
 0x2cd   :  { %8918 = vmatmul.mubr.msk.f32.gmra.mrb[134].mxu1 %vm1510_vm8, %v11525_v63  ;;  %v1445_v2 = vpop.f32.mrb[138].mxu0 }
 0x2ce   :  { %8920 = vmatprep.mubr.msk.f32.mxu1 %vm10096_vm3, %v13592_v39  ;;  %v2464_v29 = vrot.slane %v1445_v2, 7  ;;  %v1447_v15 = vpop.f32.mrb[139].mxu0  ;;  %v60_v2 = vld [vmem:[%s13365_s4 + $0x38] sm:$0xff] }
 0x2d0   :  { %v11627_v23 = vsel %vm436_vm0, %v2462_v1, %v2464_v29 }
 0x2d1   :  { %8921 = vmatmul.mubr.msk.f32.gmra.mrb[136].mxu1 %vm1510_vm8, %v11539_v52  ;;  %v11631_v5 = vpop.f32.mrb[140].mxu0 }
 0x2d2   :  { %8923 = vmatprep.mubr.msk.f32.mxu1 %vm10096_vm3, %v13592_v39  ;;  %v2466_v13 = vrot.slane %v11631_v5, 7  ;;  %v1452_v63 = vpop.f32.mrb[141].mxu0 }
 0x2d3   :  { %v13596_v63 = vmov 0.0|0.0  }
 0x2d4   :  { %v11639_v38 = vsel %vm436_vm0, %v2464_v29, %v2466_v13 }
 0x2d5   :  { %8924 = vmatmul.mubr.msk.f32.gmra.mrb[138].mxu1 %vm1510_vm8, %v13595_v19  ;;  %v1455_v1 = vpop.f32.mrb[142].mxu0 }
 0x2d6   :  { %8928 = vmatprep.mubr.msk.f32.mxu1 %vm10096_vm3, %v13592_v39  ;;  %8975 = vmatmul.mubr.msk.f32.vlgmr.msra.gmra.mrb[156].mxu0 %vm1510_vm8, %v1455_v1  ;;  %v1457_v52 = vpop.f32.mrb[143].mxu0 }
 0x2d7   :  { %8977 = vmatprep.mubr.msk.f32.mxu0 %vm10096_vm3, %v13592_v39  ;;  %8996 = vmatpush3.msra.mxu0 %v10062_v27 }
 0x2d8   :  { %9018 = vmatprep.subr.mxu0 %v13592_v39 }
 0x2d9   :  { %8929 = vmatmul.mubr.msk.f32.vlgmr.msra.gmra.mrb[140].mxu1 %vm1510_vm8, %v11546_v58  ;;  %v1460_v29 = vpop.f32.mrb[144].mxu0 }
 0x2da   :  { %8931 = vmatprep.mubr.msk.f32.mxu1 %vm10096_vm3, %v13592_v39  ;;  %8950 = vmatpush3.msra.mxu1 %v60_v2  ;;  %v1462_v15 = vpop.f32.mrb[145].mxu0 }
 0x2db   :  { %9734 = vmatprep.subr.bf16.mxu1 %v13596_v63  ;;  %8978 = vmatmul.mubr.msk.f32.gmra.mrb[158].mxu0 %vm1510_vm8, %v1460_v29 }
 0x2dc   :  { %8980 = vmatprep.mubr.msk.f32.mxu0 %vm10096_vm3, %v13592_v39 }
 0x2dd   :  { %8932 = vmatmul.mubr.msk.f32.gmra.mrb[142].mxu1 %vm1510_vm8, %v11553_v43  ;;  %v1465_v19 = vpop.f32.mrb[146].mxu0 }
 0x2de   :  { %8934 = vmatprep.mubr.msk.f32.mxu1 %vm10096_vm3, %v13592_v39  ;;  %v1467_v58 = vpop.f32.mrb[147].mxu0 }
 0x2df   :  { %8981 = vmatmul.mubr.msk.f32.gmra.mrb[160].mxu0 %vm1510_vm8, %v1465_v19 }
 0x2e0   :  { %8983 = vmatprep.mubr.msk.f32.mxu0 %vm10096_vm3, %v13592_v39 }
 0x2e1   :  { %8935 = vmatmul.mubr.msk.f32.gmra.mrb[144].mxu1 %vm1510_vm8, %v11560_v61  ;;  %v1470_v1 = vpop.f32.mrb[148].mxu0 }
 0x2e2   :  { %8937 = vmatprep.mubr.msk.f32.mxu1 %vm10096_vm3, %v13592_v39  ;;  %v1472_v52 = vpop.f32.mrb[149].mxu0 }
 0x2e3   :  { %8984 = vmatmul.mubr.msk.f32.gmra.mrb[162].mxu0 %vm1510_vm8, %v1470_v1  ;;  %v13601_v52 = vunpack.c.l.bf16 %v10439_v34 }
 0x2e4   :  { %8986 = vmatprep.mubr.msk.f32.mxu0 %vm10096_vm3, %v13592_v39 }
 0x2e5   :  { %8938 = vmatmul.mubr.msk.f32.gmra.mrb[146].mxu1 %vm1510_vm8, %v11567_v16  ;;  %v1475_v43 = vpop.f32.mrb[150].mxu0 }
 0x2e6   :  { %8940 = vmatprep.mubr.msk.f32.mxu1 %vm10096_vm3, %v13592_v39  ;;  %v1477_v2 = vpop.f32.mrb[151].mxu0 }
 0x2e7   :  { %8987 = vmatmul.mubr.msk.f32.gmra.mrb[164].mxu0 %vm1510_vm8, %v1475_v43  ;;  %v13602_v2 = vunpack.c.h.bf16 %v10456_v56 }
 0x2e8   :  { %8989 = vmatprep.mubr.msk.f32.mxu0 %vm10096_vm3, %v13592_v39 }
 0x2e9   :  { %8941 = vmatmul.mubr.msk.f32.gmra.mrb[148].mxu1 %vm1510_vm8, %v11574_v49  ;;  %v1480_v61 = vpop.f32.mrb[152].mxu0  ;;  %v13597_v49 = vrot.slane %v11579_v41, 6 }
 0x2ea   :  { %8943 = vmatprep.mubr.msk.f32.mxu1 %vm10096_vm3, %v13592_v39  ;;  %v1482_v27 = vpop.f32.mrb[153].mxu0 }
 0x2eb   :  { %8990 = vmatmul.mubr.msk.f32.gmra.mrb[166].mxu0 %vm1510_vm8, %v1480_v61  ;;  %v13603_v27 = vunpack.c.l.bf16 %v10456_v56  ;;  %v13607_v56 = vunpack.c.l.bf16 %v10495_v46 }
 0x2ec   :  { %8992 = vmatprep.mubr.msk.f32.mxu0 %vm10096_vm3, %v13592_v39 }
 0x2ed   :  { %8944 = vmatmul.mubr.msk.f32.gmra.mrb[150].mxu1 %vm1510_vm8, %v11591_v32  ;;  %v1485_v16 = vpop.f32.mrb[154].mxu0 }
 0x2ee   :  { %8946 = vmatprep.mubr.msk.f32.mxu1 %vm10096_vm3, %v13592_v39  ;;  %v1487_v29 = vpop.f32.mrb[155].mxu0 }
 0x2ef   :  { %8993 = vmatmul.mubr.msk.f32.gmra.mrb[168].mxu0 %vm1510_vm8, %v1485_v16  ;;  %v13604_v29 = vunpack.c.h.bf16 %v10477_v42 }
 0x2f0   :  { %8997 = vmatprep.mubr.msk.f32.mxu0 %vm10096_vm3, %v13592_v39 }
 0x2f1   :  { %8947 = vmatmul.mubr.msk.f32.gmra.mrb[152].mxu1 %vm1510_vm8, %v13597_v49 }
 0x2f2   :  { %8951 = vmatprep.mubr.msk.f32.mxu1 %vm10096_vm3, %v13592_v39 }
 0x2f5   :  { %8952 = vmatmul.mubr.msk.f32.vlgmr.msra.gmra.mrb[154].mxu1 %vm1510_vm8, %v11599_v33 }
 0x2f6   :  { %9736 = vmatpush1.bf16.msra.mxu1 %v11243_v51  ;;  %8954 = vmatprep.mubr.msk.f32.mxu1 %vm10096_vm3, %v13592_v39 }
 0x2f7   :  { %9737 = vmatprep.subr.bf16.mxu1 %v13596_v63 }
 0x2f9   :  { %8955 = vmatmul.mubr.msk.f32.gmra.mrb[156].mxu1 %vm1510_vm8, %v11606_v36 }
 0x2fa   :  { %9739 = vmatpush1.bf16.msra.mxu1 %v11256_v54  ;;  %8957 = vmatprep.mubr.msk.f32.mxu1 %vm10096_vm3, %v13592_v39 }
 0x2fb   :  { %9740 = vmatprep.subr.bf16.mxu1 %v13596_v63 }
 0x2fd   :  { %8958 = vmatmul.mubr.msk.f32.gmra.mrb[158].mxu1 %vm1510_vm8, %v11613_v57 }
 0x2fe   :  { %9742 = vmatpush1.bf16.msra.mxu1 %v11270_v17  ;;  %8960 = vmatprep.mubr.msk.f32.mxu1 %vm10096_vm3, %v13592_v39 }
 0x2ff   :  { %9743 = vmatprep.subr.bf16.mxu1 %v13596_v63 }
 0x301   :  { %8961 = vmatmul.mubr.msk.f32.gmra.mrb[160].mxu1 %vm1510_vm8, %v11620_v47 }
 0x302   :  { %9745 = vmatpush1.bf16.msra.mxu1 %v11282_v4  ;;  %8963 = vmatprep.mubr.msk.f32.mxu1 %vm10096_vm3, %v13592_v39 }
 0x303   :  { %9746 = vmatprep.subr.bf16.mxu1 %v13596_v63 }
 0x304   :  { %v1591_v51 = vpop.f32.mrb[56].mxu1 }
 0x305   :  { %v8792_v36 = vpop.f32.mrb[57].mxu1  ;;  %8964 = vmatmul.mubr.msk.f32.gmra.mrb[162].mxu1 %vm1510_vm8, %v11627_v23 }
 0x306   :  { %9748 = vmatpush1.bf16.msra.mxu1 %v11294_v7  ;;  %8966 = vmatprep.mubr.msk.f32.mxu1 %vm10096_vm3, %v13592_v39  ;;  %v13598_v7 = vunpack.c.h.bf16 %v10356_v31  ;;  %v13606_v36 = vunpack.c.h.bf16 %v10495_v46  ;;  %v13611_v46 = vunpack.c.l.bf16 %v10531_v55 }
 0x307   :  { %9749 = vmatprep.subr.bf16.mxu1 %v13596_v63 }
 0x308   :  { %v1596_v17 = vpop.f32.mrb[58].mxu1 }
 0x309   :  { %v8795_v54 = vpop.f32.mrb[59].mxu1  ;;  %8967 = vmatmul.mubr.msk.f32.gmra.mrb[164].mxu1 %vm1510_vm8, %v11639_v38 }
 0x30a   :  { %9751 = vmatpush1.bf16.msra.mxu1 %v11313_v21  ;;  %8969 = vmatprep.mubr.msk.f32.mxu1 %vm10096_vm3, %v13592_v39 }
 0x30b   :  { %9752 = vmatprep.subr.bf16.mxu1 %v13596_v63 }
 0x30c   :  { %v1601_v4 = vpop.f32.mrb[60].mxu1 }
 0x30d   :  { %v8798_v41 = vpop.f32.mrb[61].mxu1  ;;  %8970 = vmatmul.mubr.msk.f32.gmra.mrb[166].mxu1 %vm1510_vm8, %v2466_v13 }
 0x30e   :  { %9754 = vmatpush1.bf16.msra.mxu1 %v11332_v53  ;;  %7978 = vmatprep.mubr.msk.f32.mxu1 %vm971_vm5, %v13598_v7  ;;  %v13608_v41 = vunpack.c.h.bf16 %v10513_v50 }
 0x30f   :  { %9755 = vmatprep.subr.bf16.mxu1 %v13596_v63 }
 0x310   :  { %v1606_v21 = vpop.f32.mrb[62].mxu1 }
 0x311   :  { %v8801_v32 = vpop.f32.mrb[63].mxu1 }
 0x312   :  { %9757 = vmatpush1.bf16.msra.mxu1 %v11356_v9  ;;  %v943_v9 = vadd.f32 %v11250_v45, %v11451_v59  ;;  %v13600_v45 = vunpack.c.h.bf16 %v10439_v34  ;;  %v13605_v34 = vunpack.c.l.bf16 %v10477_v42  ;;  %v13609_v42 = vunpack.c.l.bf16 %v10513_v50 }
 0x313   :  { %9758 = vmatprep.subr.bf16.mxu1 %v13596_v63  ;;  %v13613_v50 = vunpack.c.l.bf16 %v10549_v60 }
 0x314   :  { %v1611_v33 = vpop.f32.mrb[64].mxu1  ;;  %v970_v15 = vmax.f32 %v943_v9, 0.0 }
 0x315   :  { %v8804_v57 = vpop.f32.mrb[65].mxu1 }
 0x316   :  { %9760 = vmatpush1.bf16.msra.mxu1 %v11374_v44 }
 0x317   :  { %9761 = vmatprep.subr.bf16.mxu1 %v13596_v63 }
 0x318   :  { %v1616_v47 = vpop.f32.mrb[66].mxu1 }
 0x319   :  { %v8807_v53 = vpop.f32.mrb[67].mxu1 }
 0x31a   :  { %9763 = vmatpush1.bf16.msra.mxu1 %v11396_v25 }
 0x31b   :  { %9764 = vmatprep.subr.bf16.mxu1 %v13596_v63 }
 0x31c   :  { %v1621_v23 = vpop.f32.mrb[68].mxu1 }
 0x31d   :  { %v8810_v5 = vpop.f32.mrb[69].mxu1 }
 0x31e   :  { %9766 = vmatpush1.bf16.msra.mxu1 %v11429_v28  ;;  %v13599_v28 = vunpack.c.l.bf16 %v10356_v31  ;;  %v13612_v5 = vunpack.c.h.bf16 %v10549_v60  ;;  %v13617_v60 = vunpack.c.l.bf16 %v10585_v6 }
 0x31f   :  { %9767 = vmatprep.subr.bf16.mxu1 %v13596_v63 }
 0x320   :  { %v1711_v13 = vpop.f32.mrb[70].mxu1 }
 0x321   :  { %v1712_v38 = vadd.f32 %v1711_v13, %v1591_v51  ;;  %v8815_v44 = vpop.f32.mrb[71].mxu1 }
 0x322   :  { %9769 = vmatpush1.bf16.msra.mxu1 %v11447_v35  ;;  %v13614_v44 = vunpack.c.h.bf16 %v10567_v0 }
 0x323   :  { %2781 = vmatprep.subr.mxu1 %v13592_v39 }
 0x324   :  { %v1716_v25 = vpop.f32.mrb[72].mxu1 }
 0x325   :  { %v1717_v19 = vadd.f32 %v1716_v25, %v1596_v17  ;;  %v8818_v58 = vpop.f32.mrb[73].mxu1 }
 0x326   :  { %7977 = vmatpush1.msk.msra.mxu1 %vm1140_vm6, %v970_v15  ;;  %v13616_v58 = vunpack.c.h.bf16 %v10585_v6  ;;  %v13621_v6 = vunpack.c.l.bf16 %v10621_v14 }
 0x327   :  { %2798 = vmatmul.mubr.f32.vlgmr.msra.gmra.mrb[168].mxu1 %v13599_v28  ;;  %9179 = vmatprep.subr.mxu1 %v13592_v39 }
 0x328   :  { %v1721_v1 = vpop.f32.mrb[74].mxu1  ;;  %7979 = vmatprep.mubr.msk.f32.mxu1 %vm971_vm5, %v13600_v45  ;;  %9180 = vmatpush3.msra.mxu1 %v11427_v11  ;;  %v13618_v45 = vunpack.c.h.bf16 %v10603_v10 }
 0x329   :  { %v1722_v35 = vadd.f32 %v1721_v1, %v1601_v4  ;;  %v8821_v59 = vpop.f32.mrb[75].mxu1 }
 0x32b   :  { %2803 = vmatmul.mubr.f32.gmra.mrb[170].mxu1 %v13601_v52 }
 0x32c   :  { %v1726_v43 = vpop.f32.mrb[76].mxu1  ;;  %7980 = vmatprep.mubr.msk.f32.mxu1 %vm971_vm5, %v13602_v2 }
 0x32d   :  { %v1727_v31 = vadd.f32 %v1726_v43, %v1606_v21  ;;  %v8824_v61 = vpop.f32.mrb[77].mxu1  ;;  %v13620_v43 = vunpack.c.h.bf16 %v10621_v14  ;;  %v13625_v14 = vunpack.c.l.bf16 %v10657_v22 }
 0x32f   :  { %2808 = vmatmul.mubr.f32.gmra.mrb[172].mxu1 %v13603_v27  ;;  %v13622_v27 = vunpack.c.h.bf16 %v10639_v18 }
 0x330   :  { %v1731_v16 = vpop.f32.mrb[78].mxu1  ;;  %7981 = vmatprep.mubr.msk.f32.mxu1 %vm971_vm5, %v13604_v29 }
 0x331   :  { %v1732_v11 = vadd.f32 %v1731_v16, %v1611_v33  ;;  %v8827_v49 = vpop.f32.mrb[79].mxu1  ;;  %v13610_v33 = vunpack.c.h.bf16 %v10531_v55  ;;  %v13615_v55 = vunpack.c.l.bf16 %v10567_v0  ;;  %v13619_v0 = vunpack.c.l.bf16 %v10603_v10 }
 0x332   :  { %v13623_v10 = vunpack.c.l.bf16 %v10639_v18  ;;  %v13624_v49 = vunpack.c.h.bf16 %v10657_v22  ;;  %v13627_v18 = vunpack.c.l.bf16 %v10675_v26  ;;  %v13629_v22 = vunpack.c.l.bf16 %v10693_v30 }
 0x333   :  { %2813 = vmatmul.mubr.f32.gmra.mrb[174].mxu1 %v13605_v34 }
 0x334   :  { %v1736_v51 = vpop.f32.mrb[80].mxu1  ;;  %7982 = vmatprep.mubr.msk.f32.mxu1 %vm971_vm5, %v13606_v36 }
 0x335   :  { %v1737_v17 = vadd.f32 %v1736_v51, %v1616_v47  ;;  %v8830_v54 = vpop.f32.mrb[81].mxu1 }
 0x337   :  { %2818 = vmatmul.mubr.f32.gmra.mrb[176].mxu1 %v13607_v56 }
 0x338   :  { %v1741_v4 = vpop.f32.mrb[82].mxu1  ;;  %7983 = vmatprep.mubr.msk.f32.mxu1 %vm971_vm5, %v13608_v41  ;;  %v13628_v41 = vunpack.c.h.bf16 %v10693_v30  ;;  %v13633_v30 = vunpack.c.l.bf16 %v10720_v48 }
 0x339   :  { %v1742_v7 = vadd.f32 %v1741_v4, %v1621_v23  ;;  %v8833_v21 = vpop.f32.mrb[83].mxu1 }
 0x33b   :  { %2823 = vmatmul.mubr.f32.gmra.mrb[178].mxu1 %v13609_v42 }
 0x33c   :  { %v1845_v32 = vpop.f32.mrb[84].mxu1  ;;  %7984 = vmatprep.mubr.msk.f32.mxu1 %vm971_vm5, %v13610_v33 }
 0x33d   :  { %v1879_v57 = vadd.f32 %v1845_v32, %v1712_v38  ;;  %v8838_v47 = vpop.f32.mrb[85].mxu1  ;;  %v13630_v32 = vunpack.c.h.bf16 %v10708_v37 }
 0x33f   :  { %2828 = vmatmul.mubr.f32.gmra.mrb[180].mxu1 %v13611_v46  ;;  %v13632_v46 = vunpack.c.h.bf16 %v10720_v48  ;;  %v13637_v48 = vunpack.c.l.bf16 %v10744_v12 }
 0x340   :  { %v1850_v53 = vpop.f32.mrb[86].mxu1  ;;  %7985 = vmatprep.mubr.msk.f32.mxu1 %vm971_vm5, %v13612_v5 }
 0x341   :  { %v1880_v23 = vadd.f32 %v1850_v53, %v1717_v19  ;;  %v8841_v9 = vpop.f32.mrb[87].mxu1 }
 0x342   :  { %v13634_v9 = vunpack.c.h.bf16 %v10732_v62 }
 0x343   :  { %2833 = vmatmul.mubr.f32.gmra.mrb[182].mxu1 %v13613_v50 }
 0x344   :  { %v1855_v13 = vpop.f32.mrb[88].mxu1  ;;  %7986 = vmatprep.mubr.msk.f32.mxu1 %vm971_vm5, %v13614_v44 }
 0x345   :  { %v1881_v38 = vadd.f32 %v1855_v13, %v1722_v35  ;;  %v8844_v15 = vpop.f32.mrb[89].mxu1 }
 0x347   :  { %2838 = vmatmul.mubr.f32.gmra.mrb[184].mxu1 %v13615_v55 }
 0x348   :  { %v1860_v25 = vpop.f32.mrb[90].mxu1  ;;  %7987 = vmatprep.mubr.msk.f32.mxu1 %vm971_vm5, %v13616_v58  ;;  %v13638_v58 = vunpack.c.h.bf16 %v10756_v24 }
 0x349   :  { %v1882_v19 = vadd.f32 %v1860_v25, %v1727_v31  ;;  %v8847_v28 = vpop.f32.mrb[91].mxu1 }
 0x34b   :  { %2843 = vmatmul.mubr.f32.gmra.mrb[186].mxu1 %v13617_v60 }
 0x34c   :  { %v1865_v1 = vpop.f32.mrb[92].mxu1  ;;  %7988 = vmatprep.mubr.msk.f32.mxu1 %vm971_vm5, %v13618_v45 }
 0x34d   :  { %v1883_v35 = vadd.f32 %v1865_v1, %v1732_v11  ;;  %v8850_v59 = vpop.f32.mrb[93].mxu1  ;;  %v13640_v1 = vunpack.c.h.bf16 %v10768_v8 }
 0x34f   :  { %2848 = vmatmul.mubr.f32.gmra.mrb[188].mxu1 %v13619_v0  ;;  %v13642_v0 = vunpack.c.h.bf16 %v10780_v20 }
 0x350   :  { %v1870_v52 = vpop.f32.mrb[94].mxu1  ;;  %7989 = vmatprep.mubr.msk.f32.mxu1 %vm971_vm5, %v13620_v43 }
 0x351   :  { %v1884_v2 = vadd.f32 %v1870_v52, %v1737_v17  ;;  %v8853_v31 = vpop.f32.mrb[95].mxu1  ;;  %v13626_v17 = vunpack.c.h.bf16 %v10675_v26  ;;  %v13631_v26 = vunpack.c.l.bf16 %v10708_v37  ;;  %v13635_v37 = vunpack.c.l.bf16 %v10732_v62 }
 0x352   :  { %v13639_v62 = vunpack.c.l.bf16 %v10756_v24  ;;  %v13643_v24 = vunpack.c.l.bf16 %v10780_v20  ;;  %v13644_v31 = vunpack.c.h.bf16 %v10792_v3  ;;  %v13647_v20 = vunpack.c.l.bf16 %v10808_v40 }
 0x353   :  { %2853 = vmatmul.mubr.f32.gmra.mrb[190].mxu1 %v13621_v6 }
 0x354   :  { %v1875_v61 = vpop.f32.mrb[96].mxu1  ;;  %7990 = vmatprep.mubr.msk.f32.mxu1 %vm971_vm5, %v13622_v27 }
 0x355   :  { %v1885_v16 = vadd.f32 %v1875_v61, %v1742_v7  ;;  %v8856_v29 = vpop.f32.mrb[97].mxu1 }
 0x357   :  { %2858 = vmatmul.mubr.f32.gmra.mrb[192].mxu1 %v13623_v10 }
 0x358   :  { %v1986_v11 = vpop.f32.mrb[98].mxu1  ;;  %7991 = vmatprep.mubr.msk.f32.mxu1 %vm971_vm5, %v13624_v49  ;;  %v13648_v49 = vld [vmem:[#allocation5_spill] sm:$0xff] }
 0x359   :  { %v2020_v34 = vadd.f32 %v1986_v11, %v1879_v57  ;;  %v8861_v51 = vpop.f32.mrb[99].mxu1 }
 0x35b   :  { %2863 = vmatmul.mubr.f32.gmra.mrb[194].mxu1 %v13625_v14 }
 0x35c   :  { %v1991_v36 = vpop.f32.mrb[100].mxu1  ;;  %7992 = vmatprep.mubr.msk.f32.mxu1 %vm971_vm5, %v13626_v17  ;;  %v13651_v17 = vld [vmem:[#allocation6_spill] sm:$0xff] }
 0x35d   :  { %v2021_v54 = vadd.f32 %v1991_v36, %v1880_v23  ;;  %v8864_v56 = vpop.f32.mrb[101].mxu1 }
 0x35f   :  { %2868 = vmatmul.mubr.f32.gmra.mrb[196].mxu1 %v13627_v18 }
 0x360   :  { %v1996_v4 = vpop.f32.mrb[102].mxu1  ;;  %7993 = vmatprep.mubr.msk.f32.mxu1 %vm971_vm5, %v13628_v41  ;;  %v13654_v41 = vld [vmem:[#allocation7_spill] sm:$0xff] }
 0x361   :  { %v2022_v7 = vadd.f32 %v1996_v4, %v1881_v38  ;;  %v8867_v21 = vpop.f32.mrb[103].mxu1  ;;  %v13636_v38 = vunpack.c.h.bf16 %v10744_v12  ;;  %v13641_v12 = vunpack.c.l.bf16 %v10768_v8  ;;  %v13645_v8 = vunpack.c.l.bf16 %v10792_v3 }
 0x362   :  { %v13650_v3 = vunpack.c.l.bf16 %v13648_v49 }
 0x363   :  { %2873 = vmatmul.mubr.f32.gmra.mrb[198].mxu1 %v13629_v22 }
 0x364   :  { %v2001_v42 = vpop.f32.mrb[104].mxu1  ;;  %7994 = vmatprep.mubr.msk.f32.mxu1 %vm971_vm5, %v13630_v32 }
 0x365   :  { %v2023_v33 = vadd.f32 %v2001_v42, %v1882_v19  ;;  %v8870_v57 = vpop.f32.mrb[105].mxu1  ;;  %v13656_v42 = vunpack.c.l.bf16 %v13654_v41 }
 0x367   :  { %2878 = vmatmul.mubr.f32.gmra.mrb[200].mxu1 %v13631_v26 }
 0x368   :  { %v2006_v47 = vpop.f32.mrb[106].mxu1  ;;  %7995 = vmatprep.mubr.msk.f32.mxu1 %vm971_vm5, %v13632_v46 }
 0x369   :  { %v2024_v53 = vadd.f32 %v2006_v47, %v1883_v35  ;;  %v8873_v5 = vpop.f32.mrb[107].mxu1 }
 0x36a   :  { %v13660_v5 = vld [vmem:[#allocation9_spill] sm:$0xff] }
 0x36b   :  { %2883 = vmatmul.mubr.f32.gmra.mrb[202].mxu1 %v13633_v30  ;;  %v13661_v30 = vunpack.c.h.bf16 %v13660_v5 }
 0x36c   :  { %v2011_v23 = vpop.f32.mrb[108].mxu1  ;;  %7996 = vmatprep.mubr.msk.f32.mxu1 %vm971_vm5, %v13634_v9 }
 0x36d   :  { %v2025_v50 = vadd.f32 %v2011_v23, %v1884_v2  ;;  %v8876_v13 = vpop.f32.mrb[109].mxu1 }
 0x36f   :  { %2888 = vmatmul.mubr.f32.gmra.mrb[204].mxu1 %v13635_v37  ;;  %v13663_v37 = vld [vmem:[#allocation10_spill] sm:$0xff] }
 0x370   :  { %v2016_v44 = vpop.f32.mrb[110].mxu1  ;;  %7997 = vmatprep.mubr.msk.f32.mxu1 %vm971_vm5, %v13636_v38 }
 0x371   :  { %v2026_v15 = vadd.f32 %v2016_v44, %v1885_v16  ;;  %v8879_v55 = vpop.f32.mrb[111].mxu1  ;;  %v13646_v16 = vunpack.c.h.bf16 %v10808_v40  ;;  %v13653_v40 = vunpack.c.l.bf16 %v13651_v17  ;;  %v13664_v44 = vunpack.c.h.bf16 %v13663_v37 }
 0x372   :  { %v13665_v55 = vunpack.c.l.bf16 %v13663_v37 }
 0x373   :  { %2893 = vmatmul.mubr.f32.gmra.mrb[206].mxu1 %v13637_v48 }
 0x374   :  { %v2126_v25 = vpop.f32.mrb[112].mxu1  ;;  %7998 = vmatprep.mubr.msk.f32.mxu1 %vm971_vm5, %v13638_v58 }
 0x375   :  { %v2160_v19 = vadd.f32 %v2126_v25, %v2020_v34  ;;  %v8884_v28 = vpop.f32.mrb[113].mxu1  ;;  %v13649_v34 = vunpack.c.h.bf16 %v13648_v49  ;;  %v13666_v25 = vld [vmem:[#allocation11_spill] sm:$0xff] }
 0x376   :  { %v13667_v58 = vunpack.c.h.bf16 %v13666_v25 }
 0x377   :  { %2898 = vmatmul.mubr.f32.gmra.mrb[208].mxu1 %v13639_v62  ;;  %v13668_v62 = vunpack.c.l.bf16 %v13666_v25 }
 0x378   :  { %v2131_v60 = vpop.f32.mrb[114].mxu1  ;;  %7999 = vmatprep.mubr.msk.f32.mxu1 %vm971_vm5, %v13640_v1  ;;  %v13669_v1 = vld [vmem:[#allocation12_spill] sm:$0xff] }
 0x379   :  { %v2161_v45 = vadd.f32 %v2131_v60, %v2021_v54  ;;  %v8887_v35 = vpop.f32.mrb[115].mxu1  ;;  %v13652_v54 = vunpack.c.h.bf16 %v13651_v17 }
 0x37b   :  { %2903 = vmatmul.mubr.f32.gmra.mrb[210].mxu1 %v13641_v12 }
 0x37c   :  { %v2136_v59 = vpop.f32.mrb[116].mxu1  ;;  %8000 = vmatprep.mubr.msk.f32.mxu1 %vm971_vm5, %v13642_v0 }
 0x37d   :  { %v2162_v52 = vadd.f32 %v2136_v59, %v2022_v7  ;;  %v8890_v43 = vpop.f32.mrb[117].mxu1  ;;  %v13655_v7 = vunpack.c.h.bf16 %v13654_v41  ;;  %v13671_v59 = vunpack.c.l.bf16 %v13669_v1 }
 0x37f   :  { %2908 = vmatmul.mubr.f32.gmra.mrb[212].mxu1 %v13643_v24 }
 0x380   :  { %v2141_v2 = vpop.f32.mrb[118].mxu1  ;;  %8001 = vmatprep.mubr.msk.f32.mxu1 %vm971_vm5, %v13644_v31 }
 0x381   :  { %v2163_v6 = vadd.f32 %v2141_v2, %v2023_v33  ;;  %v8893_v61 = vpop.f32.mrb[119].mxu1  ;;  %v13657_v33 = vld [vmem:[#allocation8_spill] sm:$0xff] }
 0x382   :  { %v13658_v57 = vunpack.c.h.bf16 %v13657_v33  ;;  %v13659_v46 = vunpack.c.l.bf16 %v13657_v33  ;;  %v13684_v33 = vld [vmem:[#allocation17_spill] sm:$0xff] }
 0x383   :  { %2913 = vmatmul.mubr.f32.gmra.mrb[214].mxu1 %v13645_v8 }
 0x384   :  { %v2146_v27 = vpop.f32.mrb[120].mxu1  ;;  %8002 = vmatprep.mubr.msk.f32.mxu1 %vm971_vm5, %v13646_v16 }
 0x385   :  { %v2164_v29 = vadd.f32 %v2146_v27, %v2024_v53  ;;  %v8896_v10 = vpop.f32.mrb[121].mxu1  ;;  %v13675_v27 = vld [vmem:[#allocation14_spill] sm:$0xff] }
 0x386   :  { %v13676_v16 = vunpack.c.h.bf16 %v13675_v27 }
 0x387   :  { %2918 = vmatmul.mubr.f32.gmra.mrb[216].mxu1 %v13647_v20 }
 0x388   :  { %v2151_v11 = vpop.f32.mrb[122].mxu1  ;;  %8003 = vmatprep.mubr.msk.f32.mxu1 %vm971_vm5, %v13649_v34 }
 0x389   :  { %v2165_v51 = vadd.f32 %v2151_v11, %v2025_v50  ;;  %v8899_v14 = vpop.f32.mrb[123].mxu1  ;;  %v13662_v50 = vunpack.c.l.bf16 %v13660_v5  ;;  %v13677_v11 = vunpack.c.l.bf16 %v13675_v27 }
 0x38b   :  { %2923 = vmatmul.mubr.f32.gmra.mrb[218].mxu1 %v13650_v3 }
 0x38c   :  { %v2156_v36 = vpop.f32.mrb[124].mxu1  ;;  %8004 = vmatprep.mubr.msk.f32.mxu1 %vm971_vm5, %v13652_v54 }
 0x38d   :  { %v2166_v56 = vadd.f32 %v2156_v36, %v2026_v15  ;;  %v8902_v18 = vpop.f32.mrb[125].mxu1 }
 0x38f   :  { %2928 = vmatmul.mubr.f32.gmra.mrb[220].mxu1 %v13653_v40  ;;  %v13681_v40 = vld [vmem:[#allocation16_spill] sm:$0xff] }
 0x390   :  { %v2267_v4 = vpop.f32.mrb[126].mxu1  ;;  %8005 = vmatprep.mubr.msk.f32.mxu1 %vm971_vm5, %v13655_v7 }
 0x391   :  { %v2301_v21 = vadd.f32 %v2267_v4, %v2160_v19  ;;  %v8907_v22 = vpop.f32.mrb[127].mxu1  ;;  %v13682_v4 = vunpack.c.h.bf16 %v13681_v40 }
 0x392   :  { %v13683_v22 = vunpack.c.l.bf16 %v13681_v40 }
 0x393   :  { %2933 = vmatmul.mubr.f32.gmra.mrb[222].mxu1 %v13656_v42 }
 0x394   :  { %v2272_v32 = vpop.f32.mrb[128].mxu1  ;;  %8006 = vmatprep.mubr.msk.f32.mxu1 %vm971_vm5, %v13658_v57  ;;  %v13685_v57 = vunpack.c.h.bf16 %v13684_v33 }
 0x395   :  { %v2302_v26 = vadd.f32 %v2272_v32, %v2161_v45  ;;  %v8910_v47 = vpop.f32.mrb[129].mxu1  ;;  %v13670_v45 = vunpack.c.h.bf16 %v13669_v1 }
 0x397   :  { %2938 = vmatmul.mubr.f32.gmra.mrb[224].mxu1 %v13659_v46 }
 0x398   :  { %v2277_v53 = vpop.f32.mrb[130].mxu1  ;;  %8007 = vmatprep.mubr.msk.f32.mxu1 %vm971_vm5, %v13661_v30 }
 0x399   :  { %v2303_v23 = vadd.f32 %v2277_v53, %v2162_v52  ;;  %v8913_v9 = vpop.f32.mrb[131].mxu1  ;;  %v13672_v52 = vld [vmem:[#allocation13_spill] sm:$0xff]  ;;  %v13686_v53 = vunpack.c.l.bf16 %v13684_v33 }
 0x39a   :  { %v13673_v43 = vunpack.c.h.bf16 %v13672_v52  ;;  %v13674_v61 = vunpack.c.l.bf16 %v13672_v52 }
 0x39b   :  { %2943 = vmatmul.mubr.f32.gmra.mrb[226].mxu1 %v13662_v50 }
 0x39c   :  { %v2282_v13 = vpop.f32.mrb[132].mxu1  ;;  %8008 = vmatprep.mubr.msk.f32.mxu1 %vm971_vm5, %v13664_v44 }
 0x39d   :  { %v2304_v38 = vadd.f32 %v2282_v13, %v2163_v6  ;;  %v8916_v15 = vpop.f32.mrb[133].mxu1 }
 0x39f   :  { %2948 = vmatmul.mubr.f32.gmra.mrb[228].mxu1 %v13665_v55 }
 0x3a0   :  { %v2287_v48 = vpop.f32.mrb[134].mxu1  ;;  %8009 = vmatprep.mubr.msk.f32.mxu1 %vm971_vm5, %v13667_v58 }
 0x3a1   :  { %v2305_v19 = vadd.f32 %v2287_v48, %v2164_v29  ;;  %v8919_v28 = vpop.f32.mrb[135].mxu1 }
 0x3a3   :  { %2953 = vmatmul.mubr.f32.gmra.mrb[230].mxu1 %v13668_v62 }
 0x3a4   :  { %v2292_v60 = vpop.f32.mrb[136].mxu1  ;;  %8010 = vmatprep.mubr.msk.f32.mxu1 %vm971_vm5, %v13670_v45 }
 0x3a5   :  { %v2306_v35 = vadd.f32 %v2292_v60, %v2165_v51  ;;  %v8922_v12 = vpop.f32.mrb[137].mxu1  ;;  %v13678_v51 = vld [vmem:[#allocation15_spill] sm:$0xff] }
 0x3a6   :  { %v13679_v14 = vunpack.c.h.bf16 %v13678_v51  ;;  %v13680_v54 = vunpack.c.l.bf16 %v13678_v51 }
 0x3a7   :  { %2958 = vmatmul.mubr.f32.gmra.mrb[232].mxu1 %v13671_v59 }
 0x3a8   :  { %v2297_v0 = vpop.f32.mrb[138].mxu1  ;;  %8011 = vmatprep.mubr.msk.f32.mxu1 %vm971_vm5, %v13673_v43  ;;  %v13696_v43 = vld [vmem:[#allocation21_spill] sm:$0xff] }
 0x3a9   :  { %v2307_v24 = vadd.f32 %v2297_v0, %v2166_v56  ;;  %v8925_v2 = vpop.f32.mrb[139].mxu1  ;;  %v2676_v31 = vpop.f32.mrb[156].mxu0 }
 0x3aa   :  { %v8976_v6 = vpop.f32.mrb[157].mxu0  ;;  %v13697_v2 = vunpack.c.h.bf16 %v13696_v43 }
 0x3ab   :  { %2963 = vmatmul.mubr.f32.gmra.mrb[234].mxu1 %v13674_v61 }
 0x3ac   :  { %v2408_v8 = vpop.f32.mrb[140].mxu1  ;;  %8012 = vmatprep.mubr.msk.f32.mxu1 %vm971_vm5, %v13676_v16  ;;  %v13699_v16 = vld [vmem:[#allocation22_spill] sm:$0xff] }
 0x3ad   :  { %v2442_v29 = vadd.f32 %v2408_v8, %v2301_v21  ;;  %v8930_v10 = vpop.f32.mrb[141].mxu1  ;;  %v13698_v8 = vunpack.c.l.bf16 %v13696_v43 }
 0x3ae   :  { %v2681_v20 = vpop.f32.mrb[158].mxu0  ;;  %v13700_v10 = vunpack.c.h.bf16 %v13699_v16 }
 0x3af   :  { %2968 = vmatmul.mubr.f32.gmra.mrb[236].mxu1 %v13677_v11  ;;  %v8979_v49 = vpop.f32.mrb[159].mxu0 }
 0x3b0   :  { %v2413_v34 = vpop.f32.mrb[142].mxu1  ;;  %8013 = vmatprep.mubr.msk.f32.mxu1 %vm971_vm5, %v13679_v14 }
 0x3b1   :  { %v2443_v3 = vadd.f32 %v2413_v34, %v2302_v26  ;;  %v8933_v36 = vpop.f32.mrb[143].mxu1  ;;  %v13701_v34 = vunpack.c.l.bf16 %v13699_v16  ;;  %v13735_v16 = vld [vmem:[#allocation34_spill] sm:$0xff] }
 0x3b2   :  { %v2686_v17 = vpop.f32.mrb[160].mxu0 }
 0x3b3   :  { %2973 = vmatmul.mubr.f32.gmra.mrb[238].mxu1 %v13680_v54  ;;  %v8982_v56 = vpop.f32.mrb[161].mxu0 }
 0x3b4   :  { %v2418_v18 = vpop.f32.mrb[144].mxu1  ;;  %8014 = vmatprep.mubr.msk.f32.mxu1 %vm971_vm5, %v13682_v4 }
 0x3b5   :  { %v2444_v41 = vadd.f32 %v2418_v18, %v2303_v23  ;;  %v8936_v7 = vpop.f32.mrb[145].mxu1  ;;  %v13687_v23 = vld [vmem:[#allocation18_spill] sm:$0xff] }
 0x3b6   :  { %v2691_v21 = vpop.f32.mrb[162].mxu0  ;;  %v13688_v9 = vunpack.c.h.bf16 %v13687_v23  ;;  %v13689_v44 = vunpack.c.l.bf16 %v13687_v23 }
 0x3b7   :  { %2978 = vmatmul.mubr.f32.gmra.mrb[240].mxu1 %v13683_v22  ;;  %v8985_v42 = vpop.f32.mrb[163].mxu0 }
 0x3b8   :  { %v2423_v32 = vpop.f32.mrb[146].mxu1  ;;  %8015 = vmatprep.mubr.msk.f32.mxu1 %vm971_vm5, %v13685_v57 }
 0x3b9   :  { %v2445_v26 = vadd.f32 %v2423_v32, %v2304_v38  ;;  %v8939_v47 = vpop.f32.mrb[147].mxu1  ;;  %v13690_v38 = vld [vmem:[#allocation19_spill] sm:$0xff] }
 0x3ba   :  { %v2696_v46 = vpop.f32.mrb[164].mxu0  ;;  %v13691_v48 = vunpack.c.h.bf16 %v13690_v38  ;;  %v13692_v62 = vunpack.c.l.bf16 %v13690_v38 }
 0x3bb   :  { %2983 = vmatmul.mubr.f32.gmra.mrb[242].mxu1 %v13686_v53  ;;  %v8988_v5 = vpop.f32.mrb[165].mxu0 }
 0x3bc   :  { %v2428_v30 = vpop.f32.mrb[148].mxu1  ;;  %8016 = vmatprep.mubr.msk.f32.mxu1 %vm971_vm5, %v13688_v9 }
 0x3bd   :  { %v2446_v50 = vadd.f32 %v2428_v30, %v2305_v19  ;;  %v8942_v13 = vpop.f32.mrb[149].mxu1  ;;  %v13693_v19 = vld [vmem:[#allocation20_spill] sm:$0xff] }
 0x3be   :  { %v2701_v37 = vpop.f32.mrb[166].mxu0  ;;  %v13694_v45 = vunpack.c.h.bf16 %v13693_v19  ;;  %v13695_v0 = vunpack.c.l.bf16 %v13693_v19 }
 0x3bf   :  { %2988 = vmatmul.mubr.f32.gmra.mrb[244].mxu1 %v13689_v44  ;;  %v8991_v15 = vpop.f32.mrb[167].mxu0 }
 0x3c0   :  { %v2433_v55 = vpop.f32.mrb[150].mxu1  ;;  %8017 = vmatprep.mubr.msk.f32.mxu1 %vm971_vm5, %v13691_v48  ;;  %v13717_v48 = vld [vmem:[#allocation28_spill] sm:$0xff] }
 0x3c1   :  { %v2447_v25 = vadd.f32 %v2433_v55, %v2306_v35  ;;  %v8945_v58 = vpop.f32.mrb[151].mxu1 }
 0x3c2   :  { %v2706_v28 = vpop.f32.mrb[168].mxu0  ;;  %v13720_v58 = vld [vmem:[#allocation29_spill] sm:$0xff] }
 0x3c3   :  { %2993 = vmatmul.mubr.f32.gmra.mrb[246].mxu1 %v13692_v62  ;;  %v8994_v60 = vpop.f32.mrb[169].mxu0  ;;  %v13721_v62 = vunpack.c.h.bf16 %v13720_v58 }
 0x3c4   :  { %v2438_v1 = vpop.f32.mrb[152].mxu1  ;;  %8018 = vmatprep.mubr.msk.f32.mxu1 %vm971_vm5, %v13694_v45  ;;  %v13722_v60 = vunpack.c.l.bf16 %v13720_v58  ;;  %v13726_v45 = vld [vmem:[#allocation31_spill] sm:$0xff] }
 0x3c5   :  { %v2448_v12 = vadd.f32 %v2438_v1, %v2307_v24  ;;  %v8948_v59 = vpop.f32.mrb[153].mxu1  ;;  %v13723_v1 = vld [vmem:[#allocation30_spill] sm:$0xff] }
 0x3c6   :  { %v13725_v19 = vunpack.c.l.bf16 %v13723_v1  ;;  %v13728_v59 = vunpack.c.l.bf16 %v13726_v45 }
 0x3c7   :  { %2998 = vmatmul.mubr.f32.gmra.mrb[248].mxu1 %v13695_v0  ;;  %v13729_v0 = vld [vmem:[#allocation32_spill] sm:$0xff] }
 0x3c8   :  { %v2548_v52 = vpop.f32.mrb[154].mxu1  ;;  %8019 = vmatprep.mubr.msk.f32.mxu1 %vm971_vm5, %v13697_v2  ;;  %v13731_v43 = vunpack.c.l.bf16 %v13729_v0  ;;  %v13732_v2 = vld [vmem:[#allocation33_spill] sm:$0xff] }
 0x3c9   :  { %v2582_v35 = vadd.f32 %v2548_v52, %v2442_v29  ;;  %v8953_v6 = vpop.f32.mrb[155].mxu1  ;;  %v13702_v29 = vld [vmem:[#allocation23_spill] sm:$0xff]  ;;  %v13730_v52 = vunpack.c.h.bf16 %v13729_v0 }
 0x3ca   :  { %v13703_v14 = vunpack.c.h.bf16 %v13702_v29  ;;  %v13704_v56 = vunpack.c.l.bf16 %v13702_v29 }
 0x3cb   :  { %v11968_v61 = vadd.f32 %v2676_v31, %v2582_v35  ;;  %3003 = vmatmul.mubr.f32.gmra.mrb[250].mxu1 %v13698_v8  ;;  %v13733_v35 = vunpack.c.h.bf16 %v13732_v2 }
 0x3cc   :  { %v2553_v27 = vpop.f32.mrb[156].mxu1  ;;  %8020 = vmatprep.mubr.msk.f32.mxu1 %vm971_vm5, %v13700_v10  ;;  %v13736_v10 = vunpack.c.h.bf16 %v13735_v16 }
 0x3cd   :  { %v2583_v24 = vadd.f32 %v2553_v27, %v2443_v3  ;;  %v8956_v11 = vpop.f32.mrb[157].mxu1  ;;  %v13705_v3 = vld [vmem:[#allocation24_spill] sm:$0xff]  ;;  %v13734_v27 = vunpack.c.l.bf16 %v13732_v2 }
 0x3ce   :  { %v13706_v40 = vunpack.c.h.bf16 %v13705_v3  ;;  %v13707_v22 = vunpack.c.l.bf16 %v13705_v3 }
 0x3cf   :  { %v11975_v49 = vadd.f32 %v2681_v20, %v2583_v24  ;;  %3008 = vmatmul.mubr.f32.gmra.mrb[252].mxu1 %v13701_v34  ;;  %v13737_v34 = vunpack.c.l.bf16 %v13735_v16  ;;  %v10064_v16 = vld [vmem:[%s13365_s4 + $0x10] sm:$0xff] }
 0x3d0   :  { %v2558_v51 = vpop.f32.mrb[158].mxu1  ;;  %8021 = vmatprep.mubr.msk.f32.mxu1 %vm971_vm5, %v13703_v14 }
 0x3d1   :  { %v2584_v31 = vadd.f32 %v2558_v51, %v2444_v41  ;;  %v8959_v36 = vpop.f32.mrb[159].mxu1  ;;  %v13708_v41 = vld [vmem:[#allocation25_spill] sm:$0xff]  ;;  %v13738_v51 = vld [vmem:[#allocation35_spill] sm:$0xff] }
 0x3d2   :  { %v13709_v32 = vunpack.c.h.bf16 %v13708_v41  ;;  %v13710_v47 = vunpack.c.l.bf16 %v13708_v41  ;;  %v13739_v29 = vunpack.c.h.bf16 %v13738_v51  ;;  %v13740_v36 = vunpack.c.l.bf16 %v13738_v51 }
 0x3d3   :  { %v11982_v54 = vadd.f32 %v2686_v17, %v2584_v31  ;;  %3013 = vmatmul.mubr.f32.gmra.mrb[254].mxu1 %v13704_v56 }
 0x3d4   :  { %v2563_v18 = vpop.f32.mrb[160].mxu1  ;;  %8022 = vmatprep.mubr.msk.f32.mxu1 %vm971_vm5, %v13706_v40 }
 0x3d5   :  { %v2585_v20 = vadd.f32 %v2563_v18, %v2445_v26  ;;  %v8962_v4 = vpop.f32.mrb[161].mxu1  ;;  %v13711_v26 = vld [vmem:[#allocation26_spill] sm:$0xff] }
 0x3d6   :  { %v13712_v5 = vunpack.c.h.bf16 %v13711_v26  ;;  %v13713_v9 = vunpack.c.l.bf16 %v13711_v26 }
 0x3d7   :  { %v11989_v7 = vadd.f32 %v2691_v21, %v2585_v20  ;;  %3018 = vmatmul.mubr.f32.gmra.mrb[0].mxu1 %v13707_v22 }
 0x3d8   :  { %v2568_v42 = vpop.f32.mrb[162].mxu1  ;;  %8023 = vmatprep.mubr.msk.f32.mxu1 %vm971_vm5, %v13709_v32 }
 0x3d9   :  { %v2586_v17 = vadd.f32 %v2568_v42, %v2446_v50  ;;  %v8965_v33 = vpop.f32.mrb[163].mxu1  ;;  %v13714_v50 = vld [vmem:[#allocation27_spill] sm:$0xff] }
 0x3da   :  { %v13715_v44 = vunpack.c.h.bf16 %v13714_v50  ;;  %v13716_v38 = vunpack.c.l.bf16 %v13714_v50 }
 0x3db   :  { %v11996_v57 = vadd.f32 %v2696_v46, %v2586_v17  ;;  %3023 = vmatmul.mubr.f32.gmra.mrb[2].mxu1 %v13710_v47 }
 0x3dc   :  { %v2573_v53 = vpop.f32.mrb[164].mxu1  ;;  %8024 = vmatprep.mubr.msk.f32.mxu1 %vm971_vm5, %v13712_v5 }
 0x3dd   :  { %v2587_v21 = vadd.f32 %v2573_v53, %v2447_v25  ;;  %v8968_v30 = vpop.f32.mrb[165].mxu1  ;;  %v13718_v25 = vunpack.c.h.bf16 %v13717_v48 }
 0x3df   :  { %v12003_v23 = vadd.f32 %v2701_v37, %v2587_v21  ;;  %3028 = vmatmul.mubr.f32.gmra.mrb[4].mxu1 %v13713_v9  ;;  %v13719_v37 = vunpack.c.l.bf16 %v13717_v48  ;;  %v10063_v21 = vld [vmem:[%s13365_s4] sm:$0xff] }
 0x3e0   :  { %v2578_v13 = vpop.f32.mrb[166].mxu1  ;;  %8025 = vmatprep.mubr.msk.f32.mxu1 %vm971_vm5, %v13715_v44 }
 0x3e1   :  { %v2588_v46 = vadd.f32 %v2578_v13, %v2448_v12  ;;  %v8971_v15 = vpop.f32.mrb[167].mxu1  ;;  %v13727_v12 = vunpack.c.h.bf16 %v13726_v45 }
 0x3e3   :  { %v12010_v55 = vadd.f32 %v2706_v28, %v2588_v46  ;;  %3033 = vmatmul.mubr.f32.gmra.mrb[6].mxu1 %v13716_v38  ;;  %v13724_v28 = vunpack.c.h.bf16 %v13723_v1 }
 0x3e4   :  { %8026 = vmatprep.mubr.msk.f32.mxu1 %vm971_vm5, %v13718_v25 }
 0x3e7   :  { %3038 = vmatmul.mubr.f32.gmra.mrb[8].mxu1 %v13719_v37 }
 0x3e8   :  { %8027 = vmatprep.mubr.msk.f32.mxu1 %vm971_vm5, %v13721_v62 }
 0x3eb   :  { %3043 = vmatmul.mubr.f32.gmra.mrb[10].mxu1 %v13722_v60 }
 0x3ec   :  { %8028 = vmatprep.mubr.msk.f32.mxu1 %vm971_vm5, %v13724_v28 }
 0x3ef   :  { %3048 = vmatmul.mubr.f32.gmra.mrb[12].mxu1 %v13725_v19 }
 0x3f0   :  { %8029 = vmatprep.mubr.msk.f32.mxu1 %vm971_vm5, %v13727_v12 }
 0x3f3   :  { %3053 = vmatmul.mubr.f32.gmra.mrb[14].mxu1 %v13728_v59 }
 0x3f4   :  { %8030 = vmatprep.mubr.msk.f32.mxu1 %vm971_vm5, %v13730_v52 }
 0x3f7   :  { %3058 = vmatmul.mubr.f32.gmra.mrb[16].mxu1 %v13731_v43 }
 0x3f8   :  { %8031 = vmatprep.mubr.msk.f32.mxu1 %vm971_vm5, %v13733_v35 }
 0x3fa   :  { %v12042_v6 = vpop.f32.mrb[168].mxu1 }
 0x3fb   :  { %v2801_v8 = vpop.f32.mrb[169].mxu1  ;;  %3063 = vmatmul.mubr.f32.gmra.mrb[18].mxu1 %v13734_v27 }
 0x3fc   :  { %8032 = vmatprep.mubr.msk.f32.mxu1 %vm971_vm5, %v13736_v10 }
 0x3fe   :  { %v12049_v24 = vpop.f32.mrb[170].mxu1 }
 0x3ff   :  { %v2806_v11 = vpop.f32.mrb[171].mxu1  ;;  %3068 = vmatmul.mubr.f32.gmra.mrb[20].mxu1 %v13737_v34 }
 0x400   :  { %8033 = vmatprep.mubr.msk.f32.mxu1 %vm971_vm5, %v13739_v29 }
 0x402   :  { %v12056_v14 = vpop.f32.mrb[172].mxu1 }
 0x403   :  { %v2811_v31 = vpop.f32.mrb[173].mxu1  ;;  %3073 = vmatmul.mubr.f32.gmra.mrb[22].mxu1 %v13740_v36 }
 0x404   :  { %9181 = vmatprep.mubr.msk.f32.mxu1 %vm10096_vm3, %v13592_v39 }
 0x406   :  { %v12062_v56 = vpop.f32.mrb[174].mxu1 }
 0x407   :  { %v2816_v18 = vpop.f32.mrb[175].mxu1 }
 0x40a   :  { %v12064_v3 = vpop.f32.mrb[176].mxu1 }
 0x40b   :  { %v2821_v40 = vpop.f32.mrb[177].mxu1 }
 0x40e   :  { %v12066_v20 = vpop.f32.mrb[178].mxu1 }
 0x40f   :  { %v2826_v4 = vpop.f32.mrb[179].mxu1 }
 0x412   :  { %v12068_v22 = vpop.f32.mrb[180].mxu1 }
 0x413   :  { %v2831_v42 = vpop.f32.mrb[181].mxu1  ;;  %v3085_v32 = vrot.slane %v12068_v22, 1 }
 0x416   :  { %v2834_v41 = vpop.f32.mrb[182].mxu1 }
 0x417   :  { %v3086_v17 = vrot.slane %v2834_v41, 1  ;;  %v2836_v33 = vpop.f32.mrb[183].mxu1 }
 0x419   :  { %v3087_v47 = vsel %vm1496_vm7, %v3085_v32, %v3086_v17 }
 0x41a   :  { %v2839_v53 = vpop.f32.mrb[184].mxu1  ;;  %8998 = vmatmul.mubr.msk.f32.vlgmr.msra.gmra.mrb[170].mxu0 %vm1510_vm8, %v3087_v47 }
 0x41b   :  { %v3088_v26 = vrot.slane %v2839_v53, 1  ;;  %v2841_v5 = vpop.f32.mrb[185].mxu1  ;;  %9000 = vmatprep.mubr.msk.f32.mxu0 %vm10096_vm3, %v13592_v39  ;;  %9019 = vmatpush3.msra.mxu0 %v10063_v21 }
 0x41c   :  { %9041 = vmatprep.subr.mxu0 %v13592_v39 }
 0x41d   :  { %v3089_v30 = vsel %vm1496_vm7, %v3086_v17, %v3088_v26 }
 0x41e   :  { %v2844_v9 = vpop.f32.mrb[186].mxu1  ;;  %9001 = vmatmul.mubr.msk.f32.gmra.mrb[172].mxu0 %vm1510_vm8, %v3089_v30 }
 0x41f   :  { %v3090_v13 = vrot.slane %v2844_v9, 1  ;;  %v2846_v50 = vpop.f32.mrb[187].mxu1  ;;  %9003 = vmatprep.mubr.msk.f32.mxu0 %vm10096_vm3, %v13592_v39 }
 0x420   :  { %v10065_v50 = vld [vmem:[%s13365_s4 + $0x18] sm:$0xff] }
 0x421   :  { %v3091_v44 = vsel %vm1496_vm7, %v3088_v26, %v3090_v13 }
 0x422   :  { %v2849_v46 = vpop.f32.mrb[188].mxu1  ;;  %9004 = vmatmul.mubr.msk.f32.gmra.mrb[174].mxu0 %vm1510_vm8, %v3091_v44 }
 0x423   :  { %v3092_v15 = vrot.slane %v2849_v46, 1  ;;  %v2851_v38 = vpop.f32.mrb[189].mxu1  ;;  %9006 = vmatprep.mubr.msk.f32.mxu0 %vm10096_vm3, %v13592_v39 }
 0x425   :  { %v3093_v48 = vsel %vm1496_vm7, %v3090_v13, %v3092_v15 }
 0x426   :  { %v2854_v25 = vpop.f32.mrb[190].mxu1  ;;  %9007 = vmatmul.mubr.msk.f32.gmra.mrb[176].mxu0 %vm1510_vm8, %v3093_v48 }
 0x427   :  { %v3094_v37 = vrot.slane %v2854_v25, 1  ;;  %v2856_v58 = vpop.f32.mrb[191].mxu1  ;;  %9009 = vmatprep.mubr.msk.f32.mxu0 %vm10096_vm3, %v13592_v39 }
 0x429   :  { %v3095_v62 = vsel %vm1496_vm7, %v3092_v15, %v3094_v37 }
 0x42a   :  { %v2859_v60 = vpop.f32.mrb[192].mxu1  ;;  %9010 = vmatmul.mubr.msk.f32.gmra.mrb[178].mxu0 %vm1510_vm8, %v3095_v62 }
 0x42b   :  { %v3096_v1 = vrot.slane %v2859_v60, 1  ;;  %v2861_v28 = vpop.f32.mrb[193].mxu1  ;;  %9012 = vmatprep.mubr.msk.f32.mxu0 %vm10096_vm3, %v13592_v39  ;;  %v3338_v12 = vrot.slane %v2859_v60, 2 }
 0x42d   :  { %v3097_v19 = vsel %vm1496_vm7, %v3094_v37, %v3096_v1 }
 0x42e   :  { %v2864_v45 = vpop.f32.mrb[194].mxu1  ;;  %9013 = vmatmul.mubr.msk.f32.gmra.mrb[180].mxu0 %vm1510_vm8, %v3097_v19 }
 0x42f   :  { %v3339_v59 = vrot.slane %v2864_v45, 2  ;;  %9015 = vmatprep.mubr.msk.f32.mxu0 %vm10096_vm3, %v13592_v39  ;;  %v2866_v0 = vpop.f32.mrb[195].mxu1 }
 0x431   :  { %v3340_v52 = vsel %vm1751_vm9, %v3338_v12, %v3339_v59 }
 0x432   :  { %9016 = vmatmul.mubr.msk.f32.gmra.mrb[182].mxu0 %vm1510_vm8, %v3096_v1  ;;  %v2869_v43 = vpop.f32.mrb[196].mxu1 }
 0x433   :  { %9020 = vmatprep.mubr.msk.f32.mxu0 %vm10096_vm3, %v13592_v39  ;;  %v3341_v2 = vrot.slane %v2869_v43, 2  ;;  %v2871_v35 = vpop.f32.mrb[197].mxu1 }
 0x435   :  { %v3342_v8 = vsel %vm1751_vm9, %v3339_v59, %v3341_v2 }
 0x436   :  { %9021 = vmatmul.mubr.msk.f32.vlgmr.msra.gmra.mrb[184].mxu0 %vm1510_vm8, %v12042_v6  ;;  %v2874_v27 = vpop.f32.mrb[198].mxu1 }
 0x437   :  { %9023 = vmatprep.mubr.msk.f32.mxu0 %vm10096_vm3, %v13592_v39  ;;  %9042 = vmatpush3.msra.mxu0 %v10064_v16  ;;  %v3343_v10 = vrot.slane %v2874_v27, 2  ;;  %v2876_v11 = vpop.f32.mrb[199].mxu1 }
 0x438   :  { %9064 = vmatprep.subr.mxu0 %v13592_v39 }
 0x439   :  { %v3344_v34 = vsel %vm1751_vm9, %v3341_v2, %v3343_v10 }
 0x43a   :  { %9024 = vmatmul.mubr.msk.f32.gmra.mrb[186].mxu0 %vm1510_vm8, %v12049_v24  ;;  %v2879_v51 = vpop.f32.mrb[200].mxu1 }
 0x43b   :  { %9026 = vmatprep.mubr.msk.f32.mxu0 %vm10096_vm3, %v13592_v39  ;;  %v3345_v6 = vrot.slane %v2879_v51, 2  ;;  %v2881_v29 = vpop.f32.mrb[201].mxu1 }
 0x43d   :  { %v3346_v31 = vsel %vm1751_vm9, %v3343_v10, %v3345_v6 }
 0x43e   :  { %9027 = vmatmul.mubr.msk.f32.gmra.mrb[188].mxu0 %vm1510_vm8, %v12056_v14  ;;  %v2884_v36 = vpop.f32.mrb[202].mxu1 }
 0x43f   :  { %9029 = vmatprep.mubr.msk.f32.mxu0 %vm10096_vm3, %v13592_v39  ;;  %v3347_v18 = vrot.slane %v2884_v36, 2  ;;  %v2886_v40 = vpop.f32.mrb[203].mxu1 }
 0x441   :  { %v3348_v4 = vsel %vm1751_vm9, %v3345_v6, %v3347_v18  ;;  %v10066_v6 = vld [vmem:[%s13365_s4 + $0x20] sm:$0xff] }
 0x442   :  { %9030 = vmatmul.mubr.msk.f32.gmra.mrb[190].mxu0 %vm1510_vm8, %v12062_v56  ;;  %v12125_v24 = vpop.f32.mrb[204].mxu1 }
 0x443   :  { %9032 = vmatprep.mubr.msk.f32.mxu0 %vm10096_vm3, %v13592_v39  ;;  %v3349_v42 = vrot.slane %v12125_v24, 2  ;;  %v2891_v41 = vpop.f32.mrb[205].mxu1  ;;  %v3478_v14 = vrot.slane %v12125_v24, 3 }
 0x445   :  { %v3350_v32 = vsel %vm1751_vm9, %v3347_v18, %v3349_v42 }
 0x446   :  { %9033 = vmatmul.mubr.msk.f32.gmra.mrb[192].mxu0 %vm1510_vm8, %v12064_v3  ;;  %v2894_v17 = vpop.f32.mrb[206].mxu1 }
 0x447   :  { %9035 = vmatprep.mubr.msk.f32.mxu0 %vm10096_vm3, %v13592_v39  ;;  %v3479_v56 = vrot.slane %v2894_v17, 3  ;;  %v2896_v33 = vpop.f32.mrb[207].mxu1 }
 0x449   :  { %v3480_v47 = vsel %vm1892_vm10, %v3478_v14, %v3479_v56 }
 0x44a   :  { %9036 = vmatmul.mubr.msk.f32.gmra.mrb[194].mxu0 %vm1510_vm8, %v12066_v20  ;;  %v2899_v53 = vpop.f32.mrb[208].mxu1 }
 0x44b   :  { %9038 = vmatprep.mubr.msk.f32.mxu0 %vm10096_vm3, %v13592_v39  ;;  %v3481_v26 = vrot.slane %v2899_v53, 3  ;;  %v2901_v5 = vpop.f32.mrb[209].mxu1 }
 0x44d   :  { %v12144_v21 = vsel %vm1892_vm10, %v3479_v56, %v3481_v26 }
 0x44e   :  { %9039 = vmatmul.mubr.msk.f32.gmra.mrb[196].mxu0 %vm1510_vm8, %v12068_v22  ;;  %v2904_v3 = vpop.f32.mrb[210].mxu1 }
 0x44f   :  { %9043 = vmatprep.mubr.msk.f32.mxu0 %vm10096_vm3, %v13592_v39  ;;  %v3483_v30 = vrot.slane %v2904_v3, 3  ;;  %v2906_v9 = vpop.f32.mrb[211].mxu1 }
 0x451   :  { %v12151_v20 = vsel %vm1892_vm10, %v3481_v26, %v3483_v30 }
 0x452   :  { %9044 = vmatmul.mubr.msk.f32.vlgmr.msra.gmra.mrb[198].mxu0 %vm1510_vm8, %v3340_v52  ;;  %v2909_v13 = vpop.f32.mrb[212].mxu1 }
 0x453   :  { %9046 = vmatprep.mubr.msk.f32.mxu0 %vm10096_vm3, %v13592_v39  ;;  %9065 = vmatpush3.msra.mxu0 %v10065_v50  ;;  %v3485_v22 = vrot.slane %v2909_v13, 3  ;;  %v2911_v44 = vpop.f32.mrb[213].mxu1 }
 0x454   :  { %9087 = vmatprep.subr.mxu0 %v13592_v39 }
 0x455   :  { %v3486_v46 = vsel %vm1892_vm10, %v3483_v30, %v3485_v22 }
 0x456   :  { %9047 = vmatmul.mubr.msk.f32.gmra.mrb[200].mxu0 %vm1510_vm8, %v3342_v8  ;;  %v2914_v15 = vpop.f32.mrb[214].mxu1 }
 0x457   :  { %9049 = vmatprep.mubr.msk.f32.mxu0 %vm10096_vm3, %v13592_v39  ;;  %v3487_v38 = vrot.slane %v2914_v15, 3  ;;  %v2916_v48 = vpop.f32.mrb[215].mxu1 }
 0x459   :  { %v3488_v25 = vsel %vm1892_vm10, %v3485_v22, %v3487_v38 }
 0x45a   :  { %9050 = vmatmul.mubr.msk.f32.gmra.mrb[202].mxu0 %vm1510_vm8, %v3344_v34  ;;  %v12166_v37 = vpop.f32.mrb[216].mxu1 }
 0x45b   :  { %9052 = vmatprep.mubr.msk.f32.mxu0 %vm10096_vm3, %v13592_v39  ;;  %v3489_v58 = vrot.slane %v12166_v37, 3  ;;  %v2921_v62 = vpop.f32.mrb[217].mxu1  ;;  %v3618_v60 = vrot.slane %v12166_v37, 4 }
 0x45d   :  { %v3490_v1 = vsel %vm1892_vm10, %v3487_v38, %v3489_v58  ;;  %v10067_v38 = vld [vmem:[%s13365_s4 + $0x28] sm:$0xff] }
 0x45e   :  { %9053 = vmatmul.mubr.msk.f32.gmra.mrb[204].mxu0 %vm1510_vm8, %v3346_v31  ;;  %v2924_v28 = vpop.f32.mrb[218].mxu1 }
 0x45f   :  { %9055 = vmatprep.mubr.msk.f32.mxu0 %vm10096_vm3, %v13592_v39  ;;  %v3619_v19 = vrot.slane %v2924_v28, 4  ;;  %v2926_v45 = vpop.f32.mrb[219].mxu1 }
 0x461   :  { %v12179_v12 = vsel %vm1140_vm6, %v3618_v60, %v3619_v19 }
 0x462   :  { %9056 = vmatmul.mubr.msk.f32.gmra.mrb[206].mxu0 %vm1510_vm8, %v3348_v4  ;;  %v2929_v59 = vpop.f32.mrb[220].mxu1 }
 0x463   :  { %9058 = vmatprep.mubr.msk.f32.mxu0 %vm10096_vm3, %v13592_v39  ;;  %v3621_v0 = vrot.slane %v2929_v59, 4  ;;  %v2931_v52 = vpop.f32.mrb[221].mxu1 }
 0x465   :  { %v12185_v43 = vsel %vm1140_vm6, %v3619_v19, %v3621_v0 }
 0x466   :  { %9059 = vmatmul.mubr.msk.f32.gmra.mrb[208].mxu0 %vm1510_vm8, %v3350_v32  ;;  %v2934_v2 = vpop.f32.mrb[222].mxu1 }
 0x467   :  { %9061 = vmatprep.mubr.msk.f32.mxu0 %vm10096_vm3, %v13592_v39  ;;  %v3623_v35 = vrot.slane %v2934_v2, 4  ;;  %v2936_v8 = vpop.f32.mrb[223].mxu1 }
 0x469   :  { %v12191_v27 = vsel %vm1140_vm6, %v3621_v0, %v3623_v35 }
 0x46a   :  { %9062 = vmatmul.mubr.msk.f32.gmra.mrb[210].mxu0 %vm1510_vm8, %v3349_v42  ;;  %v2939_v16 = vpop.f32.mrb[224].mxu1 }
 0x46b   :  { %9066 = vmatprep.mubr.msk.f32.mxu0 %vm10096_vm3, %v13592_v39  ;;  %v3625_v10 = vrot.slane %v2939_v16, 4  ;;  %v2941_v11 = vpop.f32.mrb[225].mxu1 }
 0x46d   :  { %v12199_v34 = vsel %vm1140_vm6, %v3623_v35, %v3625_v10 }
 0x46e   :  { %9067 = vmatmul.mubr.msk.f32.vlgmr.msra.gmra.mrb[212].mxu0 %vm1510_vm8, %v3480_v47  ;;  %v2944_v51 = vpop.f32.mrb[226].mxu1 }
 0x46f   :  { %9069 = vmatprep.mubr.msk.f32.mxu0 %vm10096_vm3, %v13592_v39  ;;  %9088 = vmatpush3.msra.mxu0 %v10066_v6  ;;  %v3627_v29 = vrot.slane %v2944_v51, 4  ;;  %v2946_v31 = vpop.f32.mrb[227].mxu1 }
 0x470   :  { %9110 = vmatprep.subr.mxu0 %v13592_v39 }
 0x471   :  { %v12209_v36 = vsel %vm1140_vm6, %v3625_v10, %v3627_v29 }
 0x472   :  { %9070 = vmatmul.mubr.msk.f32.gmra.mrb[214].mxu0 %vm1510_vm8, %v12144_v21  ;;  %v12213_v18 = vpop.f32.mrb[228].mxu1 }
 0x473   :  { %9072 = vmatprep.mubr.msk.f32.mxu0 %vm10096_vm3, %v13592_v39  ;;  %v3629_v40 = vrot.slane %v12213_v18, 4  ;;  %v2951_v4 = vpop.f32.mrb[229].mxu1  ;;  %v3758_v24 = vrot.slane %v12213_v18, 5 }
 0x475   :  { %v12222_v42 = vsel %vm1140_vm6, %v3627_v29, %v3629_v40 }
 0x476   :  { %9073 = vmatmul.mubr.msk.f32.gmra.mrb[216].mxu0 %vm1510_vm8, %v12151_v20  ;;  %v2954_v41 = vpop.f32.mrb[230].mxu1 }
 0x477   :  { %9075 = vmatprep.mubr.msk.f32.mxu0 %vm10096_vm3, %v13592_v39  ;;  %v3759_v14 = vrot.slane %v2954_v41, 5  ;;  %v2956_v32 = vpop.f32.mrb[231].mxu1 }
 0x479   :  { %v12229_v17 = vsel %vm2173_vm11, %v3758_v24, %v3759_v14 }
 0x47a   :  { %9076 = vmatmul.mubr.msk.f32.gmra.mrb[218].mxu0 %vm1510_vm8, %v3486_v46  ;;  %v2959_v56 = vpop.f32.mrb[232].mxu1 }
 0x47b   :  { %9078 = vmatprep.mubr.msk.f32.mxu0 %vm10096_vm3, %v13592_v39  ;;  %v3761_v33 = vrot.slane %v2959_v56, 5  ;;  %v2961_v47 = vpop.f32.mrb[233].mxu1 }
 0x47d   :  { %v12235_v53 = vsel %vm2173_vm11, %v3759_v14, %v3761_v33 }
 0x47e   :  { %9079 = vmatmul.mubr.msk.f32.gmra.mrb[220].mxu0 %vm1510_vm8, %v3488_v25  ;;  %v2964_v26 = vpop.f32.mrb[234].mxu1 }
 0x47f   :  { %9081 = vmatprep.mubr.msk.f32.mxu0 %vm10096_vm3, %v13592_v39  ;;  %v3763_v5 = vrot.slane %v2964_v26, 5  ;;  %v2966_v21 = vpop.f32.mrb[235].mxu1 }
 0x481   :  { %v12241_v3 = vsel %vm2173_vm11, %v3761_v33, %v3763_v5 }
 0x482   :  { %9082 = vmatmul.mubr.msk.f32.gmra.mrb[222].mxu0 %vm1510_vm8, %v3490_v1  ;;  %v2969_v30 = vpop.f32.mrb[236].mxu1 }
 0x483   :  { %9084 = vmatprep.mubr.msk.f32.mxu0 %vm10096_vm3, %v13592_v39  ;;  %v3765_v9 = vrot.slane %v2969_v30, 5  ;;  %v2971_v20 = vpop.f32.mrb[237].mxu1 }
 0x485   :  { %v12247_v13 = vsel %vm2173_vm11, %v3763_v5, %v3765_v9 }
 0x486   :  { %9085 = vmatmul.mubr.msk.f32.gmra.mrb[224].mxu0 %vm1510_vm8, %v3489_v58  ;;  %v2974_v50 = vpop.f32.mrb[238].mxu1 }
 0x487   :  { %9089 = vmatprep.mubr.msk.f32.mxu0 %vm10096_vm3, %v13592_v39  ;;  %v3767_v22 = vrot.slane %v2974_v50, 5  ;;  %v2976_v44 = vpop.f32.mrb[239].mxu1 }
 0x489   :  { %v12255_v46 = vsel %vm2173_vm11, %v3765_v9, %v3767_v22 }
 0x48a   :  { %9090 = vmatmul.mubr.msk.f32.vlgmr.msra.gmra.mrb[226].mxu0 %vm1510_vm8, %v12179_v12  ;;  %v12259_v15 = vpop.f32.mrb[240].mxu1 }
 0x48b   :  { %9092 = vmatprep.mubr.msk.f32.mxu0 %vm10096_vm3, %v13592_v39  ;;  %9111 = vmatpush3.msra.mxu0 %v10067_v38  ;;  %v3769_v48 = vrot.slane %v12259_v15, 5  ;;  %v2981_v25 = vpop.f32.mrb[241].mxu1  ;;  %v3898_v37 = vrot.slane %v12259_v15, 6  ;;  %v10069_v15 = vld [vmem:[%s13365_s4 + $0x38] sm:$0xff] }
 0x48c   :  { %9133 = vmatprep.subr.mxu0 %v13592_v39 }
 0x48d   :  { %v12272_v58 = vsel %vm2173_vm11, %v3767_v22, %v3769_v48 }
 0x48e   :  { %9093 = vmatmul.mubr.msk.f32.gmra.mrb[228].mxu0 %vm1510_vm8, %v12185_v43  ;;  %v2984_v62 = vpop.f32.mrb[242].mxu1 }
 0x48f   :  { %9095 = vmatprep.mubr.msk.f32.mxu0 %vm10096_vm3, %v13592_v39  ;;  %v3899_v60 = vrot.slane %v2984_v62, 6  ;;  %v2986_v1 = vpop.f32.mrb[243].mxu1 }
 0x491   :  { %v12279_v28 = vsel %vm2314_vm12, %v3898_v37, %v3899_v60 }
 0x492   :  { %9096 = vmatmul.mubr.msk.f32.gmra.mrb[230].mxu0 %vm1510_vm8, %v12191_v27  ;;  %v2989_v19 = vpop.f32.mrb[244].mxu1 }
 0x493   :  { %9098 = vmatprep.mubr.msk.f32.mxu0 %vm10096_vm3, %v13592_v39  ;;  %v3901_v45 = vrot.slane %v2989_v19, 6  ;;  %v2991_v12 = vpop.f32.mrb[245].mxu1 }
 0x495   :  { %v12286_v59 = vsel %vm2314_vm12, %v3899_v60, %v3901_v45 }
 0x496   :  { %9099 = vmatmul.mubr.msk.f32.gmra.mrb[232].mxu0 %vm1510_vm8, %v12199_v34  ;;  %v2994_v0 = vpop.f32.mrb[246].mxu1 }
 0x497   :  { %9101 = vmatprep.mubr.msk.f32.mxu0 %vm10096_vm3, %v13592_v39  ;;  %v3903_v52 = vrot.slane %v2994_v0, 6  ;;  %v2996_v43 = vpop.f32.mrb[247].mxu1 }
 0x499   :  { %v12293_v2 = vsel %vm2314_vm12, %v3901_v45, %v3903_v52 }
 0x49a   :  { %9102 = vmatmul.mubr.msk.f32.gmra.mrb[234].mxu0 %vm1510_vm8, %v12209_v36  ;;  %v2999_v35 = vpop.f32.mrb[248].mxu1 }
 0x49b   :  { %9104 = vmatprep.mubr.msk.f32.mxu0 %vm10096_vm3, %v13592_v39  ;;  %v3905_v8 = vrot.slane %v2999_v35, 6  ;;  %v3001_v27 = vpop.f32.mrb[249].mxu1 }
 0x49d   :  { %v12300_v16 = vsel %vm2314_vm12, %v3903_v52, %v3905_v8 }
 0x49e   :  { %9105 = vmatmul.mubr.msk.f32.gmra.mrb[236].mxu0 %vm1510_vm8, %v12222_v42  ;;  %v3004_v10 = vpop.f32.mrb[250].mxu1 }
 0x49f   :  { %9107 = vmatprep.mubr.msk.f32.mxu0 %vm10096_vm3, %v13592_v39  ;;  %v3907_v11 = vrot.slane %v3004_v10, 6  ;;  %v3006_v34 = vpop.f32.mrb[251].mxu1 }
 0x4a1   :  { %v12307_v51 = vsel %vm2314_vm12, %v3905_v8, %v3907_v11 }
 0x4a2   :  { %9108 = vmatmul.mubr.msk.f32.gmra.mrb[238].mxu0 %vm1510_vm8, %v3629_v40  ;;  %v12312_v6 = vpop.f32.mrb[252].mxu1  ;;  %v10068_v40 = vld [vmem:[%s13365_s4 + $0x30] sm:$0xff] }
 0x4a3   :  { %9112 = vmatprep.mubr.msk.f32.mxu0 %vm10096_vm3, %v13592_v39  ;;  %v3909_v29 = vrot.slane %v12312_v6, 6  ;;  %v3011_v31 = vpop.f32.mrb[253].mxu1  ;;  %v4038_v4 = vrot.slane %v12312_v6, 7 }
 0x4a5   :  { %v12320_v36 = vsel %vm2314_vm12, %v3907_v11, %v3909_v29 }
 0x4a6   :  { %9113 = vmatmul.mubr.msk.f32.vlgmr.msra.gmra.mrb[240].mxu0 %vm1510_vm8, %v12229_v17  ;;  %v3014_v18 = vpop.f32.mrb[254].mxu1 }
 0x4a7   :  { %9115 = vmatprep.mubr.msk.f32.mxu0 %vm10096_vm3, %v13592_v39  ;;  %9134 = vmatpush3.msra.mxu0 %v10068_v40  ;;  %v4039_v24 = vrot.slane %v3014_v18, 7  ;;  %v3016_v42 = vpop.f32.mrb[255].mxu1 }
 0x4a8   :  { %9156 = vmatprep.subr.mxu0 %v13592_v39 }
 0x4a9   :  { %v12332_v41 = vsel %vm436_vm0, %v4038_v4, %v4039_v24 }
 0x4aa   :  { %9116 = vmatmul.mubr.msk.f32.gmra.mrb[242].mxu0 %vm1510_vm8, %v12235_v53  ;;  %v3019_v14 = vpop.f32.mrb[0].mxu1 }
 0x4ab   :  { %9118 = vmatprep.mubr.msk.f32.mxu0 %vm10096_vm3, %v13592_v39  ;;  %v4041_v32 = vrot.slane %v3019_v14, 7  ;;  %v3021_v17 = vpop.f32.mrb[1].mxu1 }
 0x4ad   :  { %v12339_v56 = vsel %vm436_vm0, %v4039_v24, %v4041_v32 }
 0x4ae   :  { %9119 = vmatmul.mubr.msk.f32.gmra.mrb[244].mxu0 %vm1510_vm8, %v12241_v3  ;;  %v3024_v33 = vpop.f32.mrb[2].mxu1 }
 0x4af   :  { %9121 = vmatprep.mubr.msk.f32.mxu0 %vm10096_vm3, %v13592_v39  ;;  %v4043_v47 = vrot.slane %v3024_v33, 7  ;;  %v3026_v26 = vpop.f32.mrb[3].mxu1 }
 0x4b1   :  { %v12346_v53 = vsel %vm436_vm0, %v4041_v32, %v4043_v47 }
 0x4b2   :  { %9122 = vmatmul.mubr.msk.f32.gmra.mrb[246].mxu0 %vm1510_vm8, %v12247_v13  ;;  %v3029_v5 = vpop.f32.mrb[4].mxu1 }
 0x4b3   :  { %9124 = vmatprep.mubr.msk.f32.mxu0 %vm10096_vm3, %v13592_v39  ;;  %v4045_v21 = vrot.slane %v3029_v5, 7  ;;  %v3031_v30 = vpop.f32.mrb[5].mxu1 }
 0x4b5   :  { %v12353_v3 = vsel %vm436_vm0, %v4043_v47, %v4045_v21 }
 0x4b6   :  { %9125 = vmatmul.mubr.msk.f32.gmra.mrb[248].mxu0 %vm1510_vm8, %v12255_v46  ;;  %v3034_v9 = vpop.f32.mrb[6].mxu1 }
 0x4b7   :  { %9127 = vmatprep.mubr.msk.f32.mxu0 %vm10096_vm3, %v13592_v39  ;;  %v4047_v20 = vrot.slane %v3034_v9, 7  ;;  %v3036_v50 = vpop.f32.mrb[7].mxu1 }
 0x4b9   :  { %v12360_v13 = vsel %vm436_vm0, %v4045_v21, %v4047_v20 }
 0x4ba   :  { %9128 = vmatmul.mubr.msk.f32.gmra.mrb[250].mxu0 %vm1510_vm8, %v12272_v58  ;;  %v12364_v22 = vpop.f32.mrb[8].mxu1 }
 0x4bb   :  { %9130 = vmatprep.mubr.msk.f32.mxu0 %vm10096_vm3, %v13592_v39  ;;  %v4049_v44 = vrot.slane %v12364_v22, 7  ;;  %v3041_v46 = vpop.f32.mrb[9].mxu1 }
 0x4bd   :  { %v4050_v38 = vsel %vm436_vm0, %v4047_v20, %v4049_v44 }
 0x4be   :  { %9131 = vmatmul.mubr.msk.f32.gmra.mrb[252].mxu0 %vm1510_vm8, %v3769_v48  ;;  %v3044_v25 = vpop.f32.mrb[10].mxu1 }
 0x4bf   :  { %9135 = vmatprep.mubr.msk.f32.mxu0 %vm10096_vm3, %v13592_v39  ;;  %v3046_v37 = vpop.f32.mrb[11].mxu1  ;;  %9182 = vmatmul.mubr.msk.f32.vlgmr.msra.gmra.mrb[24].mxu1 %vm1510_vm8, %v3044_v25 }
 0x4c0   :  { %9184 = vmatprep.mubr.msk.f32.mxu1 %vm10096_vm3, %v13592_v39 }
 0x4c2   :  { %9136 = vmatmul.mubr.msk.f32.vlgmr.msra.gmra.mrb[254].mxu0 %vm1510_vm8, %v12279_v28  ;;  %v3049_v58 = vpop.f32.mrb[12].mxu1 }
 0x4c3   :  { %9138 = vmatprep.mubr.msk.f32.mxu0 %vm10096_vm3, %v13592_v39  ;;  %9157 = vmatpush3.msra.mxu0 %v10069_v15  ;;  %v3051_v48 = vpop.f32.mrb[13].mxu1 }
 0x4c4   :  { %9185 = vmatmul.mubr.msk.f32.gmra.mrb[26].mxu1 %vm1510_vm8, %v3049_v58  ;;  %9770 = vmatprep.subr.bf16.mxu0 %v13596_v63 }
 0x4c5   :  { %9187 = vmatprep.mubr.msk.f32.mxu1 %vm10096_vm3, %v13592_v39 }
 0x4c6   :  { %9139 = vmatmul.mubr.msk.f32.gmra.mrb[0].mxu0 %vm1510_vm8, %v12286_v59  ;;  %v3054_v62 = vpop.f32.mrb[14].mxu1 }
 0x4c7   :  { %9141 = vmatprep.mubr.msk.f32.mxu0 %vm10096_vm3, %v13592_v39  ;;  %v3056_v60 = vpop.f32.mrb[15].mxu1 }
 0x4c8   :  { %9188 = vmatmul.mubr.msk.f32.gmra.mrb[28].mxu1 %vm1510_vm8, %v3054_v62 }
 0x4c9   :  { %9190 = vmatprep.mubr.msk.f32.mxu1 %vm10096_vm3, %v13592_v39 }
 0x4ca   :  { %9142 = vmatmul.mubr.msk.f32.gmra.mrb[2].mxu0 %vm1510_vm8, %v12293_v2  ;;  %v3059_v1 = vpop.f32.mrb[16].mxu1 }
 0x4cb   :  { %9144 = vmatprep.mubr.msk.f32.mxu0 %vm10096_vm3, %v13592_v39  ;;  %v3061_v28 = vpop.f32.mrb[17].mxu1 }
 0x4cc   :  { %9191 = vmatmul.mubr.msk.f32.gmra.mrb[30].mxu1 %vm1510_vm8, %v3059_v1 }
 0x4cd   :  { %9193 = vmatprep.mubr.msk.f32.mxu1 %vm10096_vm3, %v13592_v39 }
 0x4ce   :  { %9145 = vmatmul.mubr.msk.f32.gmra.mrb[4].mxu0 %vm1510_vm8, %v12300_v16  ;;  %v3064_v19 = vpop.f32.mrb[18].mxu1 }
 0x4cf   :  { %9147 = vmatprep.mubr.msk.f32.mxu0 %vm10096_vm3, %v13592_v39  ;;  %v3066_v45 = vpop.f32.mrb[19].mxu1 }
 0x4d0   :  { %9194 = vmatmul.mubr.msk.f32.gmra.mrb[32].mxu1 %vm1510_vm8, %v3064_v19 }
 0x4d1   :  { %9196 = vmatprep.mubr.msk.f32.mxu1 %vm10096_vm3, %v13592_v39 }
 0x4d2   :  { %9148 = vmatmul.mubr.msk.f32.gmra.mrb[6].mxu0 %vm1510_vm8, %v12307_v51  ;;  %v3069_v12 = vpop.f32.mrb[20].mxu1 }
 0x4d3   :  { %9150 = vmatprep.mubr.msk.f32.mxu0 %vm10096_vm3, %v13592_v39  ;;  %v3071_v59 = vpop.f32.mrb[21].mxu1 }
 0x4d4   :  { %9197 = vmatmul.mubr.msk.f32.gmra.mrb[34].mxu1 %vm1510_vm8, %v3069_v12 }
 0x4d5   :  { %9199 = vmatprep.mubr.msk.f32.mxu1 %vm10096_vm3, %v13592_v39 }
 0x4d6   :  { %9151 = vmatmul.mubr.msk.f32.gmra.mrb[8].mxu0 %vm1510_vm8, %v12320_v36  ;;  %v3074_v0 = vpop.f32.mrb[22].mxu1 }
 0x4d7   :  { %9153 = vmatprep.mubr.msk.f32.mxu0 %vm10096_vm3, %v13592_v39  ;;  %v3076_v52 = vpop.f32.mrb[23].mxu1 }
 0x4d8   :  { %9200 = vmatmul.mubr.msk.f32.gmra.mrb[36].mxu1 %vm1510_vm8, %v3074_v0 }
 0x4da   :  { %9154 = vmatmul.mubr.msk.f32.gmra.mrb[10].mxu0 %vm1510_vm8, %v3909_v29 }
 0x4db   :  { %9158 = vmatprep.mubr.msk.f32.mxu0 %vm10096_vm3, %v13592_v39 }
 0x4de   :  { %9159 = vmatmul.mubr.msk.f32.vlgmr.msra.gmra.mrb[12].mxu0 %vm1510_vm8, %v12332_v41 }
 0x4df   :  { %9161 = vmatprep.mubr.msk.f32.mxu0 %vm10096_vm3, %v13592_v39 }
 0x4e2   :  { %9162 = vmatmul.mubr.msk.f32.gmra.mrb[14].mxu0 %vm1510_vm8, %v12339_v56 }
 0x4e3   :  { %9164 = vmatprep.mubr.msk.f32.mxu0 %vm10096_vm3, %v13592_v39 }
 0x4e6   :  { %9165 = vmatmul.mubr.msk.f32.gmra.mrb[16].mxu0 %vm1510_vm8, %v12346_v53 }
 0x4e7   :  { %9167 = vmatprep.mubr.msk.f32.mxu0 %vm10096_vm3, %v13592_v39 }
 0x4ea   :  { %9168 = vmatmul.mubr.msk.f32.gmra.mrb[18].mxu0 %vm1510_vm8, %v12353_v3 }
 0x4eb   :  { %9170 = vmatprep.mubr.msk.f32.mxu0 %vm10096_vm3, %v13592_v39 }
 0x4ed   :  { %v3178_v43 = vpop.f32.mrb[170].mxu0 }
 0x4ee   :  { %v8999_v2 = vpop.f32.mrb[171].mxu0  ;;  %9171 = vmatmul.mubr.msk.f32.gmra.mrb[20].mxu0 %vm1510_vm8, %v12360_v13 }
 0x4ef   :  { %9173 = vmatprep.mubr.msk.f32.mxu0 %vm10096_vm3, %v13592_v39 }
 0x4f1   :  { %v3183_v35 = vpop.f32.mrb[172].mxu0 }
 0x4f2   :  { %v9002_v8 = vpop.f32.mrb[173].mxu0  ;;  %9174 = vmatmul.mubr.msk.f32.gmra.mrb[22].mxu0 %vm1510_vm8, %v4050_v38 }
 0x4f3   :  { %9176 = vmatprep.mubr.msk.f32.mxu0 %vm10096_vm3, %v13592_v39 }
 0x4f5   :  { %v3188_v27 = vpop.f32.mrb[174].mxu0 }
 0x4f6   :  { %v9005_v16 = vpop.f32.mrb[175].mxu0  ;;  %9177 = vmatmul.mubr.msk.f32.gmra.mrb[24].mxu0 %vm1510_vm8, %v4049_v44 }
 0x4f7   :  { %9216 = vmatprep.mubr.msk.f32.mxu0 %vm10096_vm3, %v13592_v39 }
 0x4f9   :  { %v3193_v10 = vpop.f32.mrb[176].mxu0 }
 0x4fa   :  { %v9008_v11 = vpop.f32.mrb[177].mxu0 }
 0x4fd   :  { %v3198_v34 = vpop.f32.mrb[178].mxu0 }
 0x4fe   :  { %v9011_v51 = vpop.f32.mrb[179].mxu0 }
 0x501   :  { %v3203_v6 = vpop.f32.mrb[180].mxu0 }
 0x502   :  { %v9014_v29 = vpop.f32.mrb[181].mxu0 }
 0x505   :  { %v3208_v31 = vpop.f32.mrb[182].mxu0 }
 0x506   :  { %v9017_v36 = vpop.f32.mrb[183].mxu0 }
 0x509   :  { %v3298_v4 = vpop.f32.mrb[184].mxu0 }
 0x50a   :  { %v3299_v18 = vadd.f32 %v3298_v4, %v3178_v43  ;;  %v9022_v40 = vpop.f32.mrb[185].mxu0 }
 0x50d   :  { %v3303_v24 = vpop.f32.mrb[186].mxu0 }
 0x50e   :  { %v3304_v42 = vadd.f32 %v3303_v24, %v3183_v35  ;;  %v9025_v41 = vpop.f32.mrb[187].mxu0 }
 0x511   :  { %v3308_v14 = vpop.f32.mrb[188].mxu0 }
 0x512   :  { %v3309_v32 = vadd.f32 %v3308_v14, %v3188_v27  ;;  %v9028_v17 = vpop.f32.mrb[189].mxu0 }
 0x515   :  { %v3313_v56 = vpop.f32.mrb[190].mxu0 }
 0x516   :  { %v3314_v33 = vadd.f32 %v3313_v56, %v3193_v10  ;;  %v9031_v47 = vpop.f32.mrb[191].mxu0 }
 0x519   :  { %v3318_v26 = vpop.f32.mrb[192].mxu0 }
 0x51a   :  { %v3319_v53 = vadd.f32 %v3318_v26, %v3198_v34  ;;  %v9034_v5 = vpop.f32.mrb[193].mxu0 }
 0x51d   :  { %v3323_v21 = vpop.f32.mrb[194].mxu0 }
 0x51e   :  { %v3324_v30 = vadd.f32 %v3323_v21, %v3203_v6  ;;  %v9037_v3 = vpop.f32.mrb[195].mxu0 }
 0x521   :  { %v3328_v9 = vpop.f32.mrb[196].mxu0 }
 0x522   :  { %v3329_v20 = vadd.f32 %v3328_v9, %v3208_v31  ;;  %v9040_v50 = vpop.f32.mrb[197].mxu0 }
 0x525   :  { %v3431_v13 = vpop.f32.mrb[198].mxu0 }
 0x526   :  { %v3465_v22 = vadd.f32 %v3431_v13, %v3299_v18  ;;  %v9045_v44 = vpop.f32.mrb[199].mxu0 }
 0x529   :  { %v3436_v46 = vpop.f32.mrb[200].mxu0 }
 0x52a   :  { %v3466_v38 = vadd.f32 %v3436_v46, %v3304_v42  ;;  %v9048_v25 = vpop.f32.mrb[201].mxu0 }
 0x52d   :  { %v3441_v37 = vpop.f32.mrb[202].mxu0 }
 0x52e   :  { %v3467_v58 = vadd.f32 %v3441_v37, %v3309_v32  ;;  %v9051_v15 = vpop.f32.mrb[203].mxu0 }
 0x531   :  { %v3446_v48 = vpop.f32.mrb[204].mxu0 }
 0x532   :  { %v3468_v62 = vadd.f32 %v3446_v48, %v3314_v33  ;;  %v9054_v60 = vpop.f32.mrb[205].mxu0 }
 0x535   :  { %v3451_v1 = vpop.f32.mrb[206].mxu0 }
 0x536   :  { %v3469_v28 = vadd.f32 %v3451_v1, %v3319_v53  ;;  %v9057_v19 = vpop.f32.mrb[207].mxu0 }
 0x539   :  { %v3456_v45 = vpop.f32.mrb[208].mxu0 }
 0x53a   :  { %v3470_v12 = vadd.f32 %v3456_v45, %v3324_v30  ;;  %v9060_v59 = vpop.f32.mrb[209].mxu0 }
 0x53d   :  { %v3461_v0 = vpop.f32.mrb[210].mxu0 }
 0x53e   :  { %v3471_v52 = vadd.f32 %v3461_v0, %v3329_v20  ;;  %v9063_v43 = vpop.f32.mrb[211].mxu0 }
 0x541   :  { %v3571_v2 = vpop.f32.mrb[212].mxu0 }
 0x542   :  { %v3605_v35 = vadd.f32 %v3571_v2, %v3465_v22  ;;  %v9068_v8 = vpop.f32.mrb[213].mxu0 }
 0x545   :  { %v3576_v27 = vpop.f32.mrb[214].mxu0 }
 0x546   :  { %v3606_v16 = vadd.f32 %v3576_v27, %v3466_v38  ;;  %v9071_v10 = vpop.f32.mrb[215].mxu0 }
 0x549   :  { %v3581_v11 = vpop.f32.mrb[216].mxu0 }
 0x54a   :  { %v3607_v34 = vadd.f32 %v3581_v11, %v3467_v58  ;;  %v9074_v51 = vpop.f32.mrb[217].mxu0 }
 0x54d   :  { %v3586_v6 = vpop.f32.mrb[218].mxu0 }
 0x54e   :  { %v3608_v29 = vadd.f32 %v3586_v6, %v3468_v62  ;;  %v9077_v31 = vpop.f32.mrb[219].mxu0 }
 0x551   :  { %v3591_v36 = vpop.f32.mrb[220].mxu0 }
 0x552   :  { %v3609_v4 = vadd.f32 %v3591_v36, %v3469_v28  ;;  %v9080_v18 = vpop.f32.mrb[221].mxu0 }
 0x555   :  { %v3596_v40 = vpop.f32.mrb[222].mxu0 }
 0x556   :  { %v3610_v24 = vadd.f32 %v3596_v40, %v3470_v12  ;;  %v9083_v42 = vpop.f32.mrb[223].mxu0 }
 0x559   :  { %v3601_v41 = vpop.f32.mrb[224].mxu0 }
 0x55a   :  { %v3611_v14 = vadd.f32 %v3601_v41, %v3471_v52  ;;  %v9086_v32 = vpop.f32.mrb[225].mxu0 }
 0x55d   :  { %v3711_v17 = vpop.f32.mrb[226].mxu0 }
 0x55e   :  { %v3745_v56 = vadd.f32 %v3711_v17, %v3605_v35  ;;  %v9091_v33 = vpop.f32.mrb[227].mxu0 }
 0x561   :  { %v3716_v47 = vpop.f32.mrb[228].mxu0 }
 0x562   :  { %v3746_v26 = vadd.f32 %v3716_v47, %v3606_v16  ;;  %v9094_v53 = vpop.f32.mrb[229].mxu0 }
 0x565   :  { %v3721_v5 = vpop.f32.mrb[230].mxu0 }
 0x566   :  { %v3747_v21 = vadd.f32 %v3721_v5, %v3607_v34  ;;  %v9097_v30 = vpop.f32.mrb[231].mxu0 }
 0x569   :  { %v3726_v3 = vpop.f32.mrb[232].mxu0 }
 0x56a   :  { %v3748_v9 = vadd.f32 %v3726_v3, %v3608_v29  ;;  %v9100_v20 = vpop.f32.mrb[233].mxu0 }
 0x56d   :  { %v3731_v50 = vpop.f32.mrb[234].mxu0 }
 0x56e   :  { %v3749_v13 = vadd.f32 %v3731_v50, %v3609_v4  ;;  %v9103_v22 = vpop.f32.mrb[235].mxu0 }
 0x571   :  { %v3736_v44 = vpop.f32.mrb[236].mxu0 }
 0x572   :  { %v3750_v46 = vadd.f32 %v3736_v44, %v3610_v24  ;;  %v9106_v38 = vpop.f32.mrb[237].mxu0 }
 0x575   :  { %v3741_v25 = vpop.f32.mrb[238].mxu0 }
 0x576   :  { %v3751_v37 = vadd.f32 %v3741_v25, %v3611_v14  ;;  %v9109_v58 = vpop.f32.mrb[239].mxu0 }
 0x579   :  { %v3851_v15 = vpop.f32.mrb[240].mxu0 }
 0x57a   :  { %v3885_v48 = vadd.f32 %v3851_v15, %v3745_v56  ;;  %v9114_v62 = vpop.f32.mrb[241].mxu0 }
 0x57d   :  { %v3856_v60 = vpop.f32.mrb[242].mxu0 }
 0x57e   :  { %v3886_v1 = vadd.f32 %v3856_v60, %v3746_v26  ;;  %v9117_v28 = vpop.f32.mrb[243].mxu0 }
 0x581   :  { %v3861_v19 = vpop.f32.mrb[244].mxu0 }
 0x582   :  { %v3887_v45 = vadd.f32 %v3861_v19, %v3747_v21  ;;  %v9120_v12 = vpop.f32.mrb[245].mxu0 }
 0x585   :  { %v3866_v59 = vpop.f32.mrb[246].mxu0 }
 0x586   :  { %v3888_v0 = vadd.f32 %v3866_v59, %v3748_v9  ;;  %v9123_v52 = vpop.f32.mrb[247].mxu0 }
 0x589   :  { %v3871_v43 = vpop.f32.mrb[248].mxu0 }
 0x58a   :  { %v3889_v2 = vadd.f32 %v3871_v43, %v3749_v13  ;;  %v9126_v35 = vpop.f32.mrb[249].mxu0 }
 0x58d   :  { %v3876_v8 = vpop.f32.mrb[250].mxu0 }
 0x58e   :  { %v3890_v27 = vadd.f32 %v3876_v8, %v3750_v46  ;;  %v9129_v16 = vpop.f32.mrb[251].mxu0 }
 0x591   :  { %v3881_v10 = vpop.f32.mrb[252].mxu0 }
 0x592   :  { %v3891_v11 = vadd.f32 %v3881_v10, %v3751_v37  ;;  %v9132_v34 = vpop.f32.mrb[253].mxu0  ;;  %v4259_v51 = vpop.f32.mrb[24].mxu1 }
 0x593   :  { %v9183_v6 = vpop.f32.mrb[25].mxu1 }
 0x595   :  { %v3991_v29 = vpop.f32.mrb[254].mxu0 }
 0x596   :  { %v4025_v31 = vadd.f32 %v3991_v29, %v3885_v48  ;;  %v9137_v36 = vpop.f32.mrb[255].mxu0 }
 0x597   :  { %v4264_v4 = vpop.f32.mrb[26].mxu1 }
 0x598   :  { %v9186_v18 = vpop.f32.mrb[27].mxu1 }
 0x599   :  { %v3996_v40 = vpop.f32.mrb[0].mxu0 }
 0x59a   :  { %v4026_v24 = vadd.f32 %v3996_v40, %v3886_v1  ;;  %v9140_v42 = vpop.f32.mrb[1].mxu0  ;;  %v12466_v1 = vld [vmem:[%s13366_s5] ss:$0 sm:$0xff] }
 0x59b   :  { %v4269_v41 = vpop.f32.mrb[28].mxu1  ;;  %v12470_v28 = vadd.f32 %v12466_v1, %v11975_v49  ;;  %v12474_v12 = vadd.f32 %v12466_v1, %v11968_v61  ;;  %v12478_v59 = vadd.f32 %v12466_v1, %v11982_v54  ;;  %v12484_v49 = vadd.f32 %v12466_v1, %v11989_v7 }
 0x59c   :  { %v9189_v14 = vpop.f32.mrb[29].mxu1  ;;  %v12492_v54 = vadd.f32 %v12466_v1, %v11996_v57  ;;  %v12498_v7 = vadd.f32 %v12466_v1, %v12003_v23  ;;  %v12504_v57 = vadd.f32 %v12466_v1, %v12010_v55 }
 0x59d   :  { %v4001_v32 = vpop.f32.mrb[2].mxu0  ;;  %v4309_v43 = vsel %vm4307_vm13, %v12470_v28, 0.0  ;;  %v4308_v61 = vsel %vm4307_vm13, %v12474_v12, 0.0  ;;  %v4311_v8 = vsel %vm4307_vm13, %v12478_v59, 0.0 }
 0x59e   :  { %v4027_v17 = vadd.f32 %v4001_v32, %v3887_v45  ;;  %v9143_v56 = vpop.f32.mrb[3].mxu0  ;;  %v4310_v10 = vadd.f32 %v4309_v43, %v4308_v61  ;;  %v4315_v29 = vsel %vm4307_vm13, %v12492_v54, 0.0  ;;  %v4317_v18 = vsel %vm4307_vm13, %v12498_v7, 0.0 }
 0x59f   :  { %v4274_v33 = vpop.f32.mrb[30].mxu1 }
 0x5a0   :  { %v9192_v47 = vpop.f32.mrb[31].mxu1 }
 0x5a1   :  { %v4006_v26 = vpop.f32.mrb[4].mxu0 }
 0x5a2   :  { %v4028_v53 = vadd.f32 %v4006_v26, %v3888_v0  ;;  %v9146_v5 = vpop.f32.mrb[5].mxu0 }
 0x5a3   :  { %v4279_v21 = vpop.f32.mrb[32].mxu1 }
 0x5a4   :  { %v9195_v30 = vpop.f32.mrb[33].mxu1 }
 0x5a5   :  { %v4011_v3 = vpop.f32.mrb[6].mxu0 }
 0x5a6   :  { %v4029_v9 = vadd.f32 %v4011_v3, %v3889_v2  ;;  %v9149_v20 = vpop.f32.mrb[7].mxu0 }
 0x5a7   :  { %v12457_v50 = vpop.f32.mrb[34].mxu1 }
 0x5a8   :  { %v9198_v13 = vpop.f32.mrb[35].mxu1 }
 0x5a9   :  { %v4016_v22 = vpop.f32.mrb[8].mxu0 }
 0x5aa   :  { %v4030_v44 = vadd.f32 %v4016_v22, %v3890_v27  ;;  %v9152_v46 = vpop.f32.mrb[9].mxu0 }
 0x5ab   :  { %v12459_v38 = vpop.f32.mrb[36].mxu1 }
 0x5ac   :  { %v9201_v25 = vpop.f32.mrb[37].mxu1 }
 0x5ad   :  { %v4021_v37 = vpop.f32.mrb[10].mxu0 }
 0x5ae   :  { %v12461_v58 = vadd.f32 %v4021_v37, %v3891_v11  ;;  %v9155_v15 = vpop.f32.mrb[11].mxu0  ;;  %v4313_v11 = vsel %vm4307_vm13, %v12484_v49, 0.0 }
 0x5b1   :  { %v4131_v48 = vpop.f32.mrb[12].mxu0 }
 0x5b2   :  { %v4165_v62 = vadd.f32 %v4131_v48, %v4025_v31  ;;  %v9160_v60 = vpop.f32.mrb[13].mxu0 }
 0x5b4   :  { %v4293_v19 = vadd.f32 %v4259_v51, %v4165_v62  ;;  %v4312_v51 = vadd.f32 %v4311_v8, %v4310_v10 }
 0x5b5   :  { %v4136_v45 = vpop.f32.mrb[14].mxu0 }
 0x5b6   :  { %v4166_v0 = vadd.f32 %v4136_v45, %v4026_v24  ;;  %v9163_v52 = vpop.f32.mrb[15].mxu0  ;;  %v12514_v14 = vadd.f32 %v12466_v1, %v4293_v19 }
 0x5b8   :  { %v4294_v2 = vadd.f32 %v4264_v4, %v4166_v0  ;;  %v4314_v4 = vadd.f32 %v4313_v11, %v4312_v51  ;;  %v4329_v30 = vsel %vm4307_vm13, %v12514_v14, 0.0 }
 0x5b9   :  { %v4141_v35 = vpop.f32.mrb[16].mxu0 }
 0x5ba   :  { %v4167_v27 = vadd.f32 %v4141_v35, %v4027_v17  ;;  %v9166_v16 = vpop.f32.mrb[17].mxu0  ;;  %v12509_v23 = vadd.f32 %v12466_v1, %v4294_v2  ;;  %v4316_v24 = vadd.f32 %v4315_v29, %v4314_v4 }
 0x5bc   :  { %v4295_v34 = vadd.f32 %v4269_v41, %v4167_v27  ;;  %v4320_v41 = vsel %vm4319_vm14, %v12504_v57, 0.0  ;;  %v4318_v56 = vadd.f32 %v4317_v18, %v4316_v24  ;;  %v4330_v47 = vsel %vm4307_vm13, %v12509_v23, 0.0 }
 0x5bd   :  { %v4146_v6 = vpop.f32.mrb[18].mxu0  ;;  %v4331_v22 = vadd.f32 %v4330_v47, %v4329_v30 }
 0x5be   :  { %v4168_v31 = vadd.f32 %v4146_v6, %v4028_v53  ;;  %v9169_v36 = vpop.f32.mrb[19].mxu0  ;;  %v12517_v55 = vadd.f32 %v12466_v1, %v4295_v34  ;;  %v4321_v53 = vadd.f32 %v4320_v41, %v4318_v56 }
 0x5c0   :  { %v4296_v40 = vadd.f32 %v4274_v33, %v4168_v31  ;;  %v4332_v3 = vsel %vm4307_vm13, %v12517_v55, 0.0 }
 0x5c1   :  { %v4151_v42 = vpop.f32.mrb[20].mxu0  ;;  %v4333_v37 = vadd.f32 %v4332_v3, %v4331_v22 }
 0x5c2   :  { %v4169_v32 = vadd.f32 %v4151_v42, %v4029_v9  ;;  %v9172_v17 = vpop.f32.mrb[21].mxu0  ;;  %v12522_v26 = vadd.f32 %v12466_v1, %v4296_v40 }
 0x5c4   :  { %v4297_v33 = vadd.f32 %v4279_v21, %v4169_v32  ;;  %v4334_v46 = vsel %vm4307_vm13, %v12522_v26, 0.0  ;;  %v4322_v21 = vrot.slane %v4321_v53, 4 }
 0x5c5   :  { %v4156_v5 = vpop.f32.mrb[22].mxu0 }
 0x5c6   :  { %v12529_v20 = vadd.f32 %v12466_v1, %v4297_v33  ;;  %v4170_v9 = vadd.f32 %v4156_v5, %v4030_v44  ;;  %v9175_v13 = vpop.f32.mrb[23].mxu0  ;;  %v4335_v44 = vadd.f32 %v4334_v46, %v4333_v37  ;;  %v4323_v52 = vadd.f32 %v4322_v21, %v4321_v53 }
 0x5c8   :  { %v4298_v25 = vadd.f32 %v12457_v50, %v4170_v9  ;;  %v4336_v48 = vsel %vm4307_vm13, %v12529_v20, 0.0  ;;  %v4324_v61 = vrot.slane %v4323_v52, 2 }
 0x5c9   :  { %v4161_v15 = vpop.f32.mrb[24].mxu0  ;;  %v4337_v50 = vadd.f32 %v4336_v48, %v4335_v44 }
 0x5ca   :  { %v12537_v62 = vadd.f32 %v12466_v1, %v4298_v25  ;;  %v4171_v60 = vadd.f32 %v4161_v15, %v12461_v58  ;;  %v9178_v19 = vpop.f32.mrb[25].mxu0  ;;  %v4325_v58 = vadd.f32 %v4324_v61, %v4323_v52 }
 0x5cc   :  { %v4338_v45 = vsel %vm4307_vm13, %v12537_v62, 0.0  ;;  %v4299_v0 = vadd.f32 %v12459_v38, %v4171_v60  ;;  %v4326_v11 = vrot.slane %v4325_v58, 1  ;;  %v64_v38 = vld [vmem:[%s13370_s9 + $0x10] sm:$0xff] }
 0x5cd   :  { %v4339_v2 = vadd.f32 %v4338_v45, %v4337_v50 }
 0x5ce   :  { %v12544_v43 = vadd.f32 %v12466_v1, %v4299_v0  ;;  %v65_v1 = vld [vmem:[%s13370_s9 + $0x18] sm:$0xff]  ;;  %v4327_v29 = vadd.f32 %v4326_v11, %v4325_v58 }
 0x5cf   :  { %v12554_v51 = vpack.c.bf16 %v65_v1, %v64_v38 }
 0x5d0   :  { %v4340_v35 = vsel %vm4319_vm14, %v12544_v43, 0.0 }
 0x5d1   :  { %v4341_v8 = vadd.f32 %v4340_v35, %v4339_v2  ;;  %9780 = vmatprep.subr.bf16.mxu1 %v12554_v51 }
 0x5d2   :  { %9782 = vmatpush3.bf16.msra.mxu1 %v12554_v51 }
 0x5d3   :  { %v4342_v27 = vrot.slane %v4341_v8, 4 }
 0x5d5   :  { %v4343_v16 = vadd.f32 %v4342_v27, %v4341_v8 }
 0x5d7   :  { %v4344_v10 = vrot.slane %v4343_v16, 2 }
 0x5d9   :  { %v4345_v34 = vadd.f32 %v4344_v10, %v4343_v16 }
 0x5db   :  { %v4346_v6 = vrot.slane %v4345_v34, 1 }
 0x5dd   :  { %v4347_v31 = vadd.f32 %v4346_v6, %v4345_v34 }
 0x5df   :  { %v4348_v36 = vadd.f32 %v4347_v31, %v4327_v29 }
 0x5e1   :  { %v12558_v4 = vmul.f32 0.010204081, %v4348_v36 }
 0x5e3   :  { %v4351_v18 = vsub.f32 %v12474_v12, %v12558_v4  ;;  %v4352_v40 = vsub.f32 %v12470_v28, %v12558_v4  ;;  %v4353_v24 = vsub.f32 %v12478_v59, %v12558_v4  ;;  %v4354_v42 = vsub.f32 %v12484_v49, %v12558_v4 }
 0x5e4   :  { %v4355_v41 = vsub.f32 %v12492_v54, %v12558_v4  ;;  %v4385_v47 = vsub.f32 %v12514_v14, %v12558_v4  ;;  %v4386_v33 = vsub.f32 %v12509_v23, %v12558_v4  ;;  %v4356_v53 = vsub.f32 %v12498_v7, %v12558_v4 }
 0x5e5   :  { %v4358_v32 = vmul.f32 %v4351_v18, %v4351_v18  ;;  %v4359_v17 = vmul.f32 %v4352_v40, %v4352_v40  ;;  %v4360_v56 = vmul.f32 %v4353_v24, %v4353_v24  ;;  %v4361_v5 = vmul.f32 %v4354_v42, %v4354_v42 }
 0x5e6   :  { %v4357_v9 = vsub.f32 %v12504_v57, %v12558_v4  ;;  %v4362_v22 = vmul.f32 %v4355_v41, %v4355_v41  ;;  %v4387_v25 = vsub.f32 %v12517_v55, %v12558_v4  ;;  %v4388_v21 = vsub.f32 %v12522_v26, %v12558_v4 }
 0x5e7   :  { %v4365_v30 = vsel %vm4307_vm13, %v4358_v32, 0.0  ;;  %v4366_v3 = vsel %vm4307_vm13, %v4359_v17, 0.0  ;;  %v4368_v46 = vsel %vm4307_vm13, %v4360_v56, 0.0  ;;  %v4389_v15 = vsub.f32 %v12529_v20, %v12558_v4 }
 0x5e8   :  { %v4367_v13 = vadd.f32 %v4366_v3, %v4365_v30  ;;  %v4392_v48 = vmul.f32 %v4385_v47, %v4385_v47  ;;  %v4393_v60 = vmul.f32 %v4386_v33, %v4386_v33  ;;  %v4363_v19 = vmul.f32 %v4356_v53, %v4356_v53 }
 0x5e9   :  { %v4370_v44 = vsel %vm4307_vm13, %v4361_v5, 0.0  ;;  %v4390_v45 = vsub.f32 %v12537_v62, %v12558_v4  ;;  %v4394_v0 = vmul.f32 %v4387_v25, %v4387_v25  ;;  %v4395_v50 = vmul.f32 %v4388_v21, %v4388_v21 }
 0x5ea   :  { %v4369_v37 = vadd.f32 %v4368_v46, %v4367_v13  ;;  %v4399_v2 = vsel %vm4307_vm13, %v4392_v48, 0.0  ;;  %v4400_v35 = vsel %vm4307_vm13, %v4393_v60, 0.0  ;;  %v4364_v61 = vmul.f32 %v4357_v9, %v4357_v9 }
 0x5eb   :  { %v4372_v8 = vsel %vm4307_vm13, %v4362_v22, 0.0  ;;  %v4401_v27 = vadd.f32 %v4400_v35, %v4399_v2  ;;  %v4391_v16 = vsub.f32 %v12544_v43, %v12558_v4  ;;  %v4396_v10 = vmul.f32 %v4389_v15, %v4389_v15 }
 0x5ec   :  { %v4371_v52 = vadd.f32 %v4370_v44, %v4369_v37  ;;  %v4402_v11 = vsel %vm4307_vm13, %v4394_v0, 0.0  ;;  %v4374_v34 = vsel %vm4307_vm13, %v4363_v19, 0.0  ;;  %v4397_v6 = vmul.f32 %v4390_v45, %v4390_v45  ;;  %v137_v44 = vld [vmem:[%s13367_s6] sm:$0x1] }
 0x5ed   :  { %v4403_v38 = vadd.f32 %v4402_v11, %v4401_v27  ;;  %v4404_v29 = vsel %vm4307_vm13, %v4395_v50, 0.0  ;;  %v4376_v31 = vsel %vm4319_vm14, %v4364_v61, 0.0  ;;  %v4398_v40 = vmul.f32 %v4391_v16, %v4391_v16  ;;  %v138_v50 = vld [vmem:[%s13368_s7] sm:$0x1] }
 0x5ee   :  { %v4373_v58 = vadd.f32 %v4372_v8, %v4371_v52  ;;  %v4406_v24 = vsel %vm4307_vm13, %v4396_v10, 0.0  ;;  %v4408_v32 = vsel %vm4307_vm13, %v4397_v6, 0.0  ;;  %v4426_v60 = vlaneseq }
 0x5ef   :  { %v4405_v36 = vadd.f32 %v4404_v29, %v4403_v38  ;;  %v4410_v47 = vsel %vm4319_vm14, %v4398_v40, 0.0 }
 0x5f0   :  { %v4375_v1 = vadd.f32 %v4374_v34, %v4373_v58  ;;  %v4427_v19 = vshrl.u32 %v4426_v60, 7  ;;  %v12651_v60 = vld [vmem:[%s13369_s8 + $0x8] sm:$0xff]  }
 0x5f1   :  { %v4407_v42 = vadd.f32 %v4406_v24, %v4405_v36 }
 0x5f2   :  { %v4377_v18 = vadd.f32 %v4376_v31, %v4375_v1  ;;  %v4428_v45 = vsub.s32 0, %v4427_v19  ;;  %v8182_v19 = vunpack.c.l.bf16 %v12651_v60 }
 0x5f3   :  { %v4409_v17 = vadd.f32 %v4408_v32, %v4407_v42 }
 0x5f4   :  { %v4378_v41 = vrot.slane %v4377_v18, 4 }
 0x5f5   :  { %v4411_v33 = vadd.f32 %v4410_v47, %v4409_v17 }
 0x5f6   :  { %v4379_v56 = vadd.f32 %v4378_v41, %v4377_v18 }
 0x5f7   :  { %v4412_v5 = vrot.slane %v4411_v33, 4 }
 0x5f8   :  { %v4380_v53 = vrot.slane %v4379_v56, 2 }
 0x5f9   :  { %v4413_v3 = vadd.f32 %v4412_v5, %v4411_v33 }
 0x5fa   :  { %v4381_v30 = vadd.f32 %v4380_v53, %v4379_v56 }
 0x5fb   :  { %v4414_v13 = vrot.slane %v4413_v3, 2 }
 0x5fc   :  { %v4382_v9 = vrot.slane %v4381_v30, 1 }
 0x5fd   :  { %v4415_v22 = vadd.f32 %v4414_v13, %v4413_v3 }
 0x5fe   :  { %v4383_v46 = vadd.f32 %v4382_v9, %v4381_v30 }
 0x5ff   :  { %v4416_v25 = vrot.slane %v4415_v22, 1 }
 0x601   :  { %v4417_v21 = vadd.f32 %v4416_v25, %v4415_v22 }
 0x603   :  { %v4418_v37 = vadd.f32 %v4417_v21, %v4383_v46 }
 0x605   :  { %v4419_v15 = vmul.f32 0.010204081, %v4418_v37  ;;  %v12636_v37 = vld [vmem:[%s13369_s8] sm:$0xff]  }
 0x607   :  { %v4420_v48 = vadd.f32 1e-05, %v4419_v15  ;;  %v8178_v15 = vunpack.c.l.bf16 %v12636_v37 }
 0x609   :  { %10055 = vrsqrt.f32 %v4420_v48 }
 0x613   :  { %v10056_v0 = vpop.eup %10055 }
 0x614   :  { %v4422_v52 = vmul.f32 %v10056_v0, %v137_v44  ;;  %v8183_v44 = vunpack.c.h.bf16 %v12651_v60  ;;  %v121_v60 = vld [vmem:[%s13374_s13 + $0x28] sm:$0xff] }
 0x616   :  { %v4423_v2 = vmul.f32 %v4422_v52, %v12558_v4  ;;  %v4429_v35 = vrot.slane %v4422_v52, %v4428_v45 }
 0x618   :  { %v4424_v61 = vsub.f32 %v138_v50, %v4423_v2  ;;  %v6127_v8 = vmul.f32 %v4429_v35, %v12544_v43  ;;  %v4431_v58 = vmul.f32 %v4429_v35, %v12474_v12  ;;  %v4432_v16 = vmul.f32 %v4429_v35, %v12470_v28  ;;  %v12685_v50 = vld [vmem:[%s13369_s8 + $0x18] sm:$0xff]  }
 0x619   :  { %v4433_v10 = vmul.f32 %v4429_v35, %v12478_v59  ;;  %v4434_v11 = vmul.f32 %v4429_v35, %v12484_v49  ;;  %v4435_v34 = vmul.f32 %v4429_v35, %v12492_v54  ;;  %v4436_v38 = vmul.f32 %v4429_v35, %v12498_v7 }
 0x61a   :  { %v4442_v27 = vrot.slane %v4424_v61, %v4428_v45  ;;  %v6121_v1 = vmul.f32 %v4429_v35, %v12514_v14  ;;  %v6122_v12 = vmul.f32 %v4429_v35, %v12509_v23  ;;  %v6123_v28 = vmul.f32 %v4429_v35, %v12517_v55  ;;  %v12668_v45 = vld [vmem:[%s13369_s8 + $0x10] sm:$0xff]   ;;  %v12702_v61 = vld [vmem:[%s13369_s8 + $0x20] sm:$0xff]  }
 0x61b   :  { %v6124_v59 = vmul.f32 %v4429_v35, %v12522_v26  ;;  %v6125_v54 = vmul.f32 %v4429_v35, %v12529_v20  ;;  %v6126_v7 = vmul.f32 %v4429_v35, %v12537_v62  ;;  %v4437_v22 = vmul.f32 %v4429_v35, %v12504_v57 }
 0x61c   :  { %v12617_v4 = vadd.f32 %v6127_v8, %v4442_v27  ;;  %v4444_v6 = vadd.f32 %v4442_v27, %v4431_v58  ;;  %v4445_v29 = vadd.f32 %v4442_v27, %v4432_v16  ;;  %v4446_v43 = vadd.f32 %v4442_v27, %v4433_v10  ;;  %v12719_v58 = vld [vmem:[%s13369_s8 + $0x28] sm:$0x1]  ;;  %v62_v10 = vld [vmem:[%s13370_s9] sm:$0xff] }
 0x61d   :  { %v4447_v31 = vadd.f32 %v4442_v27, %v4434_v11  ;;  %v4448_v40 = vadd.f32 %v4442_v27, %v4435_v34  ;;  %v4449_v24 = vadd.f32 %v4442_v27, %v4436_v38  ;;  %v6128_v41 = vadd.f32 %v6121_v1, %v4442_v27  ;;  %v63_v11 = vld [vmem:[%s13370_s9 + $0x8] sm:$0xff]  ;;  %v84_v38 = vld [vmem:[%s13372_s11 + $0x20] sm:$0xff] }
 0x61e   :  { %v4451_v36 = vmax.f32 %v4444_v6, 0.0  ;;  %v4452_v49 = vmax.f32 %v4445_v29, 0.0  ;;  %v4453_v18 = vmax.f32 %v4446_v43, 0.0  ;;  %v6129_v32 = vadd.f32 %v6122_v12, %v4442_v27  ;;  %v85_v1 = vld [vmem:[%s13372_s11 + $0x28] sm:$0xff] }
 0x61f   :  { %v4454_v14 = vmax.f32 %v4447_v31, 0.0  ;;  %v6130_v17 = vadd.f32 %v6123_v28, %v4442_v27  ;;  %v6131_v56 = vadd.f32 %v6124_v59, %v4442_v27  ;;  %v6132_v23 = vadd.f32 %v6125_v54, %v4442_v27  ;;  %v66_v59 = vld [vmem:[%s13370_s9 + $0x20] sm:$0xff] }
 0x620   :  { %v9771_v42 = vpack.c.bf16 %v4452_v49, %v4451_v36  ;;  %v6135_v55 = vmax.f32 %v6128_v41, 0.0  ;;  %v6136_v47 = vmax.f32 %v6129_v32, 0.0  ;;  %v6133_v33 = vadd.f32 %v6126_v7, %v4442_v27  ;;  %v67_v36 = vld [vmem:[%s13370_s9 + $0x28] sm:$0xff] }
 0x621   :  { %v6137_v26 = vmax.f32 %v6130_v17, 0.0  ;;  %v4455_v20 = vmax.f32 %v4448_v40, 0.0  ;;  %v6138_v53 = vmax.f32 %v6131_v56, 0.0  ;;  %v6139_v62 = vmax.f32 %v6132_v23, 0.0  ;;  %v68_v23 = vld [vmem:[%s13370_s9 + $0x30] sm:$0xff] }
 0x622   :  { %9772 = vmatpush3.bf16.msra.mxu0 %v9771_v42  ;;  %v9774_v5 = vpack.c.bf16 %v4454_v14, %v4453_v18  ;;  %v4456_v30 = vmax.f32 %v4449_v24, 0.0  ;;  %v12625_v3 = vpack.c.bf16 %v6136_v47, %v6135_v55  ;;  %v6140_v9 = vmax.f32 %v6133_v33, 0.0  ;;  %v69_v55 = vld [vmem:[%s13370_s9 + $0x38] sm:$0xff] }
 0x623   :  { %9773 = vmatprep.subr.bf16.mxu0 %v13596_v63  ;;  %v12627_v13 = vpack.c.bf16 %v6138_v53, %v6137_v26  ;;  %v4450_v21 = vadd.f32 %v4442_v27, %v4437_v22  ;;  %v8179_v57 = vunpack.c.h.bf16 %v12636_v37  ;;  %v8186_v0 = vunpack.c.l.bf16 %v12668_v45  ;;  %v119_v37 = vld [vmem:[%s13374_s13 + $0x18] sm:$0xff] }
 0x624   :  { %v12630_v46 = vpack.c.bf16 %v6140_v9, %v6139_v62  ;;  %v9777_v25 = vpack.c.bf16 %v4456_v30, %v4455_v20  ;;  %v8187_v52 = vunpack.c.h.bf16 %v12668_v45  ;;  %v8190_v2 = vunpack.c.l.bf16 %v12685_v50  ;;  %v123_v45 = vld [vmem:[%s13374_s13 + $0x38] sm:$0xff] }
 0x625   :  { %v4457_v48 = vmax.f32 %v4450_v21, 0.0  ;;  %v8191_v35 = vunpack.c.h.bf16 %v12685_v50  ;;  %v8194_v8 = vunpack.c.l.bf16 %v12702_v61  ;;  %v8195_v27 = vunpack.c.h.bf16 %v12702_v61  ;;  %v71_v21 = vld [vmem:[%s13370_s9 + $0x48] sm:$0xff]  ;;  %v127_v61 = vld [vmem:[%s13374_s13 + $0x58] sm:$0xff] }
 0x626   :  { %9775 = vmatpush3.bf16.msra.mxu0 %v9774_v5  ;;  %v328_v16 = vunpack.c.l.bf16 %v12719_v58  ;;  %v12738_v34 = vpack.c.bf16 %v63_v11, %v62_v10  ;;  %v12747_v6 = vpack.c.bf16 %v85_v1, %v84_v38  ;;  %v12758_v14 = vpack.c.bf16 %v67_v36, %v66_v59  ;;  %v72_v36 = vld [vmem:[%s13370_s9 + $0x50] sm:$0xff]  ;;  %v125_v50 = vld [vmem:[%s13374_s13 + $0x48] sm:$0xff] }
 0x627   :  { %9776 = vmatprep.subr.bf16.mxu0 %v13596_v63  ;;  %v12772_v20 = vpack.c.bf16 %v69_v55, %v68_v23  ;;  %v129_v58 = vld [vmem:[%s13374_s13 + $0x68] sm:$0xff] }
 0x628   :  { %9784 = vmatprep.subr.bf16.mxu1 %v12738_v34 }
 0x62a   :  { %9778 = vmatpush3.bf16.msra.mxu0 %v9777_v25  ;;  %v70_v25 = vld [vmem:[%s13370_s9 + $0x40] sm:$0xff] }
 0x62b   :  { %9214 = vmatprep.subr.mxu0 %v13592_v39  ;;  %v12786_v38 = vpack.c.bf16 %v71_v21, %v70_v25  ;;  %v86_v25 = vld [vmem:[%s13372_s11 + $0x30] sm:$0xff]  ;;  %v87_v21 = vld [vmem:[%s13372_s11 + $0x38] sm:$0xff] }
 0x62e   :  { %9215 = vmatpush3.msk.msra.mxu0 %vm436_vm0, %v4457_v48 }
 0x62f   :  { %9217 = vmatmul.mubr.msk.f32.vlgmr.msra.gmra.mrb[26].mxu0 %vm4458_vm15, %v8178_v15  ;;  %9815 = vmatprep.subr.bf16.mxu0 %v13596_v63 }
 0x630   :  { %9219 = vmatprep.mubr.msk.f32.mxu0 %vm10096_vm3, %v13592_v39  ;;  %9817 = vmatpush3.bf16.msra.mxu0 %v12747_v6 }
 0x631   :  { %9818 = vmatprep.subr.bf16.mxu0 %v13596_v63 }
 0x633   :  { %9220 = vmatmul.mubr.msk.f32.gmra.mrb[28].mxu0 %vm4458_vm15, %v8179_v57 }
 0x634   :  { %9222 = vmatprep.mubr.msk.f32.mxu0 %vm10096_vm3, %v13592_v39 }
 0x637   :  { %9223 = vmatmul.mubr.msk.f32.gmra.mrb[30].mxu0 %vm4458_vm15, %v8182_v19 }
 0x638   :  { %9225 = vmatprep.mubr.msk.f32.mxu0 %vm10096_vm3, %v13592_v39 }
 0x63b   :  { %9226 = vmatmul.mubr.msk.f32.gmra.mrb[32].mxu0 %vm4458_vm15, %v8183_v44 }
 0x63c   :  { %9228 = vmatprep.mubr.msk.f32.mxu0 %vm10096_vm3, %v13592_v39 }
 0x63f   :  { %9229 = vmatmul.mubr.msk.f32.gmra.mrb[34].mxu0 %vm4458_vm15, %v8186_v0 }
 0x640   :  { %9231 = vmatprep.mubr.msk.f32.mxu0 %vm10096_vm3, %v13592_v39 }
 0x643   :  { %9232 = vmatmul.mubr.msk.f32.gmra.mrb[36].mxu0 %vm4458_vm15, %v8187_v52 }
 0x644   :  { %9234 = vmatprep.mubr.msk.f32.mxu0 %vm10096_vm3, %v13592_v39 }
 0x647   :  { %9235 = vmatmul.mubr.msk.f32.gmra.mrb[38].mxu0 %vm4458_vm15, %v8190_v2 }
 0x648   :  { %9237 = vmatprep.mubr.msk.f32.mxu0 %vm10096_vm3, %v13592_v39 }
 0x64b   :  { %9238 = vmatmul.mubr.msk.f32.gmra.mrb[40].mxu0 %vm4458_vm15, %v8191_v35 }
 0x64c   :  { %9240 = vmatprep.mubr.msk.f32.mxu0 %vm10096_vm3, %v13592_v39 }
 0x64f   :  { %9241 = vmatmul.mubr.msk.f32.gmra.mrb[42].mxu0 %vm4458_vm15, %v8194_v8 }
 0x650   :  { %9243 = vmatprep.mubr.msk.f32.mxu0 %vm10096_vm3, %v13592_v39 }
 0x653   :  { %9244 = vmatmul.mubr.msk.f32.gmra.mrb[44].mxu0 %vm4458_vm15, %v8195_v27 }
 0x654   :  { %9246 = vmatprep.mubr.msk.f32.mxu0 %vm10096_vm3, %v13592_v39 }
 0x657   :  { %9247 = vmatmul.mubr.msk.f32.gmra.mrb[46].mxu0 %vm4458_vm15, %v328_v16 }
 0x658   :  { %9320 = vmatprep.mubr.msk.f32.mxu0 %vm10096_vm3, %v13592_v39 }
 0x702   :  { %v4561_v29 = vpop.f32.mrb[26].mxu0 }
 0x703   :  { %v9218_v43 = vpop.f32.mrb[27].mxu0 }
 0x706   :  { %v4566_v31 = vpop.f32.mrb[28].mxu0 }
 0x707   :  { %v9221_v12 = vpop.f32.mrb[29].mxu0  ;;  %v4617_v49 = vrot.slane %v4566_v31, 1 }
 0x70a   :  { %v4571_v28 = vpop.f32.mrb[30].mxu0 }
 0x70b   :  { %v4618_v54 = vrot.slane %v4571_v28, 1  ;;  %v9224_v7 = vpop.f32.mrb[31].mxu0  ;;  %v4780_v24 = vrot.slane %v4571_v28, 2 }
 0x70d   :  { %v4619_v18 = vsel %vm1496_vm7, %v4617_v49, %v4618_v54  ;;  %v73_v49 = vld [vmem:[%s13370_s9 + $0x58] sm:$0xff] }
 0x70e   :  { %9253 = vmatprep.mubr.msk.f32.mxu1 %vm4307_vm13, %v4619_v18  ;;  %v4576_v40 = vpop.f32.mrb[32].mxu0 }
 0x70f   :  { %9254 = vmatmul.mubr.msk.f32.vlgmr.msra.gmra.mrb[38].mxu1 %vm4307_vm13, %v4618_v54  ;;  %v4781_v42 = vrot.slane %v4576_v40, 2  ;;  %v9227_v41 = vpop.f32.mrb[33].mxu0  ;;  %v4865_v32 = vrot.slane %v4576_v40, 3  ;;  %v12800_v40 = vpack.c.bf16 %v73_v49, %v72_v36  ;;  %v100_v36 = vld [vmem:[%s13372_s11 + $0xa0] sm:$0xff]  ;;  %v101_v49 = vld [vmem:[%s13372_s11 + $0xa8] sm:$0xff] }
 0x710   :  { %9260 = vmatprep.mubr.msk.f32.mxu1 %vm4307_vm13, %v4561_v29  ;;  %9786 = vmatpush3.bf16.msra.mxu1 %v12738_v34 }
 0x711   :  { %9788 = vmatprep.subr.bf16.mxu1 %v12758_v14  ;;  %v4782_v17 = vsel %vm1751_vm9, %v4780_v24, %v4781_v42 }
 0x712   :  { %v4581_v56 = vpop.f32.mrb[34].mxu0 }
 0x713   :  { %v4866_v47 = vrot.slane %v4581_v56, 3  ;;  %v9230_v26 = vpop.f32.mrb[35].mxu0  ;;  %v4950_v33 = vrot.slane %v4581_v56, 4 }
 0x714   :  { %v77_v26 = vld [vmem:[%s13370_s9 + $0x78] sm:$0xff] }
 0x715   :  { %v4867_v53 = vsel %vm1892_vm10, %v4865_v32, %v4866_v47  ;;  %v74_v32 = vld [vmem:[%s13370_s9 + $0x60] sm:$0xff] }
 0x716   :  { %v4586_v62 = vpop.f32.mrb[36].mxu0 }
 0x717   :  { %9261 = vmatmul.mubr.msk.f32.vlgmr.msra.gmra.mrb[38].mxu1 %vm4307_vm13, %v4566_v31  ;;  %v4951_v5 = vrot.slane %v4586_v62, 4  ;;  %v9233_v30 = vpop.f32.mrb[37].mxu0  ;;  %v5035_v9 = vrot.slane %v4586_v62, 5  ;;  %v79_v62 = vld [vmem:[%s13370_s9 + $0x88] sm:$0xff] }
 0x718   :  { %9790 = vmatpush3.bf16.msra.mxu1 %v12758_v14  ;;  %9267 = vmatprep.mubr.msk.f32.mxu1 %vm4307_vm13, %v4782_v17  ;;  %v75_v17 = vld [vmem:[%s13370_s9 + $0x68] sm:$0xff]  ;;  %v92_v30 = vld [vmem:[%s13372_s11 + $0x60] sm:$0xff] }
 0x719   :  { %9792 = vmatprep.subr.bf16.mxu1 %v12772_v20  ;;  %v4952_v22 = vsel %vm1140_vm6, %v4950_v33, %v4951_v5  ;;  %v12813_v55 = vpack.c.bf16 %v75_v17, %v74_v32  ;;  %v83_v32 = vld [vmem:[%s13372_s11 + $0x18] sm:$0xff]  ;;  %v102_v17 = vld [vmem:[%s13372_s11 + $0xb0] sm:$0xff] }
 0x71a   :  { %v4591_v48 = vpop.f32.mrb[38].mxu0 }
 0x71b   :  { %v5036_v10 = vrot.slane %v4591_v48, 5  ;;  %v9236_v11 = vpop.f32.mrb[39].mxu0  ;;  %v5120_v1 = vrot.slane %v4591_v48, 6  ;;  %v94_v48 = vld [vmem:[%s13372_s11 + $0x70] sm:$0xff] }
 0x71c   :  { %v95_v11 = vld [vmem:[%s13372_s11 + $0x78] sm:$0xff] }
 0x71d   :  { %v5037_v29 = vsel %vm2173_vm11, %v5035_v9, %v5036_v10  ;;  %v93_v9 = vld [vmem:[%s13372_s11 + $0x68] sm:$0xff] }
 0x71e   :  { %v4596_v43 = vpop.f32.mrb[40].mxu0 }
 0x71f   :  { %9268 = vmatmul.mubr.msk.f32.vlgmr.msra.gmra.mrb[38].mxu1 %vm4307_vm13, %v4781_v42  ;;  %v5121_v31 = vrot.slane %v4596_v43, 6  ;;  %v9239_v12 = vpop.f32.mrb[41].mxu0  ;;  %v5205_v28 = vrot.slane %v4596_v43, 7 }
 0x720   :  { %9794 = vmatpush3.bf16.msra.mxu1 %v12772_v20  ;;  %9274 = vmatprep.mubr.msk.f32.mxu1 %vm4307_vm13, %v4867_v53  ;;  %v78_v53 = vld [vmem:[%s13370_s9 + $0x80] sm:$0xff] }
 0x721   :  { %9796 = vmatprep.subr.bf16.mxu1 %v12786_v38  ;;  %v5122_v59 = vsel %vm2314_vm12, %v5120_v1, %v5121_v31  ;;  %v12874_v1 = vpack.c.bf16 %v95_v11, %v94_v48  ;;  %v80_v12 = vld [vmem:[%s13372_s11] sm:$0xff]  ;;  %v91_v11 = vld [vmem:[%s13372_s11 + $0x58] sm:$0xff] }
 0x722   :  { %v4601_v54 = vpop.f32.mrb[42].mxu0 }
 0x723   :  { %v5206_v7 = vrot.slane %v4601_v54, 7  ;;  %v9242_v18 = vpop.f32.mrb[43].mxu0 }
 0x724   :  { %v12904_v18 = vpack.c.bf16 %v101_v49, %v100_v36  ;;  %v96_v36 = vld [vmem:[%s13372_s11 + $0x80] sm:$0xff]  ;;  %v97_v49 = vld [vmem:[%s13372_s11 + $0x88] sm:$0xff] }
 0x725   :  { %v5207_v24 = vsel %vm436_vm0, %v5205_v28, %v5206_v7 }
 0x726   :  { %v4606_v42 = vpop.f32.mrb[44].mxu0 }
 0x727   :  { %9275 = vmatmul.mubr.msk.f32.vlgmr.msra.gmra.mrb[38].mxu1 %vm4307_vm13, %v4866_v47  ;;  %v9245_v41 = vpop.f32.mrb[45].mxu0  ;;  %v76_v47 = vld [vmem:[%s13370_s9 + $0x70] sm:$0xff] }
 0x728   :  { %9798 = vmatpush3.bf16.msra.mxu1 %v12786_v38  ;;  %9281 = vmatprep.mubr.msk.f32.mxu1 %vm4307_vm13, %v4952_v22  ;;  %v12825_v33 = vpack.c.bf16 %v77_v26, %v76_v47  ;;  %v12856_v22 = vpack.c.bf16 %v93_v9, %v92_v30  ;;  %v88_v26 = vld [vmem:[%s13372_s11 + $0x40] sm:$0xff]  ;;  %v109_v30 = vld [vmem:[%s13372_s11 + $0xe8] sm:$0xff] }
 0x729   :  { %9800 = vmatprep.subr.bf16.mxu1 %v12800_v40 }
 0x72a   :  { %v4611_v56 = vpop.f32.mrb[46].mxu0 }
 0x72b   :  { %v9248_v23 = vpop.f32.mrb[47].mxu0 }
 0x72f   :  { %9282 = vmatmul.mubr.msk.f32.vlgmr.msra.gmra.mrb[38].mxu1 %vm4307_vm13, %v4951_v5  ;;  %v12837_v5 = vpack.c.bf16 %v79_v62, %v78_v53  ;;  %v89_v53 = vld [vmem:[%s13372_s11 + $0x48] sm:$0xff]  ;;  %v108_v62 = vld [vmem:[%s13372_s11 + $0xe0] sm:$0xff] }
 0x730   :  { %9802 = vmatpush3.bf16.msra.mxu1 %v12800_v40  ;;  %9288 = vmatprep.mubr.msk.f32.mxu1 %vm4307_vm13, %v5037_v29  ;;  %v12883_v29 = vld [vmem:[%s13371_s10] ss:$0 sm:$0xff]  ;;  %v12948_v9 = vpack.c.bf16 %v89_v53, %v88_v26  ;;  %v105_v53 = vld [vmem:[%s13372_s11 + $0xc8] sm:$0xff] }
 0x731   :  { %9804 = vmatprep.subr.bf16.mxu1 %v12813_v55  ;;  %v104_v26 = vld [vmem:[%s13372_s11 + $0xc0] sm:$0xff] }
 0x737   :  { %9289 = vmatmul.mubr.msk.f32.vlgmr.msra.gmra.mrb[38].mxu1 %vm4307_vm13, %v5036_v10  ;;  %v12869_v10 = vpack.c.bf16 %v87_v21, %v86_v25  ;;  %v12950_v25 = vpack.c.bf16 %v109_v30, %v108_v62  ;;  %v90_v21 = vld [vmem:[%s13372_s11 + $0x50] sm:$0xff]  ;;  %v13019_v62 = vpack.c.bf16 %v105_v53, %v104_v26 }
 0x738   :  { %9806 = vmatpush3.bf16.msra.mxu1 %v12813_v55  ;;  %9295 = vmatprep.mubr.msk.f32.mxu1 %vm4307_vm13, %v5122_v59  ;;  %v81_v59 = vld [vmem:[%s13372_s11 + $0x8] sm:$0xff] }
 0x739   :  { %9808 = vmatprep.subr.bf16.mxu1 %v12825_v33  ;;  %9820 = vmatpush3.bf16.msra.mxu0 %v12869_v10 }
 0x73a   :  { %9821 = vmatprep.subr.bf16.mxu0 %v13596_v63 }
 0x73f   :  { %9296 = vmatmul.mubr.msk.f32.vlgmr.msra.gmra.mrb[38].mxu1 %vm4307_vm13, %v5121_v31 }
 0x740   :  { %9810 = vmatpush3.bf16.msra.mxu1 %v12825_v33  ;;  %9302 = vmatprep.mubr.msk.f32.mxu1 %vm4307_vm13, %v5207_v24  ;;  %v82_v24 = vld [vmem:[%s13372_s11 + $0x10] sm:$0xff] }
 0x741   :  { %9812 = vmatprep.subr.bf16.mxu1 %v12837_v5  ;;  %v12924_v23 = vpack.c.bf16 %v83_v32, %v82_v24  ;;  %v12990_v24 = vpack.c.bf16 %v97_v49, %v96_v36  ;;  %v98_v32 = vld [vmem:[%s13372_s11 + $0x90] sm:$0xff] }
 0x747   :  { %9303 = vmatmul.mubr.msk.f32.vlgmr.msra.gmra.mrb[38].mxu1 %vm4307_vm13, %v5206_v7  ;;  %v12902_v7 = vpack.c.bf16 %v81_v59, %v80_v12  ;;  %v111_v12 = vld [vmem:[%s13372_s11 + $0xf8] sm:$0xff] }
 0x748   :  { %9814 = vmatpush3.bf16.msra.mxu1 %v12837_v5  ;;  %9309 = vmatprep.mubr.msk.f32.mxu1 %vm4307_vm13, %v4606_v42 }
 0x749   :  { %9833 = vmatprep.subr.bf16.mxu1 %v13596_v63 }
 0x74f   :  { %9310 = vmatmul.mubr.msk.f32.vlgmr.msra.gmra.mrb[38].mxu1 %vm4307_vm13, %v4611_v56  ;;  %v103_v56 = vld [vmem:[%s13372_s11 + $0xb8] sm:$0xff] }
 0x750   :  { %9353 = vmatprep.mubr.msk.f32.mxu1 %vm10096_vm3, %v13592_v39  ;;  %9835 = vmatpush3.bf16.msra.mxu1 %v12856_v22  ;;  %v12926_v47 = vpack.c.bf16 %v103_v56, %v102_v17  ;;  %v99_v17 = vld [vmem:[%s13372_s11 + $0x98] sm:$0xff] }
 0x751   :  { %9836 = vmatprep.subr.bf16.mxu1 %v13596_v63  ;;  %v13005_v56 = vpack.c.bf16 %v99_v17, %v98_v32 }
 0x754   :  { %9838 = vmatpush3.bf16.msra.mxu1 %v12874_v1 }
 0x755   :  { %9845 = vmatprep.subr.bf16.mxu1 %v13596_v63 }
 0x822   :  { %v12885_v43 = vpop.f32.mrb[38].mxu1 }
 0x823   :  { %v5361_v31 = vpop.f32.mrb[39].mxu1 }
 0x824   :  { %v5378_v28 = vadd.f32 %v12883_v29, %v5361_v31  ;;  %v110_v31 = vld [vmem:[%s13372_s11 + $0xf0] sm:$0xff] }
 0x825   :  { %v12974_v59 = vpack.c.bf16 %v111_v12, %v110_v31  ;;  %v112_v31 = vld [vmem:[%s13372_s11 + $0x100] sm:$0xff]  ;;  %v113_v12 = vld [vmem:[%s13372_s11 + $0x108] sm:$0xff] }
 0x826   :  { %v12900_v54 = vmax.f32 %v5378_v28, 0.0  ;;  %v12972_v28 = vpack.c.bf16 %v91_v11, %v90_v21  ;;  %v106_v21 = vld [vmem:[%s13372_s11 + $0xd0] sm:$0xff]  ;;  %v13043_v36 = vpack.c.bf16 %v113_v12, %v112_v31 }
 0x828   :  { %v5383_v42 = vrot.slane %v12900_v54, 1  ;;  %v5603_v41 = vrot.slane %v12900_v54, 3  ;;  %v5751_v48 = vrot.slane %v12900_v54, 5  ;;  %v5677_v30 = vrot.slane %v12900_v54, 4 }
 0x829   :  { %v5825_v49 = vrot.slane %v12900_v54, 6 }
 0x82a   :  { %9321 = vmatmul.mubr.msk.f32.vlgmr.msra.gmra.mrb[48].mxu0 %vm5384_vm1, %v5383_v42  ;;  %9354 = vmatmul.mubr.msk.f32.vlgmr.msra.gmra.mrb[40].mxu1 %vm5384_vm1, %v5603_v41  ;;  %v5529_v42 = vrot.slane %v12900_v54, 2  ;;  %v5899_v41 = vrot.slane %v12900_v54, 7 }
 0x82b   :  { %9823 = vmatpush3.bf16.msra.mxu0 %v12902_v7  ;;  %9847 = vmatpush3.bf16.msra.mxu1 %v12904_v18 }
 0x82c   :  { %9824 = vmatprep.subr.bf16.mxu0 %v13596_v63  ;;  %9848 = vmatprep.subr.bf16.mxu1 %v13596_v63 }
 0x82d   :  { %9331 = vmatprep.mubr.msk.f32.mxu0 %vm10096_vm3, %v13592_v39  ;;  %9375 = vmatprep.mubr.msk.f32.mxu1 %vm10096_vm3, %v13592_v39 }
 0x82f   :  { %9826 = vmatpush3.bf16.msra.mxu0 %v12924_v23  ;;  %9850 = vmatpush3.bf16.msra.mxu1 %v12926_v47 }
 0x830   :  { %9827 = vmatprep.subr.bf16.mxu0 %v13596_v63  ;;  %9857 = vmatprep.subr.bf16.mxu1 %v13596_v63 }
 0x832   :  { %9332 = vmatmul.mubr.msk.f32.vlgmr.msra.gmra.mrb[50].mxu0 %vm5384_vm1, %v12900_v54  ;;  %9376 = vmatmul.mubr.msk.f32.vlgmr.msra.gmra.mrb[42].mxu1 %vm5384_vm1, %v5751_v48  ;;  %v107_v48 = vld [vmem:[%s13372_s11 + $0xd8] sm:$0xff]  ;;  %v5379_v54 = vadd.f32 %v12885_v43, %v12883_v29  ;;  %v6141_v43 = vmax.f32 %v12617_v4, 0.0  ;;  %v116_v4 = vld [vmem:[%s13374_s13] sm:$0xff] }
 0x833   :  { %9829 = vmatpush3.bf16.msra.mxu0 %v12948_v9  ;;  %9859 = vmatpush3.bf16.msra.mxu1 %v12950_v25  ;;  %v13031_v11 = vpack.c.bf16 %v107_v48, %v106_v21 }
 0x834   :  { %9830 = vmatprep.subr.bf16.mxu0 %v13596_v63  ;;  %9860 = vmatprep.subr.bf16.mxu1 %v13596_v63  ;;  %v5381_v17 = vmax.f32 %v5379_v54, 0.0 }
 0x835   :  { %9342 = vmatprep.mubr.msk.f32.mxu0 %vm10096_vm3, %v13592_v39  ;;  %9397 = vmatprep.mubr.msk.f32.mxu1 %vm10096_vm3, %v13592_v39 }
 0x837   :  { %9832 = vmatpush3.bf16.msra.mxu0 %v12972_v28  ;;  %9862 = vmatpush3.bf16.msra.mxu1 %v12974_v59 }
 0x838   :  { %9839 = vmatprep.subr.bf16.mxu0 %v13596_v63  ;;  %9869 = vmatprep.subr.bf16.mxu1 %v13596_v63 }
 0x83a   :  { %9343 = vmatmul.mubr.msk.f32.vlgmr.msra.gmra.mrb[52].mxu0 %vm5384_vm1, %v5529_v42  ;;  %9398 = vmatmul.mubr.msk.f32.vlgmr.msra.gmra.mrb[44].mxu1 %vm5384_vm1, %v5899_v41  ;;  %v114_v42 = vld [vmem:[%s13372_s11 + $0x110] sm:$0xff]  ;;  %v115_v41 = vld [vmem:[%s13372_s11 + $0x118] sm:$0xff] }
 0x83b   :  { %9841 = vmatpush3.bf16.msra.mxu0 %v12990_v24  ;;  %9364 = vmatprep.mubr.msk.f32.mxu0 %vm10096_vm3, %v13592_v39  ;;  %v13055_v32 = vpack.c.bf16 %v115_v41, %v114_v42 }
 0x83c   :  { %9842 = vmatprep.subr.bf16.mxu0 %v13596_v63  ;;  %9443 = vmatprep.mubr.msk.f32.mxu1 %vm10096_vm3, %v13592_v39 }
 0x83f   :  { %9844 = vmatpush3.bf16.msra.mxu0 %v13005_v56 }
 0x840   :  { %9851 = vmatprep.subr.bf16.mxu0 %v13596_v63 }
 0x842   :  { %9365 = vmatmul.mubr.msk.f32.vlgmr.msra.gmra.mrb[54].mxu0 %vm5384_vm1, %v5677_v30 }
 0x843   :  { %9853 = vmatpush3.bf16.msra.mxu0 %v13019_v62  ;;  %9386 = vmatprep.mubr.msk.f32.mxu0 %vm10096_vm3, %v13592_v39 }
 0x844   :  { %9854 = vmatprep.subr.bf16.mxu0 %v13596_v63 }
 0x847   :  { %9856 = vmatpush3.bf16.msra.mxu0 %v13031_v11 }
 0x848   :  { %9863 = vmatprep.subr.bf16.mxu0 %v13596_v63 }
 0x84a   :  { %9387 = vmatmul.mubr.msk.f32.vlgmr.msra.gmra.mrb[56].mxu0 %vm5384_vm1, %v5825_v49 }
 0x84b   :  { %9865 = vmatpush3.bf16.msra.mxu0 %v13043_v36  ;;  %9408 = vmatprep.mubr.msk.f32.mxu0 %vm10096_vm3, %v13592_v39 }
 0x84c   :  { %9866 = vmatprep.subr.bf16.mxu0 %v13596_v63 }
 0x84f   :  { %9868 = vmatpush3.bf16.msra.mxu0 %v13055_v32 }
 0x850   :  { %9893 = vmatprep.subr.bf16.mxu0 %v13596_v63 }
 0x852   :  { %9409 = vmatmul.mubr.msk.f32.vlgmr.msra.gmra.mrb[58].mxu0 %vm5384_vm1, %v5381_v17 }
 0x853   :  { %9895 = vmatpush3.bf16.msra.mxu0 %v12625_v3  ;;  %9460 = vmatprep.mubr.msk.f32.mxu0 %vm10096_vm3, %v13592_v39  ;;  %v117_v3 = vld [vmem:[%s13374_s13 + $0x8] sm:$0xff] }
 0x854   :  { %9896 = vmatprep.subr.bf16.mxu0 %v13596_v63 }
 0x857   :  { %9898 = vmatpush3.bf16.msra.mxu0 %v12627_v13  ;;  %v118_v13 = vld [vmem:[%s13374_s13 + $0x10] sm:$0xff] }
 0x858   :  { %9899 = vmatprep.subr.bf16.mxu0 %v13596_v63 }
 0x85b   :  { %9901 = vmatpush3.bf16.msra.mxu0 %v12630_v46  ;;  %v13144_v46 = vpack.c.bf16 %v117_v3, %v116_v4 }
 0x85c   :  { %9458 = vmatprep.subr.mxu0 %v13592_v39 }
 0x85d   :  { %9871 = vmatpush3.bf16.msra.mxu1 %v13144_v46 }
 0x85e   :  { %9872 = vmatprep.subr.bf16.mxu1 %v13596_v63 }
 0x85f   :  { %9459 = vmatpush3.msk.msra.mxu0 %vm436_vm0, %v6141_v43 }
 0x860   :  { %9461 = vmatmul.mubr.msk.f32.vlgmr.msra.gmra.mrb[60].mxu0 %vm4458_vm15, %v8178_v15  ;;  %9938 = vmatprep.subr.bf16.mxu0 %v13596_v63  ;;  %v13150_v15 = vpack.c.bf16 %v119_v37, %v118_v13 }
 0x861   :  { %9463 = vmatprep.mubr.msk.f32.mxu0 %vm10096_vm3, %v13592_v39  ;;  %9940 = vmatpush3.bf16.msra.mxu0 %v12747_v6  ;;  %v130_v6 = vld [vmem:[%s13374_s13 + $0x70] sm:$0xff] }
 0x862   :  { %9941 = vmatprep.subr.bf16.mxu0 %v13596_v63  ;;  %9874 = vmatpush3.bf16.msra.mxu1 %v13150_v15 }
 0x863   :  { %9875 = vmatprep.subr.bf16.mxu1 %v13596_v63 }
 0x864   :  { %9464 = vmatmul.mubr.msk.f32.gmra.mrb[62].mxu0 %vm4458_vm15, %v8179_v57  ;;  %v120_v57 = vld [vmem:[%s13374_s13 + $0x20] sm:$0xff] }
 0x865   :  { %9466 = vmatprep.mubr.msk.f32.mxu0 %vm10096_vm3, %v13592_v39  ;;  %9943 = vmatpush3.bf16.msra.mxu0 %v12869_v10  ;;  %v131_v10 = vld [vmem:[%s13374_s13 + $0x78] sm:$0xff] }
 0x866   :  { %9944 = vmatprep.subr.bf16.mxu0 %v13596_v63  ;;  %v13211_v26 = vpack.c.bf16 %v131_v10, %v130_v6 }
 0x868   :  { %9467 = vmatmul.mubr.msk.f32.gmra.mrb[64].mxu0 %vm4458_vm15, %v8182_v19  ;;  %v122_v19 = vld [vmem:[%s13374_s13 + $0x30] sm:$0xff] }
 0x869   :  { %9469 = vmatprep.mubr.msk.f32.mxu0 %vm10096_vm3, %v13592_v39 }
 0x86c   :  { %9470 = vmatmul.mubr.msk.f32.gmra.mrb[66].mxu0 %vm4458_vm15, %v8183_v44  ;;  %v13164_v44 = vpack.c.bf16 %v121_v60, %v120_v57 }
 0x86d   :  { %9472 = vmatprep.mubr.msk.f32.mxu0 %vm10096_vm3, %v13592_v39 }
 0x86e   :  { %9877 = vmatpush3.bf16.msra.mxu1 %v13164_v44 }
 0x86f   :  { %9878 = vmatprep.subr.bf16.mxu1 %v13596_v63 }
 0x870   :  { %9473 = vmatmul.mubr.msk.f32.gmra.mrb[68].mxu0 %vm4458_vm15, %v8186_v0  ;;  %v13170_v0 = vpack.c.bf16 %v123_v45, %v122_v19 }
 0x871   :  { %9475 = vmatprep.mubr.msk.f32.mxu0 %vm10096_vm3, %v13592_v39 }
 0x872   :  { %9880 = vmatpush3.bf16.msra.mxu1 %v13170_v0 }
 0x873   :  { %9881 = vmatprep.subr.bf16.mxu1 %v13596_v63 }
 0x874   :  { %9476 = vmatmul.mubr.msk.f32.gmra.mrb[70].mxu0 %vm4458_vm15, %v8187_v52  ;;  %v124_v52 = vld [vmem:[%s13374_s13 + $0x40] sm:$0xff] }
 0x875   :  { %9478 = vmatprep.mubr.msk.f32.mxu0 %vm10096_vm3, %v13592_v39 }
 0x878   :  { %9479 = vmatmul.mubr.msk.f32.gmra.mrb[72].mxu0 %vm4458_vm15, %v8190_v2  ;;  %v126_v2 = vld [vmem:[%s13374_s13 + $0x50] sm:$0xff] }
 0x879   :  { %9481 = vmatprep.mubr.msk.f32.mxu0 %vm10096_vm3, %v13592_v39 }
 0x87c   :  { %9482 = vmatmul.mubr.msk.f32.gmra.mrb[74].mxu0 %vm4458_vm15, %v8191_v35  ;;  %v13184_v35 = vpack.c.bf16 %v125_v50, %v124_v52 }
 0x87d   :  { %9484 = vmatprep.mubr.msk.f32.mxu0 %vm10096_vm3, %v13592_v39 }
 0x87e   :  { %9883 = vmatpush3.bf16.msra.mxu1 %v13184_v35 }
 0x87f   :  { %9884 = vmatprep.subr.bf16.mxu1 %v13596_v63 }
 0x880   :  { %9485 = vmatmul.mubr.msk.f32.gmra.mrb[76].mxu0 %vm4458_vm15, %v8194_v8  ;;  %v13190_v8 = vpack.c.bf16 %v127_v61, %v126_v2  ;;  %v13218_v61 = vld [vmem:[%s13373_s12] sm:$0x1] }
 0x881   :  { %9487 = vmatprep.mubr.msk.f32.mxu0 %vm10096_vm3, %v13592_v39 }
 0x882   :  { %9886 = vmatpush3.bf16.msra.mxu1 %v13190_v8 }
 0x883   :  { %9887 = vmatprep.subr.bf16.mxu1 %v13596_v63 }
 0x884   :  { %9488 = vmatmul.mubr.msk.f32.gmra.mrb[78].mxu0 %vm4458_vm15, %v8195_v27  ;;  %v128_v27 = vld [vmem:[%s13374_s13 + $0x60] sm:$0xff] }
 0x885   :  { %9490 = vmatprep.mubr.msk.f32.mxu0 %vm10096_vm3, %v13592_v39 }
 0x888   :  { %9491 = vmatmul.mubr.msk.f32.gmra.mrb[80].mxu0 %vm4458_vm15, %v328_v16  ;;  %v13201_v16 = vpack.c.bf16 %v129_v58, %v128_v27 }
 0x889   :  { %9564 = vmatprep.mubr.msk.f32.mxu0 %vm10096_vm3, %v13592_v39 }
 0x88a   :  { %9889 = vmatpush3.bf16.msra.mxu1 %v13201_v16 }
 0x88b   :  { %9890 = vmatprep.subr.bf16.mxu1 %v13596_v63 }
 0x88e   :  { %9892 = vmatpush3.bf16.msra.mxu1 %v13211_v26 }
 0x88f   :  { %9903 = vmatprep.subr.bf16.mxu1 %v12554_v51 }
 0x8fd   :  { %v5453_v53 = vpop.f32.mrb[48].mxu0  ;;  %v5672_v30 = vpop.f32.mrb[40].mxu1 }
 0x8fe   :  { %v9322_v21 = vpop.f32.mrb[49].mxu0  ;;  %v9355_v48 = vpop.f32.mrb[41].mxu1 }
 0x905   :  { %v5525_v31 = vpop.f32.mrb[50].mxu0  ;;  %v5820_v12 = vpop.f32.mrb[42].mxu1 }
 0x906   :  { %v5526_v49 = vadd.f32 %v5525_v31, %v5453_v53  ;;  %v9333_v42 = vpop.f32.mrb[51].mxu0  ;;  %v9377_v41 = vpop.f32.mrb[43].mxu1 }
 0x90d   :  { %v5598_v54 = vpop.f32.mrb[52].mxu0  ;;  %v5968_v17 = vpop.f32.mrb[44].mxu1 }
 0x90e   :  { %v5602_v43 = vadd.f32 %v5598_v54, %v5526_v49  ;;  %v9344_v4 = vpop.f32.mrb[53].mxu0  ;;  %v9399_v3 = vpop.f32.mrb[45].mxu1 }
 0x910   :  { %v5676_v13 = vadd.f32 %v5672_v30, %v5602_v43 }
 0x915   :  { %v5746_v37 = vpop.f32.mrb[54].mxu0 }
 0x916   :  { %v5750_v57 = vadd.f32 %v5746_v37, %v5676_v13  ;;  %v9366_v60 = vpop.f32.mrb[55].mxu0 }
 0x918   :  { %v5824_v19 = vadd.f32 %v5820_v12, %v5750_v57 }
 0x91d   :  { %v5894_v45 = vpop.f32.mrb[56].mxu0 }
 0x91e   :  { %v5898_v52 = vadd.f32 %v5894_v45, %v5824_v19  ;;  %v9388_v50 = vpop.f32.mrb[57].mxu0 }
 0x920   :  { %v5972_v2 = vadd.f32 %v5968_v17, %v5898_v52 }
 0x925   :  { %v6042_v27 = vpop.f32.mrb[58].mxu0 }
 0x926   :  { %v6046_v58 = vadd.f32 %v6042_v27, %v5972_v2  ;;  %v9410_v6 = vpop.f32.mrb[59].mxu0 }
 0x928   :  { %v6047_v10 = vadd.f32 %v6046_v58, %v13218_v61 }
 0x92a   :  { %v6048_v53 = vmax.f32 %v6047_v10, 0.0 }
 0x92c   :  { %9444 = vmatmul.mubr.f32.vlgmr.msra.gmra.mrb[46].mxu1 %v6048_v53 }
 0x92d   :  { %9905 = vmatpush3.bf16.msra.mxu1 %v12554_v51 }
 0x92e   :  { %9907 = vmatprep.subr.bf16.mxu1 %v12738_v34 }
 0x933   :  { %v6211_v30 = vpop.f32.mrb[60].mxu0 }
 0x934   :  { %v9462_v21 = vpop.f32.mrb[61].mxu0 }
 0x937   :  { %v6216_v48 = vpop.f32.mrb[62].mxu0 }
 0x938   :  { %v9465_v31 = vpop.f32.mrb[63].mxu0  ;;  %v6267_v49 = vrot.slane %v6216_v48, 1 }
 0x93b   :  { %v6221_v12 = vpop.f32.mrb[64].mxu0 }
 0x93c   :  { %v6268_v42 = vrot.slane %v6221_v12, 1  ;;  %v9468_v41 = vpop.f32.mrb[65].mxu0  ;;  %v6430_v43 = vrot.slane %v6221_v12, 2 }
 0x93e   :  { %v6269_v54 = vsel %vm1496_vm7, %v6267_v49, %v6268_v42 }
 0x93f   :  { %9497 = vmatprep.mubr.msk.f32.mxu1 %vm4307_vm13, %v6269_v54  ;;  %v6226_v17 = vpop.f32.mrb[66].mxu0 }
 0x940   :  { %9498 = vmatmul.mubr.msk.f32.vlgmr.msra.gmra.mrb[48].mxu1 %vm4307_vm13, %v6268_v42  ;;  %v6431_v4 = vrot.slane %v6226_v17, 2  ;;  %v9471_v51 = vpop.f32.mrb[67].mxu0  ;;  %v6515_v3 = vrot.slane %v6226_v17, 3 }
 0x941   :  { %9504 = vmatprep.mubr.msk.f32.mxu1 %vm4307_vm13, %v6211_v30  ;;  %9909 = vmatpush3.bf16.msra.mxu1 %v12738_v34 }
 0x942   :  { %9911 = vmatprep.subr.bf16.mxu1 %v12758_v14  ;;  %v6432_v13 = vsel %vm1751_vm9, %v6430_v43, %v6431_v4 }
 0x943   :  { %v6231_v37 = vpop.f32.mrb[68].mxu0 }
 0x944   :  { %v6516_v57 = vrot.slane %v6231_v37, 3  ;;  %v9474_v60 = vpop.f32.mrb[69].mxu0  ;;  %v6600_v19 = vrot.slane %v6231_v37, 4 }
 0x946   :  { %v6517_v45 = vsel %vm1892_vm10, %v6515_v3, %v6516_v57 }
 0x947   :  { %v6236_v52 = vpop.f32.mrb[70].mxu0 }
 0x948   :  { %9505 = vmatmul.mubr.msk.f32.vlgmr.msra.gmra.mrb[48].mxu1 %vm4307_vm13, %v6216_v48  ;;  %v6601_v50 = vrot.slane %v6236_v52, 4  ;;  %v9477_v2 = vpop.f32.mrb[71].mxu0  ;;  %v6685_v34 = vrot.slane %v6236_v52, 5 }
 0x949   :  { %9913 = vmatpush3.bf16.msra.mxu1 %v12758_v14  ;;  %9511 = vmatprep.mubr.msk.f32.mxu1 %vm4307_vm13, %v6432_v13 }
 0x94a   :  { %9915 = vmatprep.subr.bf16.mxu1 %v12772_v20  ;;  %v6602_v27 = vsel %vm1140_vm6, %v6600_v19, %v6601_v50 }
 0x94b   :  { %v6241_v58 = vpop.f32.mrb[72].mxu0 }
 0x94c   :  { %v6686_v6 = vrot.slane %v6241_v58, 5  ;;  %v9480_v10 = vpop.f32.mrb[73].mxu0  ;;  %v6770_v53 = vrot.slane %v6241_v58, 6 }
 0x94e   :  { %v6687_v30 = vsel %vm2173_vm11, %v6685_v34, %v6686_v6 }
 0x94f   :  { %v6246_v21 = vpop.f32.mrb[74].mxu0 }
 0x950   :  { %9512 = vmatmul.mubr.msk.f32.vlgmr.msra.gmra.mrb[48].mxu1 %vm4307_vm13, %v6431_v4  ;;  %v6771_v48 = vrot.slane %v6246_v21, 6  ;;  %v9483_v31 = vpop.f32.mrb[75].mxu0  ;;  %v6855_v14 = vrot.slane %v6246_v21, 7 }
 0x951   :  { %9917 = vmatpush3.bf16.msra.mxu1 %v12772_v20  ;;  %9518 = vmatprep.mubr.msk.f32.mxu1 %vm4307_vm13, %v6517_v45 }
 0x952   :  { %9919 = vmatprep.subr.bf16.mxu1 %v12786_v38  ;;  %v6772_v12 = vsel %vm2314_vm12, %v6770_v53, %v6771_v48 }
 0x953   :  { %v6251_v49 = vpop.f32.mrb[76].mxu0 }
 0x954   :  { %v6856_v42 = vrot.slane %v6251_v49, 7  ;;  %v9486_v41 = vpop.f32.mrb[77].mxu0 }
 0x956   :  { %v6857_v54 = vsel %vm436_vm0, %v6855_v14, %v6856_v42 }
 0x957   :  { %v6256_v17 = vpop.f32.mrb[78].mxu0 }
 0x958   :  { %9519 = vmatmul.mubr.msk.f32.vlgmr.msra.gmra.mrb[48].mxu1 %vm4307_vm13, %v6516_v57  ;;  %v9489_v43 = vpop.f32.mrb[79].mxu0 }
 0x959   :  { %9921 = vmatpush3.bf16.msra.mxu1 %v12786_v38  ;;  %9525 = vmatprep.mubr.msk.f32.mxu1 %vm4307_vm13, %v6602_v27  ;;  %v13273_v38 = vld [vmem:[%s13375_s14] sm:$0x1]  ;;  %s10098_s14 = smov [#allocation2]  }
 0x95a   :  { %9923 = vmatprep.subr.bf16.mxu1 %v12800_v40  ;;  %s7770_s2 = sshll.u32 %s10098_s14, 4  ;;  %s7771_s2 = int_to_ptr.vmem [resolvable:$true] %s7770_s2 }
 0x95b   :  { %v6261_v20 = vpop.f32.mrb[80].mxu0  ;;  %s10070_s0 = scalar_lea.vmem %s7771_s2, 32  ;;  %p10075_p1 = scmp.lt.s32.totalorder %s7771_s2, %s7771_s2 }
 0x95c   :  { %v9492_v4 = vpop.f32.mrb[81].mxu0  ;;  %p10071_p0 = scmp.ne.s32.totalorder %s7771_s2, %s10070_s0  ;;  %p10076_p2 = scmp.lt.s32.totalorder %s10070_s0, %s10070_s0 }
 0x95e   :  { %p10077_p3 = por %p10076_p2, %p10075_p1 }
 0x960   :  { %9526 = vmatmul.mubr.msk.f32.vlgmr.msra.gmra.mrb[48].mxu1 %vm4307_vm13, %v6601_v50  ;;  %p10078_p4 = pnand %p10077_p3, %p10071_p0 }
 0x961   :  { %9925 = vmatpush3.bf16.msra.mxu1 %v12800_v40  ;;  %9532 = vmatprep.mubr.msk.f32.mxu1 %vm4307_vm13, %v6687_v30 }
 0x962   :  { %9927 = vmatprep.subr.bf16.mxu1 %v12813_v55 }
 0x968   :  { %9533 = vmatmul.mubr.msk.f32.vlgmr.msra.gmra.mrb[48].mxu1 %vm4307_vm13, %v6686_v6 }
 0x969   :  { %9929 = vmatpush3.bf16.msra.mxu1 %v12813_v55  ;;  %9539 = vmatprep.mubr.msk.f32.mxu1 %vm4307_vm13, %v6772_v12 }
 0x96a   :  { %9931 = vmatprep.subr.bf16.mxu1 %v12825_v33 }
 0x970   :  { %9540 = vmatmul.mubr.msk.f32.vlgmr.msra.gmra.mrb[48].mxu1 %vm4307_vm13, %v6771_v48 }
 0x971   :  { %9933 = vmatpush3.bf16.msra.mxu1 %v12825_v33  ;;  %9546 = vmatprep.mubr.msk.f32.mxu1 %vm4307_vm13, %v6857_v54 }
 0x972   :  { %9935 = vmatprep.subr.bf16.mxu1 %v12837_v5 }
 0x978   :  { %9547 = vmatmul.mubr.msk.f32.vlgmr.msra.gmra.mrb[48].mxu1 %vm4307_vm13, %v6856_v42 }
 0x979   :  { %9937 = vmatpush3.bf16.msra.mxu1 %v12837_v5  ;;  %9553 = vmatprep.mubr.msk.f32.mxu1 %vm4307_vm13, %v6256_v17 }
 0x97a   :  { %9950 = vmatprep.subr.bf16.mxu1 %v13596_v63 }
 0x980   :  { %9554 = vmatmul.mubr.msk.f32.vlgmr.msra.gmra.mrb[48].mxu1 %vm4307_vm13, %v6261_v20 }
 0x981   :  { %9952 = vmatpush3.bf16.msra.mxu1 %v12948_v9  ;;  %9586 = vmatprep.mubr.msk.f32.mxu1 %vm10096_vm3, %v13592_v39 }
 0x982   :  { %9953 = vmatprep.subr.bf16.mxu1 %v13596_v63 }
 0x985   :  { %9955 = vmatpush3.bf16.msra.mxu1 %v12972_v28 }
 0x986   :  { %9962 = vmatprep.subr.bf16.mxu1 %v13596_v63 }
 0x9ff   :  { %v6115_v40 = vpop.f32.mrb[46].mxu1 }
 0xa00   :  { %v6116_v55 = vadd.f32 %v6115_v40, %v13273_v38  ;;  %v9445_v33 = vpop.f32.mrb[47].mxu1 }
 0xa02   :  { %10057 = vtanh.f32 %v6116_v55 }
 0xa0c   :  { %v10058_v5 = vpop.eup %10057 }
 0xa0d   :  { %6120 = vst.msk [vmem:[#allocation2] sm:$0x1] %vm4319_vm14, %v10058_v5 }
 0xa53   :  { %v9555_v9 = vpop.f32.mrb[48].mxu1 }
 0xa54   :  { %v7011_v51 = vpop.f32.mrb[49].mxu1 }
 0xa55   :  { %v7022_v3 = vadd.f32 %v12883_v29, %v7011_v51 }
 0xa57   :  { %v7024_v28 = vmax.f32 %v7022_v3, 0.0 }
 0xa59   :  { %v7027_v13 = vrot.slane %v7024_v28, 1  ;;  %v7172_v37 = vrot.slane %v7024_v28, 2  ;;  %v7320_v57 = vrot.slane %v7024_v28, 4 }
 0xa5b   :  { %9565 = vmatmul.mubr.msk.f32.vlgmr.msra.gmra.mrb[82].mxu0 %vm5384_vm1, %v7027_v13  ;;  %9587 = vmatmul.mubr.msk.f32.vlgmr.msra.gmra.mrb[50].mxu1 %vm5384_vm1, %v7172_v37 }
 0xa5c   :  { %9946 = vmatpush3.bf16.msra.mxu0 %v12902_v7  ;;  %9964 = vmatpush3.bf16.msra.mxu1 %v12990_v24  ;;  %v7246_v7 = vrot.slane %v7024_v28, 3 }
 0xa5d   :  { %9947 = vmatprep.subr.bf16.mxu0 %v13596_v63  ;;  %9965 = vmatprep.subr.bf16.mxu1 %v13596_v63 }
 0xa5e   :  { %9575 = vmatprep.mubr.msk.f32.mxu0 %vm10096_vm3, %v13592_v39  ;;  %9608 = vmatprep.mubr.msk.f32.mxu1 %vm10096_vm3, %v13592_v39 }
 0xa60   :  { %9949 = vmatpush3.bf16.msra.mxu0 %v12924_v23  ;;  %9967 = vmatpush3.bf16.msra.mxu1 %v13005_v56  ;;  %v7023_v23 = vadd.f32 %v9555_v9, %v12883_v29  ;;  %v7542_v29 = vrot.slane %v7024_v28, 7 }
 0xa61   :  { %9956 = vmatprep.subr.bf16.mxu0 %v13596_v63  ;;  %9974 = vmatprep.subr.bf16.mxu1 %v13596_v63 }
 0xa63   :  { %9576 = vmatmul.mubr.msk.f32.vlgmr.msra.gmra.mrb[84].mxu0 %vm5384_vm1, %v7024_v28  ;;  %9609 = vmatmul.mubr.msk.f32.vlgmr.msra.gmra.mrb[52].mxu1 %vm5384_vm1, %v7320_v57 }
 0xa64   :  { %9958 = vmatpush3.bf16.msra.mxu0 %v12856_v22  ;;  %9976 = vmatpush3.bf16.msra.mxu1 %v13019_v62  ;;  %v7468_v22 = vrot.slane %v7024_v28, 6 }
 0xa65   :  { %9959 = vmatprep.subr.bf16.mxu0 %v13596_v63  ;;  %9977 = vmatprep.subr.bf16.mxu1 %v13596_v63 }
 0xa66   :  { %9597 = vmatprep.mubr.msk.f32.mxu0 %vm10096_vm3, %v13592_v39  ;;  %9630 = vmatprep.mubr.msk.f32.mxu1 %vm10096_vm3, %v13592_v39 }
 0xa68   :  { %9961 = vmatpush3.bf16.msra.mxu0 %v12874_v1  ;;  %9979 = vmatpush3.bf16.msra.mxu1 %v13031_v11  ;;  %v7025_v1 = vmax.f32 %v7023_v23, 0.0 }
 0xa69   :  { %9968 = vmatprep.subr.bf16.mxu0 %v13596_v63  ;;  %9986 = vmatprep.subr.bf16.mxu1 %v13596_v63 }
 0xa6b   :  { %9598 = vmatmul.mubr.msk.f32.vlgmr.msra.gmra.mrb[86].mxu0 %vm5384_vm1, %v7246_v7  ;;  %9631 = vmatmul.mubr.msk.f32.vlgmr.msra.gmra.mrb[54].mxu1 %vm5384_vm1, %v7468_v22 }
 0xa6c   :  { %9970 = vmatpush3.bf16.msra.mxu0 %v12904_v18  ;;  %9988 = vmatpush3.bf16.msra.mxu1 %v13043_v36  ;;  %v7394_v18 = vrot.slane %v7024_v28, 5 }
 0xa6d   :  { %9971 = vmatprep.subr.bf16.mxu0 %v13596_v63  ;;  %9989 = vmatprep.subr.bf16.mxu1 %v13596_v63 }
 0xa6e   :  { %9619 = vmatprep.mubr.msk.f32.mxu0 %vm10096_vm3, %v13592_v39  ;;  %9652 = vmatprep.mubr.msk.f32.mxu1 %vm10096_vm3, %v13592_v39 }
 0xa70   :  { %9973 = vmatpush3.bf16.msra.mxu0 %v12926_v47  ;;  %9991 = vmatpush3.bf16.msra.mxu1 %v13055_v32 }
 0xa71   :  { %9980 = vmatprep.subr.bf16.mxu0 %v13596_v63 }
 0xa73   :  { %9620 = vmatmul.mubr.msk.f32.vlgmr.msra.gmra.mrb[88].mxu0 %vm5384_vm1, %v7394_v18  ;;  %9653 = vmatmul.mubr.msk.f32.vlgmr.msra.gmra.mrb[56].mxu1 %vm5384_vm1, %v7025_v1 }
 0xa74   :  { %9982 = vmatpush3.bf16.msra.mxu0 %v12950_v25  ;;  %9641 = vmatprep.mubr.msk.f32.mxu0 %vm10096_vm3, %v13592_v39 }
 0xa75   :  { %9983 = vmatprep.subr.bf16.mxu0 %v13596_v63 }
 0xa78   :  { %9985 = vmatpush3.bf16.msra.mxu0 %v12974_v59 }
 0xa79   :  { %9992 = vmatprep.subr.bf16.mxu0 %v13596_v63 }
 0xa7b   :  { %9642 = vmatmul.mubr.msk.f32.vlgmr.msra.gmra.mrb[90].mxu0 %vm5384_vm1, %v7542_v29 }
 0xa7c   :  { %9994 = vmatpush3.bf16.msra.mxu0 %v13144_v46  ;;  %9687 = vmatprep.mubr.msk.f32.mxu0 %vm10096_vm3, %v13592_v39 }
 0xa7d   :  { %9995 = vmatprep.subr.bf16.mxu0 %v13596_v63 }
 0xa80   :  { %9997 = vmatpush3.bf16.msra.mxu0 %v13150_v15 }
 0xa81   :  { %9998 = vmatprep.subr.bf16.mxu0 %v13596_v63 }
 0xa84   :  { %10000 = vmatpush3.bf16.msra.mxu0 %v13164_v44 }
 0xa85   :  { %10001 = vmatprep.subr.bf16.mxu0 %v13596_v63 }
 0xa88   :  { %10003 = vmatpush3.bf16.msra.mxu0 %v13170_v0 }
 0xa89   :  { %10004 = vmatprep.subr.bf16.mxu0 %v13596_v63 }
 0xa8c   :  { %10006 = vmatpush3.bf16.msra.mxu0 %v13184_v35 }
 0xa8d   :  { %10007 = vmatprep.subr.bf16.mxu0 %v13596_v63 }
 0xa90   :  { %10009 = vmatpush3.bf16.msra.mxu0 %v13190_v8 }
 0xa91   :  { %10010 = vmatprep.subr.bf16.mxu0 %v13596_v63 }
 0xa94   :  { %10012 = vmatpush3.bf16.msra.mxu0 %v13201_v16 }
 0xa95   :  { %10013 = vmatprep.subr.bf16.mxu0 %v13596_v63 }
 0xa98   :  { %10015 = vmatpush3.bf16.msra.mxu0 %v13211_v26 }
 0xb2e   :  { %v7096_v39 = vpop.f32.mrb[82].mxu0  ;;  %v7241_v47 = vpop.f32.mrb[50].mxu1 }
 0xb2f   :  { %v9566_v25 = vpop.f32.mrb[83].mxu0  ;;  %v9588_v59 = vpop.f32.mrb[51].mxu1 }
 0xb36   :  { %v7168_v24 = vpop.f32.mrb[84].mxu0  ;;  %v7389_v56 = vpop.f32.mrb[52].mxu1 }
 0xb37   :  { %v7169_v62 = vadd.f32 %v7168_v24, %v7096_v39  ;;  %v9577_v11 = vpop.f32.mrb[85].mxu0  ;;  %v9610_v36 = vpop.f32.mrb[53].mxu1 }
 0xb39   :  { %v7245_v32 = vadd.f32 %v7241_v47, %v7169_v62 }
 0xb3e   :  { %v7315_v46 = vpop.f32.mrb[86].mxu0  ;;  %v7537_v15 = vpop.f32.mrb[54].mxu1 }
 0xb3f   :  { %v7319_v44 = vadd.f32 %v7315_v46, %v7245_v32  ;;  %v9599_v0 = vpop.f32.mrb[87].mxu0  ;;  %v9632_v35 = vpop.f32.mrb[55].mxu1 }
 0xb41   :  { %v7393_v8 = vadd.f32 %v7389_v56, %v7319_v44 }
 0xb46   :  { %v7463_v16 = vpop.f32.mrb[88].mxu0  ;;  %v7685_v63 = vpop.f32.mrb[56].mxu1 }
 0xb47   :  { %v7467_v60 = vadd.f32 %v7463_v16, %v7393_v8  ;;  %v9621_v26 = vpop.f32.mrb[89].mxu0  ;;  %v9654_v19 = vpop.f32.mrb[57].mxu1 }
 0xb49   :  { %v7541_v45 = vadd.f32 %v7537_v15, %v7467_v60 }
 0xb4e   :  { %v7611_v52 = vpop.f32.mrb[90].mxu0 }
 0xb4f   :  { %v7615_v50 = vadd.f32 %v7611_v52, %v7541_v45  ;;  %v9643_v2 = vpop.f32.mrb[91].mxu0 }
 0xb51   :  { %v7689_v34 = vadd.f32 %v7685_v63, %v7615_v50 }
 0xb53   :  { %v7690_v27 = vadd.f32 %v7689_v34, %v13218_v61 }
 0xb55   :  { %v7691_v58 = vmax.f32 %v7690_v27, 0.0 }
 0xb57   :  { %9688 = vmatmul.mubr.f32.vlgmr.msra.gmra.mrb[92].mxu0 %v7691_v58 }
 0xc2a   :  { %v7758_v6 = vpop.f32.mrb[92].mxu0 }
 0xc2b   :  { %v7759_v10 = vadd.f32 %v7758_v6, %v13273_v38  ;;  %v9689_v53 = vpop.f32.mrb[93].mxu0 }
 0xc2d   :  { %10059 = vtanh.f32 %v7759_v10 }
 0xc37   :  { %v10060_v30 = vpop.eup %10059 }
 0xc38   :  { %7763 = vst.msk [vmem:[#allocation2 + $0x1] sm:$0x1] %vm4319_vm14, %v10060_v30 }
 0xc39   :  { %10081 = shalt.err (!%p10078_p4)
}
 0xc3a   :  { %s10082_s7 = scalar_lea.hbm %s13376_s15, 32 }
 0xc3b   :  { %p10083_p5 = scmp.ne.s32.totalorder %s13376_s15, %s10082_s7  ;;  %p10086_p6 = scmp.lt.u32.totalorder %s10082_s7, %s13376_s15 }
 0xc3d   :  { %p10088_p7 = pnand %p10086_p6, %p10083_p5 }
 0xc3f   :  { %10091 = shalt.err (!%p10088_p7)
}
 0xc40   :  { %7773 = dma.vmem_to_hbm [thread:$0]  %s7771_s2, 32, %s13376_s15, [#allocation3]  }
 0xc41   :  { %10092 = dma.done.wait [#allocation3], 32  }
 0xc42   :  { %10093 = vsyncadd [#allocation3], 4294967264 }
 0xc43   :  { %7777 = vsyncpa [#allocation3], 1 }

</bundles_post_ra>
